<compile_context>
chip_gen: v7x
topology: tpu7x:2x2x1
jax: 0.10.0
libtpu: 0.0.40
codegen_flags: <defaults>
</compile_context>

<pallas_src>
import functools

import jax
import jax.numpy as jnp
from jax import lax
from jax.experimental import pallas as pl
from jax.experimental.pallas import tpu as pltpu

_B_BLK = 8      # batch rows per grid step (one f32 sublane tile)
_LANE = 128     # lane width; each gate slab is padded to a multiple of this


def _round_up(x, m):
    return (x + m - 1) // m * m


# ----------------------------------------------------------------------------
# Fused kernel: stacked LSTM + concat(first, last) + Linear head.
# Refs: (x, [w_ih, w_hh, bias] * L, out_w, out_b, logits, gx_scratch, seq_scratch)
# ----------------------------------------------------------------------------
def _fused_lstm_kernel(*refs, num_layers, hidden_p, seq_len, batch_blk, embed_dim,
                       unroll):
    x_ref = refs[0]
    layer_refs = refs[1:1 + 3 * num_layers]
    out_w_ref = refs[1 + 3 * num_layers]
    out_b_ref = refs[2 + 3 * num_layers]
    o_ref = refs[3 + 3 * num_layers]
    gx_scr = refs[4 + 3 * num_layers]     # (T*B, 4Hp) f32: whole-sequence projections
    seq_scr = refs[5 + 3 * num_layers]    # (T*B, Hp)  f32: current layer's output seq

    Hp, T, B = hidden_p, seq_len, batch_blk
    h_first = h_final = None

    for layer in range(num_layers):
        is_last = layer == num_layers - 1
        w_ih = layer_refs[3 * layer][...]          # (D_in, 4Hp) bf16
        w_hh = layer_refs[3 * layer + 1][...]      # (Hp, 4Hp)   bf16
        bias = layer_refs[3 * layer + 2][...]      # (1, 4Hp)    f32

        # --- Prologue: ONE MXU matmul for the whole sequence, off the recurrent path.
        if layer == 0:
            xin = x_ref[...].reshape(T * B, embed_dim).astype(jnp.bfloat16)
        else:
            xin = seq_scr[...].astype(jnp.bfloat16)
        gx_scr[...] = (
            jnp.dot(xin, w_ih, preferred_element_type=jnp.float32) + bias
        )  # (T*B, 4Hp) f32, lane-dense store

        # --- Gate math (f32 everywhere; gate slabs are 128-lane aligned views).
        def cell(gates, c_prev):
            sig = jax.nn.sigmoid(gates[:, : 3 * Hp])
            i_g = sig[:, 0 * Hp:1 * Hp]
            f_g = sig[:, 1 * Hp:2 * Hp]
            o_g = sig[:, 2 * Hp:3 * Hp]
            g_g = jnp.tanh(gates[:, 3 * Hp:])
            c_new = f_g * c_prev + i_g * g_g
            h_new = o_g * jnp.tanh(c_new)
            return h_new, c_new

        zeros = jnp.zeros((B, Hp), jnp.float32)

        # t = 0 peeled: h_prev = c_prev = 0, so the W_hh matmul is skipped entirely.
        h0, c0 = cell(gx_scr[pl.ds(0, B), :], zeros)
        if not is_last:
            seq_scr[pl.ds(0, B), :] = h0

        # --- Serial recurrence: only h_prev @ W_hh per step, (h, c) carried in regs.
        def body(t, carry):
            h_prev, c_prev = carry
            row = pl.multiple_of(t * B, B)
            gates = gx_scr[pl.ds(row, B), :] + jnp.dot(
                h_prev.astype(jnp.bfloat16), w_hh,
                preferred_element_type=jnp.float32)
            h_new, c_new = cell(gates, c_prev)
            if not is_last:
                seq_scr[pl.ds(row, B), :] = h_new   # next layer's input sequence
            return (h_new, c_new)

        h_T, _ = lax.fori_loop(1, T, body, (h0, c0), unroll=unroll)

        if is_last:
            h_first, h_final = h0, h_T

    # --- Head: encoding = concat(outputs[0], outputs[-1]); logits = enc @ W_out + b.
    encoding = jnp.concatenate([h_first, h_final], axis=-1)   # (B, 2Hp)
    o_ref[...] = (
        jnp.dot(encoding, out_w_ref[...], preferred_element_type=jnp.float32)
        + out_b_ref[...]
    )


def fused_lstm_forward(x, lstm_layers, out_w, out_b, *, b_blk=_B_BLK):
    """x: (T, B_pad, E) f32 embeddings (B_pad % b_blk == 0) -> (B_pad, O) f32 logits."""
    T, B_pad, E = x.shape
    assert B_pad % b_blk == 0
    Hp = lstm_layers[0]["w_hh"].shape[0]
    L = len(lstm_layers)
    O = out_w.shape[1]

    operands = [x]
    in_specs = [pl.BlockSpec((T, b_blk, E), lambda b: (0, b, 0))]
    for layer in lstm_layers:
        d_in = layer["w_ih"].shape[0]
        operands += [layer["w_ih"], layer["w_hh"], layer["bias"]]
        in_specs += [
            pl.BlockSpec((d_in, 4 * Hp), lambda b: (0, 0)),   # W_ih (resident, bf16)
            pl.BlockSpec((Hp, 4 * Hp), lambda b: (0, 0)),     # W_hh (resident, bf16)
            pl.BlockSpec((1, 4 * Hp), lambda b: (0, 0)),      # combined bias (f32)
        ]
    operands += [out_w, out_b]
    in_specs += [
        pl.BlockSpec((2 * Hp, O), lambda b: (0, 0)),
        pl.BlockSpec((1, O), lambda b: (0, 0)),
    ]

    # Resident VMEM budget (bf16 weights, pipelined x/out blocks, f32 scratch) + headroom.
    weight_bytes = sum(l["w_ih"].size * 2 + l["w_hh"].size * 2 + l["bias"].size * 4
                       for l in lstm_layers)
    weight_bytes += out_w.size * 4 + out_b.size * 4
    block_bytes = 2 * (T * b_blk * E * 4 + b_blk * O * 4)     # double-buffered blocks
    scratch_bytes = T * b_blk * 4 * Hp * 4 + T * b_blk * Hp * 4
    vmem_limit = int(min(100 * 2 ** 20,
                         max(32 * 2 ** 20,
                             1.5 * (weight_bytes + block_bytes + scratch_bytes))))

    kernel = functools.partial(
        _fused_lstm_kernel, num_layers=L, hidden_p=Hp, seq_len=T,
        batch_blk=b_blk, embed_dim=E,
        unroll=True if T <= 16 else 8)

    return pl.pallas_call(
        kernel,
        out_shape=jax.ShapeDtypeStruct((B_pad, O), jnp.float32),
        grid=(B_pad // b_blk,),
        in_specs=in_specs,
        out_specs=pl.BlockSpec((b_blk, O), lambda b: (b, 0)),
        scratch_shapes=[
            pltpu.VMEM((T * b_blk, 4 * Hp), jnp.float32),   # whole-seq gate projections
            pltpu.VMEM((T * b_blk, Hp), jnp.float32),       # inter-layer activations
        ],
        compiler_params=pltpu.CompilerParams(
            dimension_semantics=("parallel",),              # batch blocks -> 2 TCs on v7x
            vmem_limit_bytes=vmem_limit,
        ),
    )(*operands)


# ----------------------------------------------------------------------------
# Full model forward (mirrors the PyTorch LSTM module's forward()).
# ----------------------------------------------------------------------------
@jax.jit
def lstm_model_forward(params, token_ids):
    """token_ids: (B, T) int32 -> logits (B, output_dim)."""
    # TODO(synk): embedding gather stays in plain JAX (jnp.take); a DMA-gather Pallas
    # kernel is not worthwhile at these shapes.
    ids_tb = token_ids.T                                   # inputs.permute(1, 0)
    x = jnp.take(params["embed"], ids_tb, axis=0).astype(jnp.float32)   # (T, B, E)
    T, B, E = x.shape
    B_pad = _round_up(B, _B_BLK)
    if B_pad != B:                                         # pad batch to 8-sublane tiles
        x = jnp.pad(x, ((0, 0), (0, B_pad - B), (0, 0)))
    logits = fused_lstm_forward(x, params["lstm"], params["out_w"], params["out_b"])
    return logits[:B]


# ----------------------------------------------------------------------------
# Parameter construction / packing (PyTorch layout -> kernel layout).
# ----------------------------------------------------------------------------
def _pack_lstm_layer(w_ih_pt, w_hh_pt, b_ih_pt, b_hh_pt, *, in_rows_pad, lane=_LANE):
    """PyTorch per-layer params (gate order i,f,g,o; shapes (4H,D)/(4H,H)/(4H,)) ->
    kernel layout: transposed for x@W, gate columns reordered to (i,f,o,g) with each
    gate slab zero-padded to a 128-lane multiple, biases folded into one (1,4Hp) row.
    Padded gate columns have zero weights+bias, so their hidden state stays exactly 0."""
    fourH, D = w_ih_pt.shape
    H = fourH // 4
    Hp = _round_up(H, lane)

    def reorder_pad_cols(w):            # (rows, 4H) -> (rows, 4Hp), gate order i,f,o,g
        rows = w.shape[0]
        out = jnp.zeros((rows, 4 * Hp), jnp.float32)
        for dst, src in enumerate((0, 1, 3, 2)):            # i, f, o, g  (from i,f,g,o)
            out = out.at[:, dst * Hp: dst * Hp + H].set(w[:, src * H:(src + 1) * H])
        return out

    w_ih = reorder_pad_cols(w_ih_pt.T)                      # (D, 4Hp)
    if in_rows_pad > D:                                     # pad input rows (layers > 0)
        w_ih = jnp.zeros((in_rows_pad, 4 * Hp), jnp.float32).at[:D].set(w_ih)
    w_hh = reorder_pad_cols(w_hh_pt.T)                      # (H, 4Hp)
    w_hh = jnp.zeros((Hp, 4 * Hp), jnp.float32).at[:H].set(w_hh)
    bias = reorder_pad_cols((b_ih_pt + b_hh_pt).reshape(1, 4 * H))   # (1, 4Hp)

    return {"w_ih": w_ih.astype(jnp.bfloat16),
            "w_hh": w_hh.astype(jnp.bfloat16),
            "bias": bias}


def _pack_head(out_w_pt, out_b_pt, H, Hp):
    """nn.Linear(2H, O) weight (O, 2H) -> (2Hp, O), rows [0:H] for outputs[0] and
    [Hp:Hp+H] for outputs[-1]; padded rows are zero."""
    O = out_w_pt.shape[0]
    w = out_w_pt.T.astype(jnp.float32)                      # (2H, O)
    w_pad = jnp.zeros((2 * Hp, O), jnp.float32)
    w_pad = w_pad.at[:H].set(w[:H])
    w_pad = w_pad.at[Hp:Hp + H].set(w[H:])
    return w_pad, out_b_pt.reshape(1, O).astype(jnp.float32)


def pack_params(pt):
    H = pt["layers"][0]["w_hh"].shape[1]
    Hp = _round_up(H, _LANE)
    E = pt["embed"].shape[1]
    layers = []
    for li, layer in enumerate(pt["layers"]):
        in_rows = E if li == 0 else Hp
        layers.append(_pack_lstm_layer(layer["w_ih"], layer["w_hh"],
                                       layer["b_ih"], layer["b_hh"],
                                       in_rows_pad=in_rows))
    out_w, out_b = _pack_head(pt["out_w"], pt["out_b"], H, Hp)
    return {"embed": pt["embed"], "lstm": layers, "out_w": out_w, "out_b": out_b}


def init_pt_params(key, vocab_size, embed_dim, num_hiddens, num_layers, output_dim):
    keys = iter(jax.random.split(key, 1 + 4 * num_layers + 2))
    pt = {"embed": 0.1 * jax.random.normal(next(keys), (vocab_size, embed_dim),
                                           jnp.float32)}
    layers = []
    in_dim = embed_dim
    for _ in range(num_layers):
        layers.append({
            "w_ih": 0.1 * jax.random.normal(next(keys), (4 * num_hiddens, in_dim), jnp.float32),
            "w_hh": 0.1 * jax.random.normal(next(keys), (4 * num_hiddens, num_hiddens), jnp.float32),
            "b_ih": 0.1 * jax.random.normal(next(keys), (4 * num_hiddens,), jnp.float32),
            "b_hh": 0.1 * jax.random.normal(next(keys), (4 * num_hiddens,), jnp.float32),
        })
        in_dim = num_hiddens
    pt["layers"] = layers
    pt["out_w"] = 0.1 * jax.random.normal(next(keys), (output_dim, 2 * num_hiddens), jnp.float32)
    pt["out_b"] = 0.1 * jax.random.normal(next(keys), (output_dim,), jnp.float32)
    return pt


# ----------------------------------------------------------------------------
# Pure-JAX reference in the PyTorch layout (LSTM weights round-tripped through bf16
# to match the kernel's MXU operand precision; f32 everywhere else).
# ----------------------------------------------------------------------------
def reference_forward(pt, token_ids):
    x = jnp.take(pt["embed"], token_ids.T, axis=0)          # (T, B, E)
    h_seq = x
    for layer in pt["layers"]:
        w_ih = layer["w_ih"].astype(jnp.bfloat16).astype(jnp.float32)
        w_hh = layer["w_hh"].astype(jnp.bfloat16).astype(jnp.float32)
        b = layer["b_ih"] + layer["b_hh"]
        H = w_hh.shape[1]
        B = x.shape[1]

        def step(carry, x_t, w_ih=w_ih, w_hh=w_hh, b=b, H=H):
            h, c = carry
            g = x_t @ w_ih.T + h @ w_hh.T + b
            i = jax.nn.sigmoid(g[:, 0 * H:1 * H])
            f = jax.nn.sigmoid(g[:, 1 * H:2 * H])
            gg = jnp.tanh(g[:, 2 * H:3 * H])
            o = jax.nn.sigmoid(g[:, 3 * H:4 * H])
            c = f * c + i * gg
            h = o * jnp.tanh(c)
            return (h, c), h

        (_, _), h_seq = lax.scan(step, (jnp.zeros((B, H)), jnp.zeros((B, H))), h_seq)
    enc = jnp.concatenate([h_seq[0], h_seq[-1]], axis=-1)
    return enc @ pt["out_w"].T + pt["out_b"]


if __name__ == "__main__":
    vocab_size = 100
    embed_dim = 32
    num_hiddens = 32
    num_layers = 2
    output_dim = 4
    batch = 2
    seq_len = 8

    key = jax.random.PRNGKey(0)
    pkey, dkey = jax.random.split(key)
    pt_params = init_pt_params(pkey, vocab_size, embed_dim, num_hiddens, num_layers,
                               output_dim)
    params = pack_params(pt_params)

    # Token ids, shape (B, T) like the PyTorch `inputs`.
    token_ids = jax.random.randint(dkey, (batch, seq_len), 0, vocab_size, dtype=jnp.int32)

    logits = lstm_model_forward(params, token_ids)
    jax.block_until_ready(logits)

    assert logits.shape == (batch, output_dim)
    assert logits.dtype == jnp.float32
    assert bool(jnp.all(jnp.isfinite(logits)))

    # Numerical check vs the pure-JAX reference (bf16 operand rounding only).
    ref = reference_forward(pt_params, token_ids)
    assert bool(jnp.max(jnp.abs(logits - ref)) < 2e-2), (logits, ref)

    print("KERNEL_OK")
</pallas_src>

<mosaic_0001>
module attributes {stable_mosaic.version = 11 : i64} {
  func.func @_fused_lstm_kernel(%arg0: i32, %arg1: memref<8x8x32xf32, #tpu.memory_space<vmem>>, %arg2: memref<32x512xbf16, #tpu.memory_space<vmem>>, %arg3: memref<128x512xbf16, #tpu.memory_space<vmem>>, %arg4: memref<1x512xf32, #tpu.memory_space<vmem>>, %arg5: memref<128x512xbf16, #tpu.memory_space<vmem>>, %arg6: memref<128x512xbf16, #tpu.memory_space<vmem>>, %arg7: memref<1x512xf32, #tpu.memory_space<vmem>>, %arg8: memref<256x4xf32, #tpu.memory_space<vmem>>, %arg9: memref<1x4xf32, #tpu.memory_space<vmem>>, %arg10: memref<8x4xf32, #tpu.memory_space<vmem>>, %arg11: memref<64x512xf32, #tpu.memory_space<vmem>>, %arg12: memref<64x128xf32, #tpu.memory_space<vmem>>) attributes {dimension_semantics = [#tpu.dimension_semantics<parallel>], iteration_bounds = array<i64: 1>, scalar_prefetch = 0 : i64, scratch_operands = 2 : i64, tpu.core_type = #tpu.core_type<tc>, window_params = [{transform_indices = @transform_0, window_bounds = array<i64: 8, 8, 32>}, {pipeline_mode = #tpu.pipeline_mode<synchronous>, transform_indices = @transform_1, window_bounds = array<i64: 32, 512>}, {pipeline_mode = #tpu.pipeline_mode<synchronous>, transform_indices = @transform_2, window_bounds = array<i64: 128, 512>}, {pipeline_mode = #tpu.pipeline_mode<synchronous>, transform_indices = @transform_3, window_bounds = array<i64: 1, 512>}, {pipeline_mode = #tpu.pipeline_mode<synchronous>, transform_indices = @transform_4, window_bounds = array<i64: 128, 512>}, {pipeline_mode = #tpu.pipeline_mode<synchronous>, transform_indices = @transform_5, window_bounds = array<i64: 128, 512>}, {pipeline_mode = #tpu.pipeline_mode<synchronous>, transform_indices = @transform_6, window_bounds = array<i64: 1, 512>}, {pipeline_mode = #tpu.pipeline_mode<synchronous>, transform_indices = @transform_7, window_bounds = array<i64: 256, 4>}, {pipeline_mode = #tpu.pipeline_mode<synchronous>, transform_indices = @transform_8, window_bounds = array<i64: 1, 4>}, {transform_indices = @transform_9, window_bounds = array<i64: 8, 4>}]} {
    %c0 = arith.constant 0 : index
    %c0_0 = arith.constant 0 : index
    %0 = vector.load %arg2[%c0, %c0_0] : memref<32x512xbf16, #tpu.memory_space<vmem>>, vector<32x512xbf16>
    %c0_1 = arith.constant 0 : index
    %c0_2 = arith.constant 0 : index
    %1 = vector.load %arg3[%c0_1, %c0_2] : memref<128x512xbf16, #tpu.memory_space<vmem>>, vector<128x512xbf16>
    %c0_3 = arith.constant 0 : index
    %c0_4 = arith.constant 0 : index
    %2 = vector.load %arg4[%c0_3, %c0_4] : memref<1x512xf32, #tpu.memory_space<vmem>>, vector<1x512xf32>
    %c0_5 = arith.constant 0 : index
    %c0_6 = arith.constant 0 : index
    %c0_7 = arith.constant 0 : index
    %3 = vector.load %arg1[%c0_5, %c0_6, %c0_7] : memref<8x8x32xf32, #tpu.memory_space<vmem>>, vector<8x8x32xf32>
    %4 = vector.shape_cast %3 : vector<8x8x32xf32> to vector<64x32xf32>
    %5 = arith.truncf %4 : vector<64x32xf32> to vector<64x32xbf16>
    %cst = arith.constant dense<0.000000e+00> : vector<64x512xf32>
    %6 = tpu.matmul %5, %0, %cst {dimension_numbers = #tpu.dot_dimension_numbers<[1], [0], [0], [1], [0, 0, 1, 1], [], []>} : vector<64x32xbf16>, vector<32x512xbf16>, vector<64x512xf32> -> vector<64x512xf32>
    %7 = vector.broadcast %2 : vector<1x512xf32> to vector<64x512xf32>
    %8 = arith.addf %6, %7 : vector<64x512xf32>
    %c0_8 = arith.constant 0 : index
    %c0_9 = arith.constant 0 : index
    %9 = vector.load %arg11[%c0_8, %c0_9] : memref<64x512xf32, #tpu.memory_space<vmem>>, vector<64x512xf32>
    tpu.vector_store %arg11[%c0_8, %c0_9], %8 {strides = array<i32>} : memref<64x512xf32, #tpu.memory_space<vmem>>, vector<64x512xf32>,
    %cst_10 = arith.constant 0.000000e+00 : f32
    %10 = vector.broadcast %cst_10 : f32 to vector<8x128xf32>
    %c0_11 = arith.constant 0 : index
    %c0_12 = arith.constant 0 : index
    %11 = vector.load %arg11[%c0_11, %c0_12] : memref<64x512xf32, #tpu.memory_space<vmem>>, vector<8x512xf32>
    %12 = vector.extract_strided_slice %11 {offsets = [0, 0], sizes = [8, 384], strides = [1, 1]} : vector<8x512xf32> to vector<8x384xf32>
    %13 = arith.negf %12 : vector<8x384xf32>
    %14 = math.exp %13 : vector<8x384xf32>
    %cst_13 = arith.constant 1.000000e+00 : f32
    %15 = vector.broadcast %cst_13 : f32 to vector<8x384xf32>
    %16 = arith.addf %15, %14 : vector<8x384xf32>
    %17 = arith.divf %15, %16 : vector<8x384xf32>
    %18 = vector.extract_strided_slice %17 {offsets = [0, 0], sizes = [8, 128], strides = [1, 1]} : vector<8x384xf32> to vector<8x128xf32>
    %19 = vector.extract_strided_slice %17 {offsets = [0, 128], sizes = [8, 128], strides = [1, 1]} : vector<8x384xf32> to vector<8x128xf32>
    %20 = vector.extract_strided_slice %17 {offsets = [0, 256], sizes = [8, 128], strides = [1, 1]} : vector<8x384xf32> to vector<8x128xf32>
    %21 = vector.extract_strided_slice %11 {offsets = [0, 384], sizes = [8, 128], strides = [1, 1]} : vector<8x512xf32> to vector<8x128xf32>
    %22 = math.tanh %21 : vector<8x128xf32>
    %23 = arith.mulf %19, %10 : vector<8x128xf32>
    %24 = arith.mulf %18, %22 : vector<8x128xf32>
    %25 = arith.addf %23, %24 : vector<8x128xf32>
    %26 = math.tanh %25 : vector<8x128xf32>
    %27 = arith.mulf %20, %26 : vector<8x128xf32>
    %c0_14 = arith.constant 0 : index
    %c0_15 = arith.constant 0 : index
    %28 = vector.load %arg12[%c0_14, %c0_15] : memref<64x128xf32, #tpu.memory_space<vmem>>, vector<8x128xf32>
    tpu.vector_store %arg12[%c0_14, %c0_15], %27 {strides = array<i32>} : memref<64x128xf32, #tpu.memory_space<vmem>>, vector<8x128xf32>,
    %c1_i32 = arith.constant 1 : i32
    %c8_i32 = arith.constant 8 : i32
    %29 = arith.muli %c1_i32, %c8_i32 : i32
    %30 = tpu.assume_multiple %29, 8 : i32
    %31 = arith.index_cast %30 : i32 to index
    %c0_16 = arith.constant 0 : index
    %32 = vector.load %arg11[%31, %c0_16] : memref<64x512xf32, #tpu.memory_space<vmem>>, vector<8x512xf32>
    %33 = arith.truncf %27 : vector<8x128xf32> to vector<8x128xbf16>
    %cst_17 = arith.constant dense<0.000000e+00> : vector<8x512xf32>
    %34 = tpu.matmul %33, %1, %cst_17 {dimension_numbers = #tpu.dot_dimension_numbers<[1], [0], [0], [1], [0, 0, 1, 1], [], []>} : vector<8x128xbf16>, vector<128x512xbf16>, vector<8x512xf32> -> vector<8x512xf32>
    %35 = arith.addf %32, %34 : vector<8x512xf32>
    %36 = vector.extract_strided_slice %35 {offsets = [0, 0], sizes = [8, 384], strides = [1, 1]} : vector<8x512xf32> to vector<8x384xf32>
    %37 = arith.negf %36 : vector<8x384xf32>
    %38 = math.exp %37 : vector<8x384xf32>
    %cst_18 = arith.constant 1.000000e+00 : f32
    %39 = vector.broadcast %cst_18 : f32 to vector<8x384xf32>
    %40 = arith.addf %39, %38 : vector<8x384xf32>
    %41 = arith.divf %39, %40 : vector<8x384xf32>
    %42 = vector.extract_strided_slice %41 {offsets = [0, 0], sizes = [8, 128], strides = [1, 1]} : vector<8x384xf32> to vector<8x128xf32>
    %43 = vector.extract_strided_slice %41 {offsets = [0, 128], sizes = [8, 128], strides = [1, 1]} : vector<8x384xf32> to vector<8x128xf32>
    %44 = vector.extract_strided_slice %41 {offsets = [0, 256], sizes = [8, 128], strides = [1, 1]} : vector<8x384xf32> to vector<8x128xf32>
    %45 = vector.extract_strided_slice %35 {offsets = [0, 384], sizes = [8, 128], strides = [1, 1]} : vector<8x512xf32> to vector<8x128xf32>
    %46 = math.tanh %45 : vector<8x128xf32>
    %47 = arith.mulf %43, %25 : vector<8x128xf32>
    %48 = arith.mulf %42, %46 : vector<8x128xf32>
    %49 = arith.addf %47, %48 : vector<8x128xf32>
    %50 = math.tanh %49 : vector<8x128xf32>
    %51 = arith.mulf %44, %50 : vector<8x128xf32>
    %52 = arith.index_cast %30 : i32 to index
    %c0_19 = arith.constant 0 : index
    %53 = vector.load %arg12[%52, %c0_19] : memref<64x128xf32, #tpu.memory_space<vmem>>, vector<8x128xf32>
    tpu.vector_store %arg12[%52, %c0_19], %51 {strides = array<i32>} : memref<64x128xf32, #tpu.memory_space<vmem>>, vector<8x128xf32>,
    %c2_i32 = arith.constant 2 : i32
    %c8_i32_20 = arith.constant 8 : i32
    %54 = arith.muli %c2_i32, %c8_i32_20 : i32
    %55 = tpu.assume_multiple %54, 8 : i32
    %56 = arith.index_cast %55 : i32 to index
    %c0_21 = arith.constant 0 : index
    %57 = vector.load %arg11[%56, %c0_21] : memref<64x512xf32, #tpu.memory_space<vmem>>, vector<8x512xf32>
    %58 = arith.truncf %51 : vector<8x128xf32> to vector<8x128xbf16>
    %cst_22 = arith.constant dense<0.000000e+00> : vector<8x512xf32>
    %59 = tpu.matmul %58, %1, %cst_22 {dimension_numbers = #tpu.dot_dimension_numbers<[1], [0], [0], [1], [0, 0, 1, 1], [], []>} : vector<8x128xbf16>, vector<128x512xbf16>, vector<8x512xf32> -> vector<8x512xf32>
    %60 = arith.addf %57, %59 : vector<8x512xf32>
    %61 = vector.extract_strided_slice %60 {offsets = [0, 0], sizes = [8, 384], strides = [1, 1]} : vector<8x512xf32> to vector<8x384xf32>
    %62 = arith.negf %61 : vector<8x384xf32>
    %63 = math.exp %62 : vector<8x384xf32>
    %cst_23 = arith.constant 1.000000e+00 : f32
    %64 = vector.broadcast %cst_23 : f32 to vector<8x384xf32>
    %65 = arith.addf %64, %63 : vector<8x384xf32>
    %66 = arith.divf %64, %65 : vector<8x384xf32>
    %67 = vector.extract_strided_slice %66 {offsets = [0, 0], sizes = [8, 128], strides = [1, 1]} : vector<8x384xf32> to vector<8x128xf32>
    %68 = vector.extract_strided_slice %66 {offsets = [0, 128], sizes = [8, 128], strides = [1, 1]} : vector<8x384xf32> to vector<8x128xf32>
    %69 = vector.extract_strided_slice %66 {offsets = [0, 256], sizes = [8, 128], strides = [1, 1]} : vector<8x384xf32> to vector<8x128xf32>
    %70 = vector.extract_strided_slice %60 {offsets = [0, 384], sizes = [8, 128], strides = [1, 1]} : vector<8x512xf32> to vector<8x128xf32>
    %71 = math.tanh %70 : vector<8x128xf32>
    %72 = arith.mulf %68, %49 : vector<8x128xf32>
    %73 = arith.mulf %67, %71 : vector<8x128xf32>
    %74 = arith.addf %72, %73 : vector<8x128xf32>
    %75 = math.tanh %74 : vector<8x128xf32>
    %76 = arith.mulf %69, %75 : vector<8x128xf32>
    %77 = arith.index_cast %55 : i32 to index
    %c0_24 = arith.constant 0 : index
    %78 = vector.load %arg12[%77, %c0_24] : memref<64x128xf32, #tpu.memory_space<vmem>>, vector<8x128xf32>
    tpu.vector_store %arg12[%77, %c0_24], %76 {strides = array<i32>} : memref<64x128xf32, #tpu.memory_space<vmem>>, vector<8x128xf32>,
    %c3_i32 = arith.constant 3 : i32
    %c8_i32_25 = arith.constant 8 : i32
    %79 = arith.muli %c3_i32, %c8_i32_25 : i32
    %80 = tpu.assume_multiple %79, 8 : i32
    %81 = arith.index_cast %80 : i32 to index
    %c0_26 = arith.constant 0 : index
    %82 = vector.load %arg11[%81, %c0_26] : memref<64x512xf32, #tpu.memory_space<vmem>>, vector<8x512xf32>
    %83 = arith.truncf %76 : vector<8x128xf32> to vector<8x128xbf16>
    %cst_27 = arith.constant dense<0.000000e+00> : vector<8x512xf32>
    %84 = tpu.matmul %83, %1, %cst_27 {dimension_numbers = #tpu.dot_dimension_numbers<[1], [0], [0], [1], [0, 0, 1, 1], [], []>} : vector<8x128xbf16>, vector<128x512xbf16>, vector<8x512xf32> -> vector<8x512xf32>
    %85 = arith.addf %82, %84 : vector<8x512xf32>
    %86 = vector.extract_strided_slice %85 {offsets = [0, 0], sizes = [8, 384], strides = [1, 1]} : vector<8x512xf32> to vector<8x384xf32>
    %87 = arith.negf %86 : vector<8x384xf32>
    %88 = math.exp %87 : vector<8x384xf32>
    %cst_28 = arith.constant 1.000000e+00 : f32
    %89 = vector.broadcast %cst_28 : f32 to vector<8x384xf32>
    %90 = arith.addf %89, %88 : vector<8x384xf32>
    %91 = arith.divf %89, %90 : vector<8x384xf32>
    %92 = vector.extract_strided_slice %91 {offsets = [0, 0], sizes = [8, 128], strides = [1, 1]} : vector<8x384xf32> to vector<8x128xf32>
    %93 = vector.extract_strided_slice %91 {offsets = [0, 128], sizes = [8, 128], strides = [1, 1]} : vector<8x384xf32> to vector<8x128xf32>
    %94 = vector.extract_strided_slice %91 {offsets = [0, 256], sizes = [8, 128], strides = [1, 1]} : vector<8x384xf32> to vector<8x128xf32>
    %95 = vector.extract_strided_slice %85 {offsets = [0, 384], sizes = [8, 128], strides = [1, 1]} : vector<8x512xf32> to vector<8x128xf32>
    %96 = math.tanh %95 : vector<8x128xf32>
    %97 = arith.mulf %93, %74 : vector<8x128xf32>
    %98 = arith.mulf %92, %96 : vector<8x128xf32>
    %99 = arith.addf %97, %98 : vector<8x128xf32>
    %100 = math.tanh %99 : vector<8x128xf32>
    %101 = arith.mulf %94, %100 : vector<8x128xf32>
    %102 = arith.index_cast %80 : i32 to index
    %c0_29 = arith.constant 0 : index
    %103 = vector.load %arg12[%102, %c0_29] : memref<64x128xf32, #tpu.memory_space<vmem>>, vector<8x128xf32>
    tpu.vector_store %arg12[%102, %c0_29], %101 {strides = array<i32>} : memref<64x128xf32, #tpu.memory_space<vmem>>, vector<8x128xf32>,
    %c4_i32 = arith.constant 4 : i32
    %c8_i32_30 = arith.constant 8 : i32
    %104 = arith.muli %c4_i32, %c8_i32_30 : i32
    %105 = tpu.assume_multiple %104, 8 : i32
    %106 = arith.index_cast %105 : i32 to index
    %c0_31 = arith.constant 0 : index
    %107 = vector.load %arg11[%106, %c0_31] : memref<64x512xf32, #tpu.memory_space<vmem>>, vector<8x512xf32>
    %108 = arith.truncf %101 : vector<8x128xf32> to vector<8x128xbf16>
    %cst_32 = arith.constant dense<0.000000e+00> : vector<8x512xf32>
    %109 = tpu.matmul %108, %1, %cst_32 {dimension_numbers = #tpu.dot_dimension_numbers<[1], [0], [0], [1], [0, 0, 1, 1], [], []>} : vector<8x128xbf16>, vector<128x512xbf16>, vector<8x512xf32> -> vector<8x512xf32>
    %110 = arith.addf %107, %109 : vector<8x512xf32>
    %111 = vector.extract_strided_slice %110 {offsets = [0, 0], sizes = [8, 384], strides = [1, 1]} : vector<8x512xf32> to vector<8x384xf32>
    %112 = arith.negf %111 : vector<8x384xf32>
    %113 = math.exp %112 : vector<8x384xf32>
    %cst_33 = arith.constant 1.000000e+00 : f32
    %114 = vector.broadcast %cst_33 : f32 to vector<8x384xf32>
    %115 = arith.addf %114, %113 : vector<8x384xf32>
    %116 = arith.divf %114, %115 : vector<8x384xf32>
    %117 = vector.extract_strided_slice %116 {offsets = [0, 0], sizes = [8, 128], strides = [1, 1]} : vector<8x384xf32> to vector<8x128xf32>
    %118 = vector.extract_strided_slice %116 {offsets = [0, 128], sizes = [8, 128], strides = [1, 1]} : vector<8x384xf32> to vector<8x128xf32>
    %119 = vector.extract_strided_slice %116 {offsets = [0, 256], sizes = [8, 128], strides = [1, 1]} : vector<8x384xf32> to vector<8x128xf32>
    %120 = vector.extract_strided_slice %110 {offsets = [0, 384], sizes = [8, 128], strides = [1, 1]} : vector<8x512xf32> to vector<8x128xf32>
    %121 = math.tanh %120 : vector<8x128xf32>
    %122 = arith.mulf %118, %99 : vector<8x128xf32>
    %123 = arith.mulf %117, %121 : vector<8x128xf32>
    %124 = arith.addf %122, %123 : vector<8x128xf32>
    %125 = math.tanh %124 : vector<8x128xf32>
    %126 = arith.mulf %119, %125 : vector<8x128xf32>
    %127 = arith.index_cast %105 : i32 to index
    %c0_34 = arith.constant 0 : index
    %128 = vector.load %arg12[%127, %c0_34] : memref<64x128xf32, #tpu.memory_space<vmem>>, vector<8x128xf32>
    tpu.vector_store %arg12[%127, %c0_34], %126 {strides = array<i32>} : memref<64x128xf32, #tpu.memory_space<vmem>>, vector<8x128xf32>,
    %c5_i32 = arith.constant 5 : i32
    %c8_i32_35 = arith.constant 8 : i32
    %129 = arith.muli %c5_i32, %c8_i32_35 : i32
    %130 = tpu.assume_multiple %129, 8 : i32
    %131 = arith.index_cast %130 : i32 to index
    %c0_36 = arith.constant 0 : index
    %132 = vector.load %arg11[%131, %c0_36] : memref<64x512xf32, #tpu.memory_space<vmem>>, vector<8x512xf32>
    %133 = arith.truncf %126 : vector<8x128xf32> to vector<8x128xbf16>
    %cst_37 = arith.constant dense<0.000000e+00> : vector<8x512xf32>
    %134 = tpu.matmul %133, %1, %cst_37 {dimension_numbers = #tpu.dot_dimension_numbers<[1], [0], [0], [1], [0, 0, 1, 1], [], []>} : vector<8x128xbf16>, vector<128x512xbf16>, vector<8x512xf32> -> vector<8x512xf32>
    %135 = arith.addf %132, %134 : vector<8x512xf32>
    %136 = vector.extract_strided_slice %135 {offsets = [0, 0], sizes = [8, 384], strides = [1, 1]} : vector<8x512xf32> to vector<8x384xf32>
    %137 = arith.negf %136 : vector<8x384xf32>
    %138 = math.exp %137 : vector<8x384xf32>
    %cst_38 = arith.constant 1.000000e+00 : f32
    %139 = vector.broadcast %cst_38 : f32 to vector<8x384xf32>
    %140 = arith.addf %139, %138 : vector<8x384xf32>
    %141 = arith.divf %139, %140 : vector<8x384xf32>
    %142 = vector.extract_strided_slice %141 {offsets = [0, 0], sizes = [8, 128], strides = [1, 1]} : vector<8x384xf32> to vector<8x128xf32>
    %143 = vector.extract_strided_slice %141 {offsets = [0, 128], sizes = [8, 128], strides = [1, 1]} : vector<8x384xf32> to vector<8x128xf32>
    %144 = vector.extract_strided_slice %141 {offsets = [0, 256], sizes = [8, 128], strides = [1, 1]} : vector<8x384xf32> to vector<8x128xf32>
    %145 = vector.extract_strided_slice %135 {offsets = [0, 384], sizes = [8, 128], strides = [1, 1]} : vector<8x512xf32> to vector<8x128xf32>
    %146 = math.tanh %145 : vector<8x128xf32>
    %147 = arith.mulf %143, %124 : vector<8x128xf32>
    %148 = arith.mulf %142, %146 : vector<8x128xf32>
    %149 = arith.addf %147, %148 : vector<8x128xf32>
    %150 = math.tanh %149 : vector<8x128xf32>
    %151 = arith.mulf %144, %150 : vector<8x128xf32>
    %152 = arith.index_cast %130 : i32 to index
    %c0_39 = arith.constant 0 : index
    %153 = vector.load %arg12[%152, %c0_39] : memref<64x128xf32, #tpu.memory_space<vmem>>, vector<8x128xf32>
    tpu.vector_store %arg12[%152, %c0_39], %151 {strides = array<i32>} : memref<64x128xf32, #tpu.memory_space<vmem>>, vector<8x128xf32>,
    %c6_i32 = arith.constant 6 : i32
    %c8_i32_40 = arith.constant 8 : i32
    %154 = arith.muli %c6_i32, %c8_i32_40 : i32
    %155 = tpu.assume_multiple %154, 8 : i32
    %156 = arith.index_cast %155 : i32 to index
    %c0_41 = arith.constant 0 : index
    %157 = vector.load %arg11[%156, %c0_41] : memref<64x512xf32, #tpu.memory_space<vmem>>, vector<8x512xf32>
    %158 = arith.truncf %151 : vector<8x128xf32> to vector<8x128xbf16>
    %cst_42 = arith.constant dense<0.000000e+00> : vector<8x512xf32>
    %159 = tpu.matmul %158, %1, %cst_42 {dimension_numbers = #tpu.dot_dimension_numbers<[1], [0], [0], [1], [0, 0, 1, 1], [], []>} : vector<8x128xbf16>, vector<128x512xbf16>, vector<8x512xf32> -> vector<8x512xf32>
    %160 = arith.addf %157, %159 : vector<8x512xf32>
    %161 = vector.extract_strided_slice %160 {offsets = [0, 0], sizes = [8, 384], strides = [1, 1]} : vector<8x512xf32> to vector<8x384xf32>
    %162 = arith.negf %161 : vector<8x384xf32>
    %163 = math.exp %162 : vector<8x384xf32>
    %cst_43 = arith.constant 1.000000e+00 : f32
    %164 = vector.broadcast %cst_43 : f32 to vector<8x384xf32>
    %165 = arith.addf %164, %163 : vector<8x384xf32>
    %166 = arith.divf %164, %165 : vector<8x384xf32>
    %167 = vector.extract_strided_slice %166 {offsets = [0, 0], sizes = [8, 128], strides = [1, 1]} : vector<8x384xf32> to vector<8x128xf32>
    %168 = vector.extract_strided_slice %166 {offsets = [0, 128], sizes = [8, 128], strides = [1, 1]} : vector<8x384xf32> to vector<8x128xf32>
    %169 = vector.extract_strided_slice %166 {offsets = [0, 256], sizes = [8, 128], strides = [1, 1]} : vector<8x384xf32> to vector<8x128xf32>
    %170 = vector.extract_strided_slice %160 {offsets = [0, 384], sizes = [8, 128], strides = [1, 1]} : vector<8x512xf32> to vector<8x128xf32>
    %171 = math.tanh %170 : vector<8x128xf32>
    %172 = arith.mulf %168, %149 : vector<8x128xf32>
    %173 = arith.mulf %167, %171 : vector<8x128xf32>
    %174 = arith.addf %172, %173 : vector<8x128xf32>
    %175 = math.tanh %174 : vector<8x128xf32>
    %176 = arith.mulf %169, %175 : vector<8x128xf32>
    %177 = arith.index_cast %155 : i32 to index
    %c0_44 = arith.constant 0 : index
    %178 = vector.load %arg12[%177, %c0_44] : memref<64x128xf32, #tpu.memory_space<vmem>>, vector<8x128xf32>
    tpu.vector_store %arg12[%177, %c0_44], %176 {strides = array<i32>} : memref<64x128xf32, #tpu.memory_space<vmem>>, vector<8x128xf32>,
    %c7_i32 = arith.constant 7 : i32
    %c8_i32_45 = arith.constant 8 : i32
    %179 = arith.muli %c7_i32, %c8_i32_45 : i32
    %180 = tpu.assume_multiple %179, 8 : i32
    %181 = arith.index_cast %180 : i32 to index
    %c0_46 = arith.constant 0 : index
    %182 = vector.load %arg11[%181, %c0_46] : memref<64x512xf32, #tpu.memory_space<vmem>>, vector<8x512xf32>
    %183 = arith.truncf %176 : vector<8x128xf32> to vector<8x128xbf16>
    %cst_47 = arith.constant dense<0.000000e+00> : vector<8x512xf32>
    %184 = tpu.matmul %183, %1, %cst_47 {dimension_numbers = #tpu.dot_dimension_numbers<[1], [0], [0], [1], [0, 0, 1, 1], [], []>} : vector<8x128xbf16>, vector<128x512xbf16>, vector<8x512xf32> -> vector<8x512xf32>
    %185 = arith.addf %182, %184 : vector<8x512xf32>
    %186 = vector.extract_strided_slice %185 {offsets = [0, 0], sizes = [8, 384], strides = [1, 1]} : vector<8x512xf32> to vector<8x384xf32>
    %187 = arith.negf %186 : vector<8x384xf32>
    %188 = math.exp %187 : vector<8x384xf32>
    %cst_48 = arith.constant 1.000000e+00 : f32
    %189 = vector.broadcast %cst_48 : f32 to vector<8x384xf32>
    %190 = arith.addf %189, %188 : vector<8x384xf32>
    %191 = arith.divf %189, %190 : vector<8x384xf32>
    %192 = vector.extract_strided_slice %191 {offsets = [0, 0], sizes = [8, 128], strides = [1, 1]} : vector<8x384xf32> to vector<8x128xf32>
    %193 = vector.extract_strided_slice %191 {offsets = [0, 128], sizes = [8, 128], strides = [1, 1]} : vector<8x384xf32> to vector<8x128xf32>
    %194 = vector.extract_strided_slice %191 {offsets = [0, 256], sizes = [8, 128], strides = [1, 1]} : vector<8x384xf32> to vector<8x128xf32>
    %195 = vector.extract_strided_slice %185 {offsets = [0, 384], sizes = [8, 128], strides = [1, 1]} : vector<8x512xf32> to vector<8x128xf32>
    %196 = math.tanh %195 : vector<8x128xf32>
    %197 = arith.mulf %193, %174 : vector<8x128xf32>
    %198 = arith.mulf %192, %196 : vector<8x128xf32>
    %199 = arith.addf %197, %198 : vector<8x128xf32>
    %200 = math.tanh %199 : vector<8x128xf32>
    %201 = arith.mulf %194, %200 : vector<8x128xf32>
    %202 = arith.index_cast %180 : i32 to index
    %c0_49 = arith.constant 0 : index
    %203 = vector.load %arg12[%202, %c0_49] : memref<64x128xf32, #tpu.memory_space<vmem>>, vector<8x128xf32>
    tpu.vector_store %arg12[%202, %c0_49], %201 {strides = array<i32>} : memref<64x128xf32, #tpu.memory_space<vmem>>, vector<8x128xf32>,
    %c7_i32_50 = arith.constant 7 : i32
    %c0_51 = arith.constant 0 : index
    %c0_52 = arith.constant 0 : index
    %204 = vector.load %arg5[%c0_51, %c0_52] : memref<128x512xbf16, #tpu.memory_space<vmem>>, vector<128x512xbf16>
    %c0_53 = arith.constant 0 : index
    %c0_54 = arith.constant 0 : index
    %205 = vector.load %arg6[%c0_53, %c0_54] : memref<128x512xbf16, #tpu.memory_space<vmem>>, vector<128x512xbf16>
    %c0_55 = arith.constant 0 : index
    %c0_56 = arith.constant 0 : index
    %206 = vector.load %arg7[%c0_55, %c0_56] : memref<1x512xf32, #tpu.memory_space<vmem>>, vector<1x512xf32>
    %c0_57 = arith.constant 0 : index
    %c0_58 = arith.constant 0 : index
    %207 = vector.load %arg12[%c0_57, %c0_58] : memref<64x128xf32, #tpu.memory_space<vmem>>, vector<64x128xf32>
    %208 = arith.truncf %207 : vector<64x128xf32> to vector<64x128xbf16>
    %cst_59 = arith.constant dense<0.000000e+00> : vector<64x512xf32>
    %209 = tpu.matmul %208, %204, %cst_59 {dimension_numbers = #tpu.dot_dimension_numbers<[1], [0], [0], [1], [0, 0, 1, 1], [], []>} : vector<64x128xbf16>, vector<128x512xbf16>, vector<64x512xf32> -> vector<64x512xf32>
    %210 = vector.broadcast %206 : vector<1x512xf32> to vector<64x512xf32>
    %211 = arith.addf %209, %210 : vector<64x512xf32>
    %c0_60 = arith.constant 0 : index
    %c0_61 = arith.constant 0 : index
    %212 = vector.load %arg11[%c0_60, %c0_61] : memref<64x512xf32, #tpu.memory_space<vmem>>, vector<64x512xf32>
    tpu.vector_store %arg11[%c0_60, %c0_61], %211 {strides = array<i32>} : memref<64x512xf32, #tpu.memory_space<vmem>>, vector<64x512xf32>,
    %cst_62 = arith.constant 0.000000e+00 : f32
    %213 = vector.broadcast %cst_62 : f32 to vector<8x128xf32>
    %c0_63 = arith.constant 0 : index
    %c0_64 = arith.constant 0 : index
    %214 = vector.load %arg11[%c0_63, %c0_64] : memref<64x512xf32, #tpu.memory_space<vmem>>, vector<8x512xf32>
    %215 = vector.extract_strided_slice %214 {offsets = [0, 0], sizes = [8, 384], strides = [1, 1]} : vector<8x512xf32> to vector<8x384xf32>
    %216 = arith.negf %215 : vector<8x384xf32>
    %217 = math.exp %216 : vector<8x384xf32>
    %cst_65 = arith.constant 1.000000e+00 : f32
    %218 = vector.broadcast %cst_65 : f32 to vector<8x384xf32>
    %219 = arith.addf %218, %217 : vector<8x384xf32>
    %220 = arith.divf %218, %219 : vector<8x384xf32>
    %221 = vector.extract_strided_slice %220 {offsets = [0, 0], sizes = [8, 128], strides = [1, 1]} : vector<8x384xf32> to vector<8x128xf32>
    %222 = vector.extract_strided_slice %220 {offsets = [0, 128], sizes = [8, 128], strides = [1, 1]} : vector<8x384xf32> to vector<8x128xf32>
    %223 = vector.extract_strided_slice %220 {offsets = [0, 256], sizes = [8, 128], strides = [1, 1]} : vector<8x384xf32> to vector<8x128xf32>
    %224 = vector.extract_strided_slice %214 {offsets = [0, 384], sizes = [8, 128], strides = [1, 1]} : vector<8x512xf32> to vector<8x128xf32>
    %225 = math.tanh %224 : vector<8x128xf32>
    %226 = arith.mulf %222, %213 : vector<8x128xf32>
    %227 = arith.mulf %221, %225 : vector<8x128xf32>
    %228 = arith.addf %226, %227 : vector<8x128xf32>
    %229 = math.tanh %228 : vector<8x128xf32>
    %230 = arith.mulf %223, %229 : vector<8x128xf32>
    %c1_i32_66 = arith.constant 1 : i32
    %c8_i32_67 = arith.constant 8 : i32
    %231 = arith.muli %c1_i32_66, %c8_i32_67 : i32
    %232 = tpu.assume_multiple %231, 8 : i32
    %233 = arith.index_cast %232 : i32 to index
    %c0_68 = arith.constant 0 : index
    %234 = vector.load %arg11[%233, %c0_68] : memref<64x512xf32, #tpu.memory_space<vmem>>, vector<8x512xf32>
    %235 = arith.truncf %230 : vector<8x128xf32> to vector<8x128xbf16>
    %cst_69 = arith.constant dense<0.000000e+00> : vector<8x512xf32>
    %236 = tpu.matmul %235, %205, %cst_69 {dimension_numbers = #tpu.dot_dimension_numbers<[1], [0], [0], [1], [0, 0, 1, 1], [], []>} : vector<8x128xbf16>, vector<128x512xbf16>, vector<8x512xf32> -> vector<8x512xf32>
    %237 = arith.addf %234, %236 : vector<8x512xf32>
    %238 = vector.extract_strided_slice %237 {offsets = [0, 0], sizes = [8, 384], strides = [1, 1]} : vector<8x512xf32> to vector<8x384xf32>
    %239 = arith.negf %238 : vector<8x384xf32>
    %240 = math.exp %239 : vector<8x384xf32>
    %cst_70 = arith.constant 1.000000e+00 : f32
    %241 = vector.broadcast %cst_70 : f32 to vector<8x384xf32>
    %242 = arith.addf %241, %240 : vector<8x384xf32>
    %243 = arith.divf %241, %242 : vector<8x384xf32>
    %244 = vector.extract_strided_slice %243 {offsets = [0, 0], sizes = [8, 128], strides = [1, 1]} : vector<8x384xf32> to vector<8x128xf32>
    %245 = vector.extract_strided_slice %243 {offsets = [0, 128], sizes = [8, 128], strides = [1, 1]} : vector<8x384xf32> to vector<8x128xf32>
    %246 = vector.extract_strided_slice %243 {offsets = [0, 256], sizes = [8, 128], strides = [1, 1]} : vector<8x384xf32> to vector<8x128xf32>
    %247 = vector.extract_strided_slice %237 {offsets = [0, 384], sizes = [8, 128], strides = [1, 1]} : vector<8x512xf32> to vector<8x128xf32>
    %248 = math.tanh %247 : vector<8x128xf32>
    %249 = arith.mulf %245, %228 : vector<8x128xf32>
    %250 = arith.mulf %244, %248 : vector<8x128xf32>
    %251 = arith.addf %249, %250 : vector<8x128xf32>
    %252 = math.tanh %251 : vector<8x128xf32>
    %253 = arith.mulf %246, %252 : vector<8x128xf32>
    %c2_i32_71 = arith.constant 2 : i32
    %c8_i32_72 = arith.constant 8 : i32
    %254 = arith.muli %c2_i32_71, %c8_i32_72 : i32
    %255 = tpu.assume_multiple %254, 8 : i32
    %256 = arith.index_cast %255 : i32 to index
    %c0_73 = arith.constant 0 : index
    %257 = vector.load %arg11[%256, %c0_73] : memref<64x512xf32, #tpu.memory_space<vmem>>, vector<8x512xf32>
    %258 = arith.truncf %253 : vector<8x128xf32> to vector<8x128xbf16>
    %cst_74 = arith.constant dense<0.000000e+00> : vector<8x512xf32>
    %259 = tpu.matmul %258, %205, %cst_74 {dimension_numbers = #tpu.dot_dimension_numbers<[1], [0], [0], [1], [0, 0, 1, 1], [], []>} : vector<8x128xbf16>, vector<128x512xbf16>, vector<8x512xf32> -> vector<8x512xf32>
    %260 = arith.addf %257, %259 : vector<8x512xf32>
    %261 = vector.extract_strided_slice %260 {offsets = [0, 0], sizes = [8, 384], strides = [1, 1]} : vector<8x512xf32> to vector<8x384xf32>
    %262 = arith.negf %261 : vector<8x384xf32>
    %263 = math.exp %262 : vector<8x384xf32>
    %cst_75 = arith.constant 1.000000e+00 : f32
    %264 = vector.broadcast %cst_75 : f32 to vector<8x384xf32>
    %265 = arith.addf %264, %263 : vector<8x384xf32>
    %266 = arith.divf %264, %265 : vector<8x384xf32>
    %267 = vector.extract_strided_slice %266 {offsets = [0, 0], sizes = [8, 128], strides = [1, 1]} : vector<8x384xf32> to vector<8x128xf32>
    %268 = vector.extract_strided_slice %266 {offsets = [0, 128], sizes = [8, 128], strides = [1, 1]} : vector<8x384xf32> to vector<8x128xf32>
    %269 = vector.extract_strided_slice %266 {offsets = [0, 256], sizes = [8, 128], strides = [1, 1]} : vector<8x384xf32> to vector<8x128xf32>
    %270 = vector.extract_strided_slice %260 {offsets = [0, 384], sizes = [8, 128], strides = [1, 1]} : vector<8x512xf32> to vector<8x128xf32>
    %271 = math.tanh %270 : vector<8x128xf32>
    %272 = arith.mulf %268, %251 : vector<8x128xf32>
    %273 = arith.mulf %267, %271 : vector<8x128xf32>
    %274 = arith.addf %272, %273 : vector<8x128xf32>
    %275 = math.tanh %274 : vector<8x128xf32>
    %276 = arith.mulf %269, %275 : vector<8x128xf32>
    %c3_i32_76 = arith.constant 3 : i32
    %c8_i32_77 = arith.constant 8 : i32
    %277 = arith.muli %c3_i32_76, %c8_i32_77 : i32
    %278 = tpu.assume_multiple %277, 8 : i32
    %279 = arith.index_cast %278 : i32 to index
    %c0_78 = arith.constant 0 : index
    %280 = vector.load %arg11[%279, %c0_78] : memref<64x512xf32, #tpu.memory_space<vmem>>, vector<8x512xf32>
    %281 = arith.truncf %276 : vector<8x128xf32> to vector<8x128xbf16>
    %cst_79 = arith.constant dense<0.000000e+00> : vector<8x512xf32>
    %282 = tpu.matmul %281, %205, %cst_79 {dimension_numbers = #tpu.dot_dimension_numbers<[1], [0], [0], [1], [0, 0, 1, 1], [], []>} : vector<8x128xbf16>, vector<128x512xbf16>, vector<8x512xf32> -> vector<8x512xf32>
    %283 = arith.addf %280, %282 : vector<8x512xf32>
    %284 = vector.extract_strided_slice %283 {offsets = [0, 0], sizes = [8, 384], strides = [1, 1]} : vector<8x512xf32> to vector<8x384xf32>
    %285 = arith.negf %284 : vector<8x384xf32>
    %286 = math.exp %285 : vector<8x384xf32>
    %cst_80 = arith.constant 1.000000e+00 : f32
    %287 = vector.broadcast %cst_80 : f32 to vector<8x384xf32>
    %288 = arith.addf %287, %286 : vector<8x384xf32>
    %289 = arith.divf %287, %288 : vector<8x384xf32>
    %290 = vector.extract_strided_slice %289 {offsets = [0, 0], sizes = [8, 128], strides = [1, 1]} : vector<8x384xf32> to vector<8x128xf32>
    %291 = vector.extract_strided_slice %289 {offsets = [0, 128], sizes = [8, 128], strides = [1, 1]} : vector<8x384xf32> to vector<8x128xf32>
    %292 = vector.extract_strided_slice %289 {offsets = [0, 256], sizes = [8, 128], strides = [1, 1]} : vector<8x384xf32> to vector<8x128xf32>
    %293 = vector.extract_strided_slice %283 {offsets = [0, 384], sizes = [8, 128], strides = [1, 1]} : vector<8x512xf32> to vector<8x128xf32>
    %294 = math.tanh %293 : vector<8x128xf32>
    %295 = arith.mulf %291, %274 : vector<8x128xf32>
    %296 = arith.mulf %290, %294 : vector<8x128xf32>
    %297 = arith.addf %295, %296 : vector<8x128xf32>
    %298 = math.tanh %297 : vector<8x128xf32>
    %299 = arith.mulf %292, %298 : vector<8x128xf32>
    %c4_i32_81 = arith.constant 4 : i32
    %c8_i32_82 = arith.constant 8 : i32
    %300 = arith.muli %c4_i32_81, %c8_i32_82 : i32
    %301 = tpu.assume_multiple %300, 8 : i32
    %302 = arith.index_cast %301 : i32 to index
    %c0_83 = arith.constant 0 : index
    %303 = vector.load %arg11[%302, %c0_83] : memref<64x512xf32, #tpu.memory_space<vmem>>, vector<8x512xf32>
    %304 = arith.truncf %299 : vector<8x128xf32> to vector<8x128xbf16>
    %cst_84 = arith.constant dense<0.000000e+00> : vector<8x512xf32>
    %305 = tpu.matmul %304, %205, %cst_84 {dimension_numbers = #tpu.dot_dimension_numbers<[1], [0], [0], [1], [0, 0, 1, 1], [], []>} : vector<8x128xbf16>, vector<128x512xbf16>, vector<8x512xf32> -> vector<8x512xf32>
    %306 = arith.addf %303, %305 : vector<8x512xf32>
    %307 = vector.extract_strided_slice %306 {offsets = [0, 0], sizes = [8, 384], strides = [1, 1]} : vector<8x512xf32> to vector<8x384xf32>
    %308 = arith.negf %307 : vector<8x384xf32>
    %309 = math.exp %308 : vector<8x384xf32>
    %cst_85 = arith.constant 1.000000e+00 : f32
    %310 = vector.broadcast %cst_85 : f32 to vector<8x384xf32>
    %311 = arith.addf %310, %309 : vector<8x384xf32>
    %312 = arith.divf %310, %311 : vector<8x384xf32>
    %313 = vector.extract_strided_slice %312 {offsets = [0, 0], sizes = [8, 128], strides = [1, 1]} : vector<8x384xf32> to vector<8x128xf32>
    %314 = vector.extract_strided_slice %312 {offsets = [0, 128], sizes = [8, 128], strides = [1, 1]} : vector<8x384xf32> to vector<8x128xf32>
    %315 = vector.extract_strided_slice %312 {offsets = [0, 256], sizes = [8, 128], strides = [1, 1]} : vector<8x384xf32> to vector<8x128xf32>
    %316 = vector.extract_strided_slice %306 {offsets = [0, 384], sizes = [8, 128], strides = [1, 1]} : vector<8x512xf32> to vector<8x128xf32>
    %317 = math.tanh %316 : vector<8x128xf32>
    %318 = arith.mulf %314, %297 : vector<8x128xf32>
    %319 = arith.mulf %313, %317 : vector<8x128xf32>
    %320 = arith.addf %318, %319 : vector<8x128xf32>
    %321 = math.tanh %320 : vector<8x128xf32>
    %322 = arith.mulf %315, %321 : vector<8x128xf32>
    %c5_i32_86 = arith.constant 5 : i32
    %c8_i32_87 = arith.constant 8 : i32
    %323 = arith.muli %c5_i32_86, %c8_i32_87 : i32
    %324 = tpu.assume_multiple %323, 8 : i32
    %325 = arith.index_cast %324 : i32 to index
    %c0_88 = arith.constant 0 : index
    %326 = vector.load %arg11[%325, %c0_88] : memref<64x512xf32, #tpu.memory_space<vmem>>, vector<8x512xf32>
    %327 = arith.truncf %322 : vector<8x128xf32> to vector<8x128xbf16>
    %cst_89 = arith.constant dense<0.000000e+00> : vector<8x512xf32>
    %328 = tpu.matmul %327, %205, %cst_89 {dimension_numbers = #tpu.dot_dimension_numbers<[1], [0], [0], [1], [0, 0, 1, 1], [], []>} : vector<8x128xbf16>, vector<128x512xbf16>, vector<8x512xf32> -> vector<8x512xf32>
    %329 = arith.addf %326, %328 : vector<8x512xf32>
    %330 = vector.extract_strided_slice %329 {offsets = [0, 0], sizes = [8, 384], strides = [1, 1]} : vector<8x512xf32> to vector<8x384xf32>
    %331 = arith.negf %330 : vector<8x384xf32>
    %332 = math.exp %331 : vector<8x384xf32>
    %cst_90 = arith.constant 1.000000e+00 : f32
    %333 = vector.broadcast %cst_90 : f32 to vector<8x384xf32>
    %334 = arith.addf %333, %332 : vector<8x384xf32>
    %335 = arith.divf %333, %334 : vector<8x384xf32>
    %336 = vector.extract_strided_slice %335 {offsets = [0, 0], sizes = [8, 128], strides = [1, 1]} : vector<8x384xf32> to vector<8x128xf32>
    %337 = vector.extract_strided_slice %335 {offsets = [0, 128], sizes = [8, 128], strides = [1, 1]} : vector<8x384xf32> to vector<8x128xf32>
    %338 = vector.extract_strided_slice %335 {offsets = [0, 256], sizes = [8, 128], strides = [1, 1]} : vector<8x384xf32> to vector<8x128xf32>
    %339 = vector.extract_strided_slice %329 {offsets = [0, 384], sizes = [8, 128], strides = [1, 1]} : vector<8x512xf32> to vector<8x128xf32>
    %340 = math.tanh %339 : vector<8x128xf32>
    %341 = arith.mulf %337, %320 : vector<8x128xf32>
    %342 = arith.mulf %336, %340 : vector<8x128xf32>
    %343 = arith.addf %341, %342 : vector<8x128xf32>
    %344 = math.tanh %343 : vector<8x128xf32>
    %345 = arith.mulf %338, %344 : vector<8x128xf32>
    %c6_i32_91 = arith.constant 6 : i32
    %c8_i32_92 = arith.constant 8 : i32
    %346 = arith.muli %c6_i32_91, %c8_i32_92 : i32
    %347 = tpu.assume_multiple %346, 8 : i32
    %348 = arith.index_cast %347 : i32 to index
    %c0_93 = arith.constant 0 : index
    %349 = vector.load %arg11[%348, %c0_93] : memref<64x512xf32, #tpu.memory_space<vmem>>, vector<8x512xf32>
    %350 = arith.truncf %345 : vector<8x128xf32> to vector<8x128xbf16>
    %cst_94 = arith.constant dense<0.000000e+00> : vector<8x512xf32>
    %351 = tpu.matmul %350, %205, %cst_94 {dimension_numbers = #tpu.dot_dimension_numbers<[1], [0], [0], [1], [0, 0, 1, 1], [], []>} : vector<8x128xbf16>, vector<128x512xbf16>, vector<8x512xf32> -> vector<8x512xf32>
    %352 = arith.addf %349, %351 : vector<8x512xf32>
    %353 = vector.extract_strided_slice %352 {offsets = [0, 0], sizes = [8, 384], strides = [1, 1]} : vector<8x512xf32> to vector<8x384xf32>
    %354 = arith.negf %353 : vector<8x384xf32>
    %355 = math.exp %354 : vector<8x384xf32>
    %cst_95 = arith.constant 1.000000e+00 : f32
    %356 = vector.broadcast %cst_95 : f32 to vector<8x384xf32>
    %357 = arith.addf %356, %355 : vector<8x384xf32>
    %358 = arith.divf %356, %357 : vector<8x384xf32>
    %359 = vector.extract_strided_slice %358 {offsets = [0, 0], sizes = [8, 128], strides = [1, 1]} : vector<8x384xf32> to vector<8x128xf32>
    %360 = vector.extract_strided_slice %358 {offsets = [0, 128], sizes = [8, 128], strides = [1, 1]} : vector<8x384xf32> to vector<8x128xf32>
    %361 = vector.extract_strided_slice %358 {offsets = [0, 256], sizes = [8, 128], strides = [1, 1]} : vector<8x384xf32> to vector<8x128xf32>
    %362 = vector.extract_strided_slice %352 {offsets = [0, 384], sizes = [8, 128], strides = [1, 1]} : vector<8x512xf32> to vector<8x128xf32>
    %363 = math.tanh %362 : vector<8x128xf32>
    %364 = arith.mulf %360, %343 : vector<8x128xf32>
    %365 = arith.mulf %359, %363 : vector<8x128xf32>
    %366 = arith.addf %364, %365 : vector<8x128xf32>
    %367 = math.tanh %366 : vector<8x128xf32>
    %368 = arith.mulf %361, %367 : vector<8x128xf32>
    %c7_i32_96 = arith.constant 7 : i32
    %c8_i32_97 = arith.constant 8 : i32
    %369 = arith.muli %c7_i32_96, %c8_i32_97 : i32
    %370 = tpu.assume_multiple %369, 8 : i32
    %371 = arith.index_cast %370 : i32 to index
    %c0_98 = arith.constant 0 : index
    %372 = vector.load %arg11[%371, %c0_98] : memref<64x512xf32, #tpu.memory_space<vmem>>, vector<8x512xf32>
    %373 = arith.truncf %368 : vector<8x128xf32> to vector<8x128xbf16>
    %cst_99 = arith.constant dense<0.000000e+00> : vector<8x512xf32>
    %374 = tpu.matmul %373, %205, %cst_99 {dimension_numbers = #tpu.dot_dimension_numbers<[1], [0], [0], [1], [0, 0, 1, 1], [], []>} : vector<8x128xbf16>, vector<128x512xbf16>, vector<8x512xf32> -> vector<8x512xf32>
    %375 = arith.addf %372, %374 : vector<8x512xf32>
    %376 = vector.extract_strided_slice %375 {offsets = [0, 0], sizes = [8, 384], strides = [1, 1]} : vector<8x512xf32> to vector<8x384xf32>
    %377 = arith.negf %376 : vector<8x384xf32>
    %378 = math.exp %377 : vector<8x384xf32>
    %cst_100 = arith.constant 1.000000e+00 : f32
    %379 = vector.broadcast %cst_100 : f32 to vector<8x384xf32>
    %380 = arith.addf %379, %378 : vector<8x384xf32>
    %381 = arith.divf %379, %380 : vector<8x384xf32>
    %382 = vector.extract_strided_slice %381 {offsets = [0, 0], sizes = [8, 128], strides = [1, 1]} : vector<8x384xf32> to vector<8x128xf32>
    %383 = vector.extract_strided_slice %381 {offsets = [0, 128], sizes = [8, 128], strides = [1, 1]} : vector<8x384xf32> to vector<8x128xf32>
    %384 = vector.extract_strided_slice %381 {offsets = [0, 256], sizes = [8, 128], strides = [1, 1]} : vector<8x384xf32> to vector<8x128xf32>
    %385 = vector.extract_strided_slice %375 {offsets = [0, 384], sizes = [8, 128], strides = [1, 1]} : vector<8x512xf32> to vector<8x128xf32>
    %386 = math.tanh %385 : vector<8x128xf32>
    %387 = arith.mulf %383, %366 : vector<8x128xf32>
    %388 = arith.mulf %382, %386 : vector<8x128xf32>
    %389 = arith.addf %387, %388 : vector<8x128xf32>
    %390 = math.tanh %389 : vector<8x128xf32>
    %391 = arith.mulf %384, %390 : vector<8x128xf32>
    %c7_i32_101 = arith.constant 7 : i32
    %392 = tpu.concatenate %230, %391 in 1 : vector<8x128xf32>, vector<8x128xf32> -> vector<8x256xf32>
    %c0_102 = arith.constant 0 : index
    %c0_103 = arith.constant 0 : index
    %393 = vector.load %arg8[%c0_102, %c0_103] : memref<256x4xf32, #tpu.memory_space<vmem>>, vector<256x4xf32>
    %cst_104 = arith.constant dense<0.000000e+00> : vector<8x4xf32>
    %394 = tpu.matmul %392, %393, %cst_104 {dimension_numbers = #tpu.dot_dimension_numbers<[1], [0], [0], [1], [0, 0, 1, 1], [], []>} : vector<8x256xf32>, vector<256x4xf32>, vector<8x4xf32> -> vector<8x4xf32>
    %c0_105 = arith.constant 0 : index
    %c0_106 = arith.constant 0 : index
    %395 = vector.load %arg9[%c0_105, %c0_106] : memref<1x4xf32, #tpu.memory_space<vmem>>, vector<1x4xf32>
    %396 = vector.broadcast %395 : vector<1x4xf32> to vector<8x4xf32>
    %397 = arith.addf %394, %396 : vector<8x4xf32>
    %c0_107 = arith.constant 0 : index
    %c0_108 = arith.constant 0 : index
    %398 = vector.load %arg10[%c0_107, %c0_108] : memref<8x4xf32, #tpu.memory_space<vmem>>, vector<8x4xf32>
    tpu.vector_store %arg10[%c0_107, %c0_108], %397 {strides = array<i32>} : memref<8x4xf32, #tpu.memory_space<vmem>>, vector<8x4xf32>,
    return
  }
  func.func @transform_0(%arg0: i32) -> (i32, i32, i32) {
    %c0_i32 = arith.constant 0 : i32
    %c0_i32_0 = arith.constant 0 : i32
    %c0_i32_1 = arith.constant 0 : i32
    return %c0_i32, %arg0, %c0_i32_0 : i32, i32, i32
  }
  func.func @transform_1(%arg0: i32) -> (i32, i32) {
    %c0_i32 = arith.constant 0 : i32
    %c0_i32_0 = arith.constant 0 : i32
    %c0_i32_1 = arith.constant 0 : i32
    return %c0_i32, %c0_i32_0 : i32, i32
  }
  func.func @transform_2(%arg0: i32) -> (i32, i32) {
    %c0_i32 = arith.constant 0 : i32
    %c0_i32_0 = arith.constant 0 : i32
    %c0_i32_1 = arith.constant 0 : i32
    return %c0_i32, %c0_i32_0 : i32, i32
  }
  func.func @transform_3(%arg0: i32) -> (i32, i32) {
    %c0_i32 = arith.constant 0 : i32
    %c0_i32_0 = arith.constant 0 : i32
    %c0_i32_1 = arith.constant 0 : i32
    return %c0_i32, %c0_i32_0 : i32, i32
  }
  func.func @transform_4(%arg0: i32) -> (i32, i32) {
    %c0_i32 = arith.constant 0 : i32
    %c0_i32_0 = arith.constant 0 : i32
    %c0_i32_1 = arith.constant 0 : i32
    return %c0_i32, %c0_i32_0 : i32, i32
  }
  func.func @transform_5(%arg0: i32) -> (i32, i32) {
    %c0_i32 = arith.constant 0 : i32
    %c0_i32_0 = arith.constant 0 : i32
    %c0_i32_1 = arith.constant 0 : i32
    return %c0_i32, %c0_i32_0 : i32, i32
  }
  func.func @transform_6(%arg0: i32) -> (i32, i32) {
    %c0_i32 = arith.constant 0 : i32
    %c0_i32_0 = arith.constant 0 : i32
    %c0_i32_1 = arith.constant 0 : i32
    return %c0_i32, %c0_i32_0 : i32, i32
  }
  func.func @transform_7(%arg0: i32) -> (i32, i32) {
    %c0_i32 = arith.constant 0 : i32
    %c0_i32_0 = arith.constant 0 : i32
    %c0_i32_1 = arith.constant 0 : i32
    return %c0_i32, %c0_i32_0 : i32, i32
  }
  func.func @transform_8(%arg0: i32) -> (i32, i32) {
    %c0_i32 = arith.constant 0 : i32
    %c0_i32_0 = arith.constant 0 : i32
    %c0_i32_1 = arith.constant 0 : i32
    return %c0_i32, %c0_i32_0 : i32, i32
  }
  func.func @transform_9(%arg0: i32) -> (i32, i32) {
    %c0_i32 = arith.constant 0 : i32
    %c0_i32_0 = arith.constant 0 : i32
    return %arg0, %c0_i32 : i32, i32
  }
}

</mosaic_0001>

<bundles_post_ra>
// kernel: lstm_model_forward.1
= control target key start
LH: loop header
LB: loop body
LE: loop exit
PB: predicated region body
PF: predicated region fallthrough
CT: control target
= control target key end

     0   :  { %14 = vsyncpa [#allocation5], 0  ;;  %s3661_s30 = smov [#allocation4]   ;;  %s5093_s0 = inlined_call_operand.vmem [shape: f32[8,8,32], index: 0, kind: input, shape index: {}]   ;;  %s5094_s1 = inlined_call_operand.vmem [shape: bf16[32,512], index: 1, kind: input, shape index: {}]   ;;  %s5095_s2 = inlined_call_operand.vmem [shape: bf16[128,512], index: 2, kind: input, shape index: {}]   ;;  %s5096_s3 = inlined_call_operand.vmem [shape: f32[1,512], index: 3, kind: input, shape index: {}]   ;;  %s5097_s4 = inlined_call_operand.vmem [shape: bf16[128,512], index: 4, kind: input, shape index: {}]   ;;  %s5098_s5 = inlined_call_operand.hbm [shape: bf16[128,512], index: 5, kind: input, shape index: {}]   ;;  %s5099_s6 = inlined_call_operand.vmem [shape: f32[1,512], index: 6, kind: input, shape index: {}]   ;;  %s5100_s7 = inlined_call_operand.vmem [shape: f32[256,4], index: 7, kind: input, shape index: {}]   ;;  %s5101_s8 = inlined_call_operand.vmem [shape: f32[1,4], index: 8, kind: input, shape index: {}]   ;;  %s5102_s9 = inlined_call_operand.vmem [shape: f32[8,4], index: 9, kind: output, shape index: {}]  }
   0x1   :  { %s30_s10 = sshll.u32 %s3661_s30, 4  ;;  %s3637_s13 = scalar_lea.hbm %s5098_s5, 4096  ;;  %s31_s10 = int_to_ptr.vmem [resolvable:$true] %s30_s10 }
   0x2   :  { %p3638_p0 = scmp.ne.s32.totalorder %s5098_s5, %s3637_s13  ;;  %p3641_p1 = scmp.lt.u32.totalorder %s3637_s13, %s5098_s5 }
   0x4   :  { %p3643_p2 = pnand %p3641_p1, %p3638_p0 }
   0x6   :  { %3646 = shalt.err (!%p3643_p2)
}
   0x7   :  { %s3647_s18 = scalar_lea.vmem %s31_s10, 4096  ;;  %p3652_p4 = scmp.lt.s32.totalorder %s31_s10, %s31_s10 }
   0x8   :  { %p3648_p3 = scmp.ne.s32.totalorder %s31_s10, %s3647_s18  ;;  %p3653_p5 = scmp.lt.s32.totalorder %s3647_s18, %s3647_s18 }
   0xa   :  { %p3654_p6 = por %p3653_p5, %p3652_p4 }
   0xc   :  { %p3655_p7 = pnand %p3654_p6, %p3648_p3 }
   0xe   :  { %3658 = shalt.err (!%p3655_p7)
}
   0xf   :  { %s3662_s19 = smov 256   ;;  %s3663_s20 = smov 16  }
  0x10   :  { %36 = dma.hbm_to_vmem [thread:$0]  %s5098_s5, 4096, %s31_s10, [#allocation5], %s3662_s19, %s3662_s19, %s3663_s20  }
  0x11   :  { %3659 = dma.done.wait [#allocation5], 4096  }
  0x12   :  { %3660 = vsyncadd [#allocation5], 4294963200  ;;  %v5107_v0 = vmov 0   ;;  %v3165_v1 = vld [vmem:[%s5094_s1 + $0x4] ss:$16 sps:$4 sm:$0xff]   ;;  %v89_v6 = vld [vmem:[%s5093_s0 + $0x8] sm:$0xff]  ;;  %v101_v53 = vlaneseq }
  0x13   :  { %206 = vmatprep.mubr.bf16.mxu0 %v5107_v0  ;;  %279 = vmatprep.mubr.bf16.mxu1 %v5107_v0  ;;  %v3167_v2 = vld [vmem:[%s5094_s1] ss:$16 sps:$4 sm:$0xff]   ;;  %v3168_v3 = vld [vmem:[%s5094_s1 + $0x24] ss:$16 sps:$4 sm:$0xff]   ;;  %v3171_v7 = vld [vmem:[%s5094_s1 + $0xc] ss:$16 sps:$4 sm:$0xff]  }
  0x14   :  { %174 = vmatprep.subr.bf16.mxu0 %v3165_v1  ;;  %v3170_v4 = vld [vmem:[%s5094_s1 + $0x20] ss:$16 sps:$4 sm:$0xff]   ;;  %v3173_v8 = vld [vmem:[%s5094_s1 + $0x8] ss:$16 sps:$4 sm:$0xff]   ;;  %v3174_v9 = vld [vmem:[%s5094_s1 + $0x2c] ss:$16 sps:$4 sm:$0xff]   ;;  %247 = vmatprep.subr.bf16.mxu1 %v3171_v7 }
  0x15   :  { %v88_v5 = vld [vmem:[%s5093_s0] sm:$0xff]  ;;  %175 = vmatpush1.bf16.msra.mxu0 %v3167_v2  ;;  %v3176_v11 = vld [vmem:[%s5094_s1 + $0x28] ss:$16 sps:$4 sm:$0xff]   ;;  %vm161_vm0 = vcmask 261120   ;;  %248 = vmatpush1.bf16.msra.mxu1 %v3173_v8  ;;  %v3771_v13 = vld [vmem:[%s5095_s2 + $0xc] ss:$16 sps:$4 sm:$0xff]  }
  0x16   :  { %176 = vmatprep.subr.bf16.mxu0 %v3168_v3  ;;  %v96_v10 = vpack.c.bf16 %v89_v6, %v88_v5  ;;  %249 = vmatprep.subr.bf16.mxu1 %v3174_v9  ;;  %v3766_v12 = vld [vmem:[%s5095_s2 + $0x4] ss:$16 sps:$4 sm:$0xff]   ;;  %v3776_v14 = vld [vmem:[%s5095_s2] ss:$16 sps:$4 sm:$0xff]   ;;  %v3781_v15 = vld [vmem:[%s5095_s2 + $0x8] ss:$16 sps:$4 sm:$0xff]  }
  0x17   :  { %v3790_v16 = vld [vmem:[%s5095_s2 + $0x24] ss:$16 sps:$4 sm:$0xff]   ;;  %v3795_v17 = vld [vmem:[%s5095_s2 + $0x2c] ss:$16 sps:$4 sm:$0xff]   ;;  %v3803_v19 = vld [vmem:[%s5095_s2 + $0x20] ss:$16 sps:$4 sm:$0xff]  }
  0x18   :  { %v90_v18 = vld [vmem:[%s5093_s0 + $0x10] sm:$0xff]  ;;  %v91_v20 = vld [vmem:[%s5093_s0 + $0x18] sm:$0xff]  ;;  %v92_v29 = vld [vmem:[%s5093_s0 + $0x20] sm:$0xff]  ;;  %v3987_v54 = vshrl.u32 %v101_v53, 7  ;;  %vm2919_vm1 = vcmask 31744  }
  0x19   :  { %177 = vmatpush1.bf16.msra.mxu0 %v3170_v4  ;;  %250 = vmatpush1.bf16.msra.mxu1 %v3176_v11  ;;  %v3811_v21 = vld [vmem:[%s5095_s2 + $0x28] ss:$16 sps:$4 sm:$0xff]   ;;  %v97_v22 = vpack.c.bf16 %v91_v20, %v90_v18  ;;  %v3821_v23 = vld [vmem:[%s5095_s2 + $0x44] ss:$16 sps:$4 sm:$0xff]   ;;  %v3827_v24 = vld [vmem:[%s5095_s2 + $0x4c] ss:$16 sps:$4 sm:$0xff]  }
  0x1a   :  { %549 = vmatprep.subr.bf16.mxu0 %v3766_v12  ;;  %590 = vmatprep.subr.bf16.mxu1 %v3771_v13  ;;  %v3832_v25 = vld [vmem:[%s5095_s2 + $0x40] ss:$16 sps:$4 sm:$0xff]   ;;  %v3837_v26 = vld [vmem:[%s5095_s2 + $0x48] ss:$16 sps:$4 sm:$0xff]   ;;  %v3848_v27 = vld [vmem:[%s5095_s2 + $0x64] ss:$16 sps:$4 sm:$0xff]  }
  0x1b   :  { %v3853_v28 = vld [vmem:[%s5095_s2 + $0x6c] ss:$16 sps:$4 sm:$0xff]   ;;  %v3861_v30 = vld [vmem:[%s5095_s2 + $0x60] ss:$16 sps:$4 sm:$0xff]   ;;  %v3869_v32 = vld [vmem:[%s5095_s2 + $0x68] ss:$16 sps:$4 sm:$0xff]  }
  0x1c   :  { %2941 = vmatmul.mubr.msk.bf16.vlgmr.msra.gmra.mrb[0].mxu0 %vm161_vm0, %v96_v10  ;;  %2945 = vmatmul.mubr.msk.bf16.vlgmr.msra.gmra.mrb[0].mxu1 %vm161_vm0, %v96_v10  ;;  %v93_v31 = vld [vmem:[%s5093_s0 + $0x28] sm:$0xff]  ;;  %v3879_v34 = vld [vmem:[%s5095_s2 + $0x84] ss:$16 sps:$4 sm:$0xff]   ;;  %v3890_v36 = vld [vmem:[%s5095_s2 + $0x80] ss:$16 sps:$4 sm:$0xff]   ;;  %5113 = vst [vmem:[#allocation7_spill] sm:$0xff] %v3987_v54 }
  0x1d   :  { %216 = vmatprep.mubr.bf16.mxu0 %v5107_v0  ;;  %289 = vmatprep.mubr.bf16.mxu1 %v5107_v0  ;;  %v98_v33 = vpack.c.bf16 %v93_v31, %v92_v29  ;;  %v3885_v35 = vld [vmem:[%s5095_s2 + $0x8c] ss:$16 sps:$4 sm:$0xff]   ;;  %v3895_v37 = vld [vmem:[%s5095_s2 + $0x88] ss:$16 sps:$4 sm:$0xff]   ;;  %v3906_v38 = vld [vmem:[%s5095_s2 + $0xa4] ss:$16 sps:$4 sm:$0xff]  }
  0x1e   :  { %550 = vmatpush1.bf16.msra.mxu0 %v3776_v14  ;;  %591 = vmatpush1.bf16.msra.mxu1 %v3781_v15  ;;  %v3911_v39 = vld [vmem:[%s5095_s2 + $0xa0] ss:$16 sps:$4 sm:$0xff]   ;;  %v3916_v40 = vld [vmem:[%s5095_s2 + $0xac] ss:$16 sps:$4 sm:$0xff]   ;;  %v3927_v43 = vld [vmem:[%s5095_s2 + $0xa8] ss:$16 sps:$4 sm:$0xff]  }
  0x1f   :  { %551 = vmatprep.subr.bf16.mxu0 %v3790_v16  ;;  %592 = vmatprep.subr.bf16.mxu1 %v3795_v17  ;;  %v94_v41 = vld [vmem:[%s5093_s0 + $0x30] sm:$0xff]  ;;  %v95_v42 = vld [vmem:[%s5093_s0 + $0x38] sm:$0xff]  ;;  %v5106_v55 = vsub.s32 0, %v3987_v54  ;;  %v87_v56 = vld [vmem:[%s5096_s3] sm:$0xf]  ;;  %v5105_v57 = vsub.s32 1, %v3987_v54 }
  0x20   :  { %v99_v44 = vpack.c.bf16 %v95_v42, %v94_v41  ;;  %v3934_v45 = vld [vmem:[%s5095_s2 + $0xc4] ss:$16 sps:$4 sm:$0xff]   ;;  %v3939_v46 = vld [vmem:[%s5095_s2 + $0xcc] ss:$16 sps:$4 sm:$0xff]   ;;  %v3946_v47 = vld [vmem:[%s5095_s2 + $0xc0] ss:$16 sps:$4 sm:$0xff]  }
  0x21   :  { %v3951_v48 = vld [vmem:[%s5095_s2 + $0xc8] ss:$16 sps:$4 sm:$0xff]   ;;  %v3958_v49 = vld [vmem:[%s5095_s2 + $0xe4] ss:$16 sps:$4 sm:$0xff]   ;;  %v3963_v50 = vld [vmem:[%s5095_s2 + $0xec] ss:$16 sps:$4 sm:$0xff]   ;;  %v3996_v58 = vrot.slane %v87_v56, %v5106_v55  ;;  %v4000_v59 = vrot.slane %v87_v56, %v5105_v57 }
  0x22   :  { %552 = vmatpush1.bf16.msra.mxu0 %v3803_v19  ;;  %593 = vmatpush1.bf16.msra.mxu1 %v3811_v21  ;;  %v3974_v51 = vld [vmem:[%s5095_s2 + $0xe0] ss:$16 sps:$4 sm:$0xff]   ;;  %v3979_v52 = vld [vmem:[%s5095_s2 + $0xe8] ss:$16 sps:$4 sm:$0xff]   ;;  %v5104_v60 = vsub.s32 2, %v3987_v54  ;;  %v5103_v8 = vsub.s32 3, %v3987_v54 }
  0x23   :  { %553 = vmatprep.subr.bf16.mxu0 %v3821_v23  ;;  %594 = vmatprep.subr.bf16.mxu1 %v3827_v24 }
  0x24   :  { %2942 = vmatmul.mubr.msk.bf16.gmra.mrb[4].mxu0 %vm161_vm0, %v97_v22  ;;  %2946 = vmatmul.mubr.msk.bf16.gmra.mrb[4].mxu1 %vm161_vm0, %v97_v22  ;;  %v4011_v5 = vrot.slane %v87_v56, %v5104_v60  ;;  %v4021_v20 = vrot.slane %v87_v56, %v5103_v8 }
  0x25   :  { %226 = vmatprep.mubr.bf16.mxu0 %v5107_v0  ;;  %299 = vmatprep.mubr.bf16.mxu1 %v5107_v0 }
  0x26   :  { %554 = vmatpush1.bf16.msra.mxu0 %v3832_v25  ;;  %595 = vmatpush1.bf16.msra.mxu1 %v3837_v26 }
  0x27   :  { %555 = vmatprep.subr.bf16.mxu0 %v3848_v27  ;;  %596 = vmatprep.subr.bf16.mxu1 %v3853_v28 }
  0x2a   :  { %556 = vmatpush1.bf16.msra.mxu0 %v3861_v30  ;;  %597 = vmatpush1.bf16.msra.mxu1 %v3869_v32 }
  0x2b   :  { %557 = vmatprep.subr.bf16.mxu0 %v3879_v34  ;;  %598 = vmatprep.subr.bf16.mxu1 %v3885_v35 }
  0x2c   :  { %2943 = vmatmul.mubr.msk.bf16.gmra.mrb[8].mxu0 %vm161_vm0, %v98_v33  ;;  %2947 = vmatmul.mubr.msk.bf16.gmra.mrb[8].mxu1 %vm161_vm0, %v98_v33 }
  0x2d   :  { %236 = vmatprep.mubr.bf16.mxu0 %v5107_v0  ;;  %309 = vmatprep.mubr.bf16.mxu1 %v5107_v0 }
  0x2e   :  { %558 = vmatpush1.bf16.msra.mxu0 %v3890_v36  ;;  %599 = vmatpush1.bf16.msra.mxu1 %v3895_v37 }
  0x2f   :  { %559 = vmatprep.subr.bf16.mxu0 %v3906_v38  ;;  %600 = vmatprep.subr.bf16.mxu1 %v3916_v40 }
  0x32   :  { %560 = vmatpush1.bf16.msra.mxu0 %v3911_v39  ;;  %601 = vmatpush1.bf16.msra.mxu1 %v3927_v43 }
  0x33   :  { %561 = vmatprep.subr.bf16.mxu0 %v3934_v45  ;;  %602 = vmatprep.subr.bf16.mxu1 %v3939_v46 }
  0x34   :  { %2944 = vmatmul.mubr.msk.bf16.gmra.mrb[12].mxu0 %vm161_vm0, %v99_v44  ;;  %2948 = vmatmul.mubr.msk.bf16.gmra.mrb[12].mxu1 %vm161_vm0, %v99_v44 }
  0x35   :  { %581 = vmatprep.mubr.bf16.mxu0 %v5107_v0  ;;  %622 = vmatprep.mubr.bf16.mxu1 %v5107_v0 }
  0x36   :  { %562 = vmatpush1.bf16.msra.mxu0 %v3946_v47  ;;  %603 = vmatpush1.bf16.msra.mxu1 %v3951_v48 }
  0x37   :  { %563 = vmatprep.subr.bf16.mxu0 %v3958_v49  ;;  %604 = vmatprep.subr.bf16.mxu1 %v3963_v50 }
  0x3a   :  { %564 = vmatpush1.bf16.msra.mxu0 %v3974_v51  ;;  %605 = vmatpush1.bf16.msra.mxu1 %v3979_v52 }
  0x3b   :  { %669 = vmatprep.subr.bf16.mxu0 %v3766_v12  ;;  %710 = vmatprep.subr.bf16.mxu1 %v3771_v13 }
  0xef   :  { %v208_v61 = vpop.f32.mrb[0].mxu0  ;;  %v281_v7 = vpop.f32.mrb[0].mxu1 }
  0xf0   :  { %v209_v62 = vadd.f32 %v208_v61, %v3996_v58  ;;  %v210_v63 = vpop.f32.mrb[1].mxu0  ;;  %v283_v9 = vpop.f32.mrb[1].mxu1  ;;  %v282_v11 = vadd.f32 %v281_v7, %v4011_v5 }
  0xf1   :  { %v211_v1 = vadd.f32 %v210_v63, %v4000_v59  ;;  %v4005_v2 = vpop.f32.mrb[2].mxu0  ;;  %v4014_v10 = vpop.f32.mrb[2].mxu1  ;;  %v284_v29 = vadd.f32 %v283_v9, %v4021_v20 }
  0xf2   :  { %v2949_v3 = vmul.f32 -1.442695, %v209_v62  ;;  %v4007_v4 = vpop.f32.mrb[3].mxu0  ;;  %v4017_v18 = vpop.f32.mrb[3].mxu1  ;;  %v2951_v22 = vmul.f32 -1.442695, %v282_v11 }
  0xf3   :  { %v2950_v6 = vmul.f32 -1.442695, %v211_v1 }
  0xf4   :  { %3321 = vpow2.f32 %v2949_v3 }
  0xf5   :  { %3323 = vpow2.f32 %v2950_v6 }
  0xf6   :  { %3325 = vpow2.f32 %v2951_v22 }
  0xf7   :  { %3327 = vtanh.f32 %v284_v29  ;;  %v4065_v22 = vpop.f32.mrb[4].mxu0  ;;  %v4067_v29 = vpop.f32.mrb[4].mxu1 }
  0xfe   :  { %v3322_v31 = vpop.eup %3321 }
  0xff   :  { %v3324_v33 = vpop.eup %3323  ;;  %v365_v41 = vadd.f32 1.0, %v3322_v31  ;;  %v4069_v31 = vpop.f32.mrb[5].mxu0 }
 0x100   :  { %v366_v42 = vadd.f32 1.0, %v3324_v33  ;;  %v3326_v44 = vpop.eup %3325  ;;  %v4071_v33 = vpop.f32.mrb[5].mxu1 }
 0x101   :  { %3329 = vrcp.f32 %v365_v41  ;;  %v3328_v53 = vpop.eup %3327  ;;  %v367_v62 = vadd.f32 1.0, %v3326_v44  ;;  %v4073_v41 = vpop.f32.mrb[6].mxu0 }
 0x102   :  { %3331 = vrcp.f32 %v366_v42  ;;  %v4075_v42 = vpop.f32.mrb[6].mxu1  ;;  %v4077_v44 = vpop.f32.mrb[7].mxu0 }
 0x103   :  { %3333 = vrcp.f32 %v367_v62  ;;  %5115 = vst [vmem:[#allocation9_spill] sm:$0xff] %v4075_v42  ;;  %5116 = vst [vmem:[#allocation10_spill] sm:$0xff] %v4077_v44 }
 0x10b   :  { %v3330_v61 = vpop.eup %3329 }
 0x10c   :  { %v3332_v63 = vpop.eup %3331  ;;  %v376_v1 = vmul.f32 %v3330_v61, %v3328_v53  ;;  %v4079_v53 = vpop.f32.mrb[7].mxu1 }
 0x10d   :  { %v375_v3 = vmul.f32 0.0, %v3332_v63  ;;  %v3334_v6 = vpop.eup %3333  ;;  %5117 = vst [vmem:[#allocation11_spill] sm:$0xff] %v4079_v53  ;;  %v4081_v61 = vpop.f32.mrb[8].mxu0 }
 0x10e   :  { %5118 = vst [vmem:[#allocation12_spill] sm:$0xff] %v4081_v61  ;;  %v4083_v62 = vpop.f32.mrb[8].mxu1  ;;  %v4085_v63 = vpop.f32.mrb[9].mxu0 }
 0x10f   :  { %v4024_v56 = vadd.f32 %v376_v1, %v375_v3  ;;  %5119 = vst [vmem:[#allocation13_spill] sm:$0xff] %v4083_v62  ;;  %5120 = vst [vmem:[#allocation14_spill] sm:$0xff] %v4085_v63  ;;  %v4087_v1 = vpop.f32.mrb[9].mxu1  ;;  %v4089_v3 = vpop.f32.mrb[10].mxu0 }
 0x110   :  { %5121 = vst [vmem:[#allocation15_spill] sm:$0xff] %v4087_v1  ;;  %5122 = vst [vmem:[#allocation16_spill] sm:$0xff] %v4089_v3 }
 0x111   :  { %3335 = vtanh.f32 %v4024_v56 }
 0x11b   :  { %v3336_v7 = vpop.eup %3335 }
 0x11c   :  { %v4027_v9 = vmul.f32 %v3336_v7, %v3334_v6  ;;  %v4091_v6 = vpop.f32.mrb[10].mxu1  ;;  %v4093_v7 = vpop.f32.mrb[11].mxu0 }
 0x11d   :  { %5123 = vst [vmem:[#allocation17_spill] sm:$0xff] %v4091_v6  ;;  %5124 = vst [vmem:[#allocation18_spill] sm:$0xff] %v4093_v7  ;;  %v4097_v8 = vpop.f32.mrb[12].mxu0  ;;  %v213_v7 = vadd.f32 %v4005_v2, %v3996_v58 }
 0x11e   :  { %5114 = vst [vmem:[#allocation8_spill] sm:$0xff] %v4027_v9  ;;  %v388_v11 = vpack.c.bf16 %v4027_v9, %v4027_v9  ;;  %5126 = vst [vmem:[#allocation20_spill] sm:$0xff] %v4097_v8  ;;  %v4099_v60 = vpop.f32.mrb[13].mxu0  ;;  %v286_v8 = vadd.f32 %v4014_v10, %v4011_v5 }
 0x11f   :  { %5127 = vst [vmem:[#allocation21_spill] sm:$0xff] %v4099_v60  ;;  %v4103_v55 = vpop.f32.mrb[14].mxu0  ;;  %v215_v60 = vadd.f32 %v4007_v4, %v4000_v59 }
 0x120   :  { %582 = vmatmul.mubr.bf16.vlgmr.msra.gmra.mrb[16].mxu0 %v388_v11  ;;  %623 = vmatmul.mubr.bf16.vlgmr.msra.gmra.mrb[16].mxu1 %v388_v11  ;;  %v4095_v11 = vpop.f32.mrb[11].mxu1  ;;  %5129 = vst [vmem:[#allocation23_spill] sm:$0xff] %v4103_v55  ;;  %v4107_v54 = vpop.f32.mrb[15].mxu0  ;;  %v288_v55 = vadd.f32 %v4017_v18, %v4021_v20 }
 0x121   :  { %670 = vmatpush1.bf16.msra.mxu0 %v3776_v14  ;;  %711 = vmatpush1.bf16.msra.mxu1 %v3781_v15  ;;  %5125 = vst [vmem:[#allocation19_spill] sm:$0xff] %v4095_v11  ;;  %v4101_v57 = vpop.f32.mrb[12].mxu1  ;;  %5131 = vst [vmem:[#allocation25_spill] sm:$0xff] %v4107_v54 }
 0x122   :  { %671 = vmatprep.subr.bf16.mxu0 %v3790_v16  ;;  %712 = vmatprep.subr.bf16.mxu1 %v3795_v17  ;;  %5128 = vst [vmem:[#allocation22_spill] sm:$0xff] %v4101_v57 }
 0x123   :  { %701 = vmatprep.mubr.bf16.mxu0 %v5107_v0  ;;  %742 = vmatprep.mubr.bf16.mxu1 %v5107_v0  ;;  %v4105_v0 = vpop.f32.mrb[13].mxu1 }
 0x124   :  { %5130 = vst [vmem:[#allocation24_spill] sm:$0xff] %v4105_v0  ;;  %v4109_v9 = vpop.f32.mrb[14].mxu1 }
 0x125   :  { %672 = vmatpush1.bf16.msra.mxu0 %v3803_v19  ;;  %713 = vmatpush1.bf16.msra.mxu1 %v3811_v21  ;;  %5132 = vst [vmem:[#allocation26_spill] sm:$0xff] %v4109_v9  ;;  %v4111_v3 = vpop.f32.mrb[15].mxu1 }
 0x126   :  { %673 = vmatprep.subr.bf16.mxu0 %v3821_v23  ;;  %714 = vmatprep.subr.bf16.mxu1 %v3827_v24  ;;  %5133 = vst [vmem:[#allocation27_spill] sm:$0xff] %v4111_v3 }
 0x129   :  { %674 = vmatpush1.bf16.msra.mxu0 %v3832_v25  ;;  %715 = vmatpush1.bf16.msra.mxu1 %v3837_v26 }
 0x12a   :  { %675 = vmatprep.subr.bf16.mxu0 %v3848_v27  ;;  %716 = vmatprep.subr.bf16.mxu1 %v3853_v28 }
 0x12d   :  { %676 = vmatpush1.bf16.msra.mxu0 %v3861_v30  ;;  %717 = vmatpush1.bf16.msra.mxu1 %v3869_v32 }
 0x12e   :  { %677 = vmatprep.subr.bf16.mxu0 %v3879_v34  ;;  %718 = vmatprep.subr.bf16.mxu1 %v3885_v35 }
 0x131   :  { %678 = vmatpush1.bf16.msra.mxu0 %v3890_v36  ;;  %719 = vmatpush1.bf16.msra.mxu1 %v3895_v37 }
 0x132   :  { %679 = vmatprep.subr.bf16.mxu0 %v3906_v38  ;;  %720 = vmatprep.subr.bf16.mxu1 %v3916_v40 }
 0x135   :  { %680 = vmatpush1.bf16.msra.mxu0 %v3911_v39  ;;  %721 = vmatpush1.bf16.msra.mxu1 %v3927_v43 }
 0x136   :  { %681 = vmatprep.subr.bf16.mxu0 %v3934_v45  ;;  %722 = vmatprep.subr.bf16.mxu1 %v3939_v46 }
 0x139   :  { %682 = vmatpush1.bf16.msra.mxu0 %v3946_v47  ;;  %723 = vmatpush1.bf16.msra.mxu1 %v3951_v48 }
 0x13a   :  { %683 = vmatprep.subr.bf16.mxu0 %v3958_v49  ;;  %724 = vmatprep.subr.bf16.mxu1 %v3963_v50 }
 0x13d   :  { %684 = vmatpush1.bf16.msra.mxu0 %v3974_v51  ;;  %725 = vmatpush1.bf16.msra.mxu1 %v3979_v52 }
 0x13e   :  { %789 = vmatprep.subr.bf16.mxu0 %v3766_v12  ;;  %830 = vmatprep.subr.bf16.mxu1 %v3771_v13 }
 0x1f3   :  { %v583_v57 = vpop.f32.mrb[16].mxu0  ;;  %v624_v0 = vpop.f32.mrb[16].mxu1 }
 0x1f4   :  { %v631_v11 = vadd.f32 %v583_v57, %v213_v7  ;;  %v633_v54 = vadd.f32 %v624_v0, %v286_v8  ;;  %v585_v6 = vpop.f32.mrb[17].mxu0  ;;  %v626_v9 = vpop.f32.mrb[17].mxu1  ;;  %v294_v7 = vadd.f32 %v4071_v33, %v4021_v20 }
 0x1f5   :  { %v632_v1 = vadd.f32 %v585_v6, %v215_v60  ;;  %v634_v3 = vadd.f32 %v626_v9, %v288_v55  ;;  %v587_v63 = vpop.f32.mrb[18].mxu0  ;;  %v628_v62 = vpop.f32.mrb[18].mxu1  ;;  %v221_v6 = vadd.f32 %v4069_v31, %v4000_v59 }
 0x1f6   :  { %v2984_v2 = vmul.f32 -1.442695, %v631_v11  ;;  %v588_v61 = vpop.f32.mrb[19].mxu0  ;;  %v629_v53 = vpop.f32.mrb[19].mxu1  ;;  %v2986_v4 = vmul.f32 -1.442695, %v633_v54 }
 0x1f7   :  { %v2985_v10 = vmul.f32 -1.442695, %v632_v1  ;;  %v219_v1 = vadd.f32 %v4065_v22, %v3996_v58 }
 0x1f8   :  { %3337 = vpow2.f32 %v2984_v2 }
 0x1f9   :  { %3339 = vpow2.f32 %v2985_v10 }
 0x1fa   :  { %3341 = vtanh.f32 %v634_v3  ;;  %v292_v3 = vadd.f32 %v4067_v29, %v4011_v5 }
 0x1fb   :  { %3343 = vpow2.f32 %v2986_v4 }
 0x202   :  { %v3338_v44 = vpop.eup %3337 }
 0x203   :  { %v644_v42 = vadd.f32 1.0, %v3338_v44  ;;  %v3340_v18 = vpop.eup %3339 }
 0x204   :  { %v645_v0 = vadd.f32 1.0, %v3340_v18  ;;  %v3342_v57 = vpop.eup %3341 }
 0x205   :  { %3345 = vrcp.f32 %v644_v42  ;;  %v3344_v60 = vpop.eup %3343 }
 0x206   :  { %3347 = vrcp.f32 %v645_v0  ;;  %v646_v62 = vadd.f32 1.0, %v3344_v60 }
 0x208   :  { %3349 = vrcp.f32 %v646_v62 }
 0x20f   :  { %v3346_v55 = vpop.eup %3345 }
 0x210   :  { %v655_v8 = vmul.f32 %v3346_v55, %v3342_v57  ;;  %v3348_v9 = vpop.eup %3347 }
 0x211   :  { %v654_v53 = vmul.f32 %v3348_v9, %v4024_v56  ;;  %v5134_v56 = vmov 0  }
 0x212   :  { %v3350_v54 = vpop.eup %3349 }
 0x213   :  { %v4122_v61 = vadd.f32 %v655_v8, %v654_v53 }
 0x215   :  { %3351 = vtanh.f32 %v4122_v61 }
 0x21f   :  { %v3352_v44 = vpop.eup %3351 }
 0x220   :  { %v4125_v63 = vmul.f32 %v3352_v44, %v3350_v54 }
 0x222   :  { %v668_v42 = vpack.c.bf16 %v4125_v63, %v4125_v63 }
 0x224   :  { %702 = vmatmul.mubr.bf16.vlgmr.msra.gmra.mrb[20].mxu0 %v668_v42  ;;  %743 = vmatmul.mubr.bf16.vlgmr.msra.gmra.mrb[20].mxu1 %v668_v42 }
 0x225   :  { %790 = vmatpush1.bf16.msra.mxu0 %v3776_v14  ;;  %831 = vmatpush1.bf16.msra.mxu1 %v3781_v15 }
 0x226   :  { %791 = vmatprep.subr.bf16.mxu0 %v3790_v16  ;;  %832 = vmatprep.subr.bf16.mxu1 %v3795_v17 }
 0x227   :  { %821 = vmatprep.mubr.bf16.mxu0 %v5134_v56  ;;  %862 = vmatprep.mubr.bf16.mxu1 %v5134_v56 }
 0x229   :  { %792 = vmatpush1.bf16.msra.mxu0 %v3803_v19  ;;  %833 = vmatpush1.bf16.msra.mxu1 %v3811_v21 }
 0x22a   :  { %793 = vmatprep.subr.bf16.mxu0 %v3821_v23  ;;  %834 = vmatprep.subr.bf16.mxu1 %v3827_v24 }
 0x22d   :  { %794 = vmatpush1.bf16.msra.mxu0 %v3832_v25  ;;  %835 = vmatpush1.bf16.msra.mxu1 %v3837_v26 }
 0x22e   :  { %795 = vmatprep.subr.bf16.mxu0 %v3848_v27  ;;  %836 = vmatprep.subr.bf16.mxu1 %v3853_v28 }
 0x231   :  { %796 = vmatpush1.bf16.msra.mxu0 %v3861_v30  ;;  %837 = vmatpush1.bf16.msra.mxu1 %v3869_v32 }
 0x232   :  { %797 = vmatprep.subr.bf16.mxu0 %v3879_v34  ;;  %838 = vmatprep.subr.bf16.mxu1 %v3885_v35 }
 0x235   :  { %798 = vmatpush1.bf16.msra.mxu0 %v3890_v36  ;;  %839 = vmatpush1.bf16.msra.mxu1 %v3895_v37 }
 0x236   :  { %799 = vmatprep.subr.bf16.mxu0 %v3906_v38  ;;  %840 = vmatprep.subr.bf16.mxu1 %v3916_v40 }
 0x239   :  { %800 = vmatpush1.bf16.msra.mxu0 %v3911_v39  ;;  %841 = vmatpush1.bf16.msra.mxu1 %v3927_v43 }
 0x23a   :  { %801 = vmatprep.subr.bf16.mxu0 %v3934_v45  ;;  %842 = vmatprep.subr.bf16.mxu1 %v3939_v46 }
 0x23d   :  { %802 = vmatpush1.bf16.msra.mxu0 %v3946_v47  ;;  %843 = vmatpush1.bf16.msra.mxu1 %v3951_v48 }
 0x23e   :  { %803 = vmatprep.subr.bf16.mxu0 %v3958_v49  ;;  %844 = vmatprep.subr.bf16.mxu1 %v3963_v50 }
 0x241   :  { %804 = vmatpush1.bf16.msra.mxu0 %v3974_v51  ;;  %845 = vmatpush1.bf16.msra.mxu1 %v3979_v52 }
 0x242   :  { %909 = vmatprep.subr.bf16.mxu0 %v3766_v12  ;;  %950 = vmatprep.subr.bf16.mxu1 %v3771_v13 }
 0x2f7   :  { %v703_v11 = vpop.f32.mrb[20].mxu0  ;;  %v744_v2 = vpop.f32.mrb[20].mxu1 }
 0x2f8   :  { %v751_v10 = vadd.f32 %v703_v11, %v219_v1  ;;  %v753_v4 = vadd.f32 %v744_v2, %v292_v3  ;;  %v705_v18 = vpop.f32.mrb[21].mxu0  ;;  %v746_v0 = vpop.f32.mrb[21].mxu1 }
 0x2f9   :  { %v752_v57 = vadd.f32 %v705_v18, %v221_v6  ;;  %v754_v60 = vadd.f32 %v746_v0, %v294_v7  ;;  %v707_v55 = vpop.f32.mrb[22].mxu0  ;;  %v748_v8 = vpop.f32.mrb[22].mxu1 }
 0x2fa   :  { %v2987_v22 = vmul.f32 -1.442695, %v751_v10  ;;  %v708_v9 = vpop.f32.mrb[23].mxu0  ;;  %v749_v62 = vpop.f32.mrb[23].mxu1  ;;  %v2989_v31 = vmul.f32 -1.442695, %v753_v4 }
 0x2fb   :  { %v2988_v29 = vmul.f32 -1.442695, %v752_v57  ;;  %v5136_v8 = vld [vmem:[#allocation10_spill] sm:$0xff]  ;;  %v5137_v9 = vld [vmem:[#allocation11_spill] sm:$0xff] }
 0x2fc   :  { %3353 = vpow2.f32 %v2987_v22  ;;  %v225_v22 = vadd.f32 %v5136_v8, %v4000_v59  ;;  %v298_v62 = vadd.f32 %v5137_v9, %v4021_v20 }
 0x2fd   :  { %3355 = vpow2.f32 %v2988_v29 }
 0x2fe   :  { %3357 = vtanh.f32 %v754_v60  ;;  %v5135_v60 = vld [vmem:[#allocation9_spill] sm:$0xff] }
 0x2ff   :  { %3359 = vpow2.f32 %v2989_v31  ;;  %v296_v55 = vadd.f32 %v5135_v60, %v4011_v5 }
 0x306   :  { %v3354_v53 = vpop.eup %3353 }
 0x307   :  { %v764_v54 = vadd.f32 1.0, %v3354_v53  ;;  %v3356_v33 = vpop.eup %3355 }
 0x308   :  { %v765_v44 = vadd.f32 1.0, %v3356_v33  ;;  %v3358_v42 = vpop.eup %3357 }
 0x309   :  { %3361 = vrcp.f32 %v764_v54  ;;  %v3360_v1 = vpop.eup %3359 }
 0x30a   :  { %3363 = vrcp.f32 %v765_v44  ;;  %v766_v11 = vadd.f32 1.0, %v3360_v1 }
 0x30c   :  { %3365 = vrcp.f32 %v766_v11 }
 0x313   :  { %v3362_v3 = vpop.eup %3361 }
 0x314   :  { %v775_v6 = vmul.f32 %v3362_v3, %v3358_v42  ;;  %v3364_v7 = vpop.eup %3363 }
 0x315   :  { %v774_v2 = vmul.f32 %v3364_v7, %v4122_v61  ;;  %v223_v61 = vadd.f32 %v4073_v41, %v3996_v58 }
 0x316   :  { %v3366_v4 = vpop.eup %3365 }
 0x317   :  { %v4172_v10 = vadd.f32 %v775_v6, %v774_v2 }
 0x319   :  { %3367 = vtanh.f32 %v4172_v10 }
 0x323   :  { %v3368_v18 = vpop.eup %3367 }
 0x324   :  { %v4175_v0 = vmul.f32 %v3368_v18, %v3366_v4 }
 0x326   :  { %v788_v57 = vpack.c.bf16 %v4175_v0, %v4175_v0 }
 0x328   :  { %822 = vmatmul.mubr.bf16.vlgmr.msra.gmra.mrb[24].mxu0 %v788_v57  ;;  %863 = vmatmul.mubr.bf16.vlgmr.msra.gmra.mrb[24].mxu1 %v788_v57 }
 0x329   :  { %910 = vmatpush1.bf16.msra.mxu0 %v3776_v14  ;;  %951 = vmatpush1.bf16.msra.mxu1 %v3781_v15 }
 0x32a   :  { %911 = vmatprep.subr.bf16.mxu0 %v3790_v16  ;;  %952 = vmatprep.subr.bf16.mxu1 %v3795_v17 }
 0x32b   :  { %941 = vmatprep.mubr.bf16.mxu0 %v5134_v56  ;;  %982 = vmatprep.mubr.bf16.mxu1 %v5134_v56 }
 0x32d   :  { %912 = vmatpush1.bf16.msra.mxu0 %v3803_v19  ;;  %953 = vmatpush1.bf16.msra.mxu1 %v3811_v21 }
 0x32e   :  { %913 = vmatprep.subr.bf16.mxu0 %v3821_v23  ;;  %954 = vmatprep.subr.bf16.mxu1 %v3827_v24 }
 0x331   :  { %914 = vmatpush1.bf16.msra.mxu0 %v3832_v25  ;;  %955 = vmatpush1.bf16.msra.mxu1 %v3837_v26 }
 0x332   :  { %915 = vmatprep.subr.bf16.mxu0 %v3848_v27  ;;  %956 = vmatprep.subr.bf16.mxu1 %v3853_v28 }
 0x335   :  { %916 = vmatpush1.bf16.msra.mxu0 %v3861_v30  ;;  %957 = vmatpush1.bf16.msra.mxu1 %v3869_v32 }
 0x336   :  { %917 = vmatprep.subr.bf16.mxu0 %v3879_v34  ;;  %958 = vmatprep.subr.bf16.mxu1 %v3885_v35 }
 0x339   :  { %918 = vmatpush1.bf16.msra.mxu0 %v3890_v36  ;;  %959 = vmatpush1.bf16.msra.mxu1 %v3895_v37 }
 0x33a   :  { %919 = vmatprep.subr.bf16.mxu0 %v3906_v38  ;;  %960 = vmatprep.subr.bf16.mxu1 %v3916_v40 }
 0x33d   :  { %920 = vmatpush1.bf16.msra.mxu0 %v3911_v39  ;;  %961 = vmatpush1.bf16.msra.mxu1 %v3927_v43 }
 0x33e   :  { %921 = vmatprep.subr.bf16.mxu0 %v3934_v45  ;;  %962 = vmatprep.subr.bf16.mxu1 %v3939_v46 }
 0x341   :  { %922 = vmatpush1.bf16.msra.mxu0 %v3946_v47  ;;  %963 = vmatpush1.bf16.msra.mxu1 %v3951_v48 }
 0x342   :  { %923 = vmatprep.subr.bf16.mxu0 %v3958_v49  ;;  %964 = vmatprep.subr.bf16.mxu1 %v3963_v50 }
 0x345   :  { %924 = vmatpush1.bf16.msra.mxu0 %v3974_v51  ;;  %965 = vmatpush1.bf16.msra.mxu1 %v3979_v52 }
 0x346   :  { %1029 = vmatprep.subr.bf16.mxu0 %v3766_v12  ;;  %1070 = vmatprep.subr.bf16.mxu1 %v3771_v13 }
 0x3fb   :  { %v823_v29 = vpop.f32.mrb[24].mxu0  ;;  %v864_v31 = vpop.f32.mrb[24].mxu1 }
 0x3fc   :  { %v871_v53 = vadd.f32 %v823_v29, %v223_v61  ;;  %v873_v54 = vadd.f32 %v864_v31, %v296_v55  ;;  %v825_v33 = vpop.f32.mrb[25].mxu0  ;;  %v866_v44 = vpop.f32.mrb[25].mxu1 }
 0x3fd   :  { %v872_v42 = vadd.f32 %v825_v33, %v225_v22  ;;  %v874_v1 = vadd.f32 %v866_v44, %v298_v62  ;;  %v827_v3 = vpop.f32.mrb[26].mxu0  ;;  %v868_v6 = vpop.f32.mrb[26].mxu1 }
 0x3fe   :  { %v2990_v41 = vmul.f32 -1.442695, %v871_v53  ;;  %v828_v7 = vpop.f32.mrb[27].mxu0  ;;  %v869_v11 = vpop.f32.mrb[27].mxu1  ;;  %v2992_v4 = vmul.f32 -1.442695, %v873_v54 }
 0x3ff   :  { %v2991_v2 = vmul.f32 -1.442695, %v872_v42  ;;  %v5139_v3 = vld [vmem:[#allocation13_spill] sm:$0xff]  ;;  %v5141_v11 = vld [vmem:[#allocation15_spill] sm:$0xff] }
 0x400   :  { %3369 = vpow2.f32 %v2990_v41  ;;  %v302_v6 = vadd.f32 %v5139_v3, %v4011_v5  ;;  %v5140_v41 = vld [vmem:[#allocation14_spill] sm:$0xff] }
 0x401   :  { %3371 = vpow2.f32 %v2991_v2  ;;  %v231_v7 = vadd.f32 %v5140_v41, %v4000_v59  ;;  %v304_v2 = vadd.f32 %v5141_v11, %v4021_v20 }
 0x402   :  { %3373 = vtanh.f32 %v874_v1 }
 0x403   :  { %3375 = vpow2.f32 %v2992_v4 }
 0x40a   :  { %v3370_v18 = vpop.eup %3369 }
 0x40b   :  { %v884_v57 = vadd.f32 1.0, %v3370_v18  ;;  %v3372_v60 = vpop.eup %3371 }
 0x40c   :  { %v885_v61 = vadd.f32 1.0, %v3372_v60  ;;  %v3374_v55 = vpop.eup %3373 }
 0x40d   :  { %3377 = vrcp.f32 %v884_v57  ;;  %v3376_v8 = vpop.eup %3375 }
 0x40e   :  { %3379 = vrcp.f32 %v885_v61  ;;  %v886_v29 = vadd.f32 1.0, %v3376_v8 }
 0x410   :  { %3381 = vrcp.f32 %v886_v29 }
 0x417   :  { %v3378_v22 = vpop.eup %3377 }
 0x418   :  { %v895_v9 = vmul.f32 %v3378_v22, %v3374_v55  ;;  %v3380_v62 = vpop.eup %3379 }
 0x419   :  { %v894_v31 = vmul.f32 %v3380_v62, %v4172_v10  ;;  %v5138_v10 = vld [vmem:[#allocation12_spill] sm:$0xff] }
 0x41a   :  { %v3382_v54 = vpop.eup %3381  ;;  %v229_v1 = vadd.f32 %v5138_v10, %v3996_v58 }
 0x41b   :  { %v4222_v53 = vadd.f32 %v895_v9, %v894_v31 }
 0x41d   :  { %3383 = vtanh.f32 %v4222_v53 }
 0x427   :  { %v3384_v33 = vpop.eup %3383 }
 0x428   :  { %v4225_v44 = vmul.f32 %v3384_v33, %v3382_v54 }
 0x42a   :  { %v908_v42 = vpack.c.bf16 %v4225_v44, %v4225_v44 }
 0x42c   :  { %942 = vmatmul.mubr.bf16.vlgmr.msra.gmra.mrb[28].mxu0 %v908_v42  ;;  %983 = vmatmul.mubr.bf16.vlgmr.msra.gmra.mrb[28].mxu1 %v908_v42 }
 0x42d   :  { %1030 = vmatpush1.bf16.msra.mxu0 %v3776_v14  ;;  %1071 = vmatpush1.bf16.msra.mxu1 %v3781_v15 }
 0x42e   :  { %1031 = vmatprep.subr.bf16.mxu0 %v3790_v16  ;;  %1072 = vmatprep.subr.bf16.mxu1 %v3795_v17 }
 0x42f   :  { %1061 = vmatprep.mubr.bf16.mxu0 %v5134_v56  ;;  %1102 = vmatprep.mubr.bf16.mxu1 %v5134_v56 }
 0x431   :  { %1032 = vmatpush1.bf16.msra.mxu0 %v3803_v19  ;;  %1073 = vmatpush1.bf16.msra.mxu1 %v3811_v21 }
 0x432   :  { %1033 = vmatprep.subr.bf16.mxu0 %v3821_v23  ;;  %1074 = vmatprep.subr.bf16.mxu1 %v3827_v24 }
 0x435   :  { %1034 = vmatpush1.bf16.msra.mxu0 %v3832_v25  ;;  %1075 = vmatpush1.bf16.msra.mxu1 %v3837_v26 }
 0x436   :  { %1035 = vmatprep.subr.bf16.mxu0 %v3848_v27  ;;  %1076 = vmatprep.subr.bf16.mxu1 %v3853_v28 }
 0x439   :  { %1036 = vmatpush1.bf16.msra.mxu0 %v3861_v30  ;;  %1077 = vmatpush1.bf16.msra.mxu1 %v3869_v32 }
 0x43a   :  { %1037 = vmatprep.subr.bf16.mxu0 %v3879_v34  ;;  %1078 = vmatprep.subr.bf16.mxu1 %v3885_v35 }
 0x43d   :  { %1038 = vmatpush1.bf16.msra.mxu0 %v3890_v36  ;;  %1079 = vmatpush1.bf16.msra.mxu1 %v3895_v37 }
 0x43e   :  { %1039 = vmatprep.subr.bf16.mxu0 %v3906_v38  ;;  %1080 = vmatprep.subr.bf16.mxu1 %v3916_v40 }
 0x441   :  { %1040 = vmatpush1.bf16.msra.mxu0 %v3911_v39  ;;  %1081 = vmatpush1.bf16.msra.mxu1 %v3927_v43 }
 0x442   :  { %1041 = vmatprep.subr.bf16.mxu0 %v3934_v45  ;;  %1082 = vmatprep.subr.bf16.mxu1 %v3939_v46 }
 0x445   :  { %1042 = vmatpush1.bf16.msra.mxu0 %v3946_v47  ;;  %1083 = vmatpush1.bf16.msra.mxu1 %v3951_v48 }
 0x446   :  { %1043 = vmatprep.subr.bf16.mxu0 %v3958_v49  ;;  %1084 = vmatprep.subr.bf16.mxu1 %v3963_v50 }
 0x449   :  { %1044 = vmatpush1.bf16.msra.mxu0 %v3974_v51  ;;  %1085 = vmatpush1.bf16.msra.mxu1 %v3979_v52 }
 0x44a   :  { %1149 = vmatprep.subr.bf16.mxu0 %v3766_v12  ;;  %1190 = vmatprep.subr.bf16.mxu1 %v3771_v13 }
 0x4ff   :  { %v943_v4 = vpop.f32.mrb[28].mxu0  ;;  %v984_v18 = vpop.f32.mrb[28].mxu1 }
 0x500   :  { %v991_v57 = vadd.f32 %v943_v4, %v229_v1  ;;  %v993_v60 = vadd.f32 %v984_v18, %v302_v6  ;;  %v945_v61 = vpop.f32.mrb[29].mxu0  ;;  %v986_v55 = vpop.f32.mrb[29].mxu1 }
 0x501   :  { %v992_v8 = vadd.f32 %v945_v61, %v231_v7  ;;  %v994_v22 = vadd.f32 %v986_v55, %v304_v2  ;;  %v947_v9 = vpop.f32.mrb[30].mxu0  ;;  %v988_v62 = vpop.f32.mrb[30].mxu1 }
 0x502   :  { %v2993_v29 = vmul.f32 -1.442695, %v991_v57  ;;  %v948_v31 = vpop.f32.mrb[31].mxu0  ;;  %v989_v54 = vpop.f32.mrb[31].mxu1  ;;  %v2995_v42 = vmul.f32 -1.442695, %v993_v60 }
 0x503   :  { %v2994_v33 = vmul.f32 -1.442695, %v992_v8 }
 0x504   :  { %3385 = vpow2.f32 %v2993_v29 }
 0x505   :  { %3387 = vpow2.f32 %v2994_v33 }
 0x506   :  { %3389 = vtanh.f32 %v994_v22 }
 0x507   :  { %3391 = vpow2.f32 %v2995_v42 }
 0x50e   :  { %v3386_v10 = vpop.eup %3385 }
 0x50f   :  { %v1004_v3 = vadd.f32 1.0, %v3386_v10  ;;  %v3388_v41 = vpop.eup %3387 }
 0x510   :  { %v1005_v1 = vadd.f32 1.0, %v3388_v41  ;;  %v3390_v6 = vpop.eup %3389  ;;  %v3578_v41 = vld [vmem:[%s5095_s2 + $0x8] ss:$16 sps:$4 sm:$0xff]  }
 0x511   :  { %3393 = vrcp.f32 %v1004_v3  ;;  %v3392_v7 = vpop.eup %3391  ;;  %v3577_v3 = vld [vmem:[%s5095_s2] ss:$16 sps:$4 sm:$0xff]  }
 0x512   :  { %3395 = vrcp.f32 %v1005_v1  ;;  %v1006_v18 = vadd.f32 1.0, %v3392_v7  ;;  %v3579_v1 = vld [vmem:[%s5095_s2 + $0x24] ss:$16 sps:$4 sm:$0xff]   ;;  %v3581_v7 = vld [vmem:[%s5095_s2 + $0x20] ss:$16 sps:$4 sm:$0xff]  }
 0x514   :  { %3397 = vrcp.f32 %v1006_v18  ;;  %v3585_v18 = vld [vmem:[%s5095_s2 + $0x40] ss:$16 sps:$4 sm:$0xff]  }
 0x51b   :  { %v3394_v11 = vpop.eup %3393 }
 0x51c   :  { %v1015_v2 = vmul.f32 %v3394_v11, %v3390_v6  ;;  %v3396_v4 = vpop.eup %3395  ;;  %v3580_v6 = vld [vmem:[%s5095_s2 + $0x2c] ss:$16 sps:$4 sm:$0xff]   ;;  %v3582_v11 = vld [vmem:[%s5095_s2 + $0x28] ss:$16 sps:$4 sm:$0xff]  }
 0x51d   :  { %v1014_v57 = vmul.f32 %v3396_v4, %v4222_v53  ;;  %v3584_v4 = vld [vmem:[%s5095_s2 + $0x4c] ss:$16 sps:$4 sm:$0xff]  }
 0x51e   :  { %v3398_v60 = vpop.eup %3397 }
 0x51f   :  { %v4272_v61 = vadd.f32 %v1015_v2, %v1014_v57  ;;  %v3583_v2 = vld [vmem:[%s5095_s2 + $0x44] ss:$16 sps:$4 sm:$0xff]   ;;  %v3586_v57 = vld [vmem:[%s5095_s2 + $0x48] ss:$16 sps:$4 sm:$0xff]  }
 0x521   :  { %3399 = vtanh.f32 %v4272_v61 }
 0x52b   :  { %v3400_v55 = vpop.eup %3399 }
 0x52c   :  { %v4275_v8 = vmul.f32 %v3400_v55, %v3398_v60  ;;  %v3588_v60 = vld [vmem:[%s5095_s2 + $0x6c] ss:$16 sps:$4 sm:$0xff]   ;;  %v3589_v55 = vld [vmem:[%s5095_s2 + $0x60] ss:$16 sps:$4 sm:$0xff]  }
 0x52e   :  { %v1028_v22 = vpack.c.bf16 %v4275_v8, %v4275_v8 }
 0x530   :  { %1062 = vmatmul.mubr.bf16.vlgmr.msra.gmra.mrb[32].mxu0 %v1028_v22  ;;  %1103 = vmatmul.mubr.bf16.vlgmr.msra.gmra.mrb[32].mxu1 %v1028_v22  ;;  %v3590_v22 = vld [vmem:[%s5095_s2 + $0x68] ss:$16 sps:$4 sm:$0xff]  }
 0x531   :  { %1150 = vmatpush1.bf16.msra.mxu0 %v3776_v14  ;;  %1191 = vmatpush1.bf16.msra.mxu1 %v3781_v15  ;;  %v5142_v14 = vld [vmem:[#allocation16_spill] sm:$0xff] }
 0x532   :  { %1151 = vmatprep.subr.bf16.mxu0 %v3790_v16  ;;  %1192 = vmatprep.subr.bf16.mxu1 %v3795_v17  ;;  %v233_v15 = vadd.f32 %v5142_v14, %v3996_v58  ;;  %v5143_v16 = vld [vmem:[#allocation17_spill] sm:$0xff] }
 0x533   :  { %1181 = vmatprep.mubr.bf16.mxu0 %v5134_v56  ;;  %1222 = vmatprep.mubr.bf16.mxu1 %v5134_v56  ;;  %v306_v17 = vadd.f32 %v5143_v16, %v4011_v5  ;;  %v3591_v14 = vld [vmem:[%s5095_s2 + $0x84] ss:$16 sps:$4 sm:$0xff]   ;;  %v3593_v16 = vld [vmem:[%s5095_s2 + $0x80] ss:$16 sps:$4 sm:$0xff]  }
 0x535   :  { %1152 = vmatpush1.bf16.msra.mxu0 %v3803_v19  ;;  %1193 = vmatpush1.bf16.msra.mxu1 %v3811_v21  ;;  %v5144_v19 = vld [vmem:[#allocation18_spill] sm:$0xff] }
 0x536   :  { %1153 = vmatprep.subr.bf16.mxu0 %v3821_v23  ;;  %1194 = vmatprep.subr.bf16.mxu1 %v3827_v24  ;;  %v235_v21 = vadd.f32 %v5144_v19, %v4000_v59  ;;  %v5145_v23 = vld [vmem:[#allocation19_spill] sm:$0xff] }
 0x537   :  { %v308_v24 = vadd.f32 %v5145_v23, %v4021_v20  ;;  %v3595_v19 = vld [vmem:[%s5095_s2 + $0xa4] ss:$16 sps:$4 sm:$0xff]   ;;  %v3597_v23 = vld [vmem:[%s5095_s2 + $0xa0] ss:$16 sps:$4 sm:$0xff]  }
 0x539   :  { %1154 = vmatpush1.bf16.msra.mxu0 %v3832_v25  ;;  %1195 = vmatpush1.bf16.msra.mxu1 %v3837_v26 }
 0x53a   :  { %1155 = vmatprep.subr.bf16.mxu0 %v3848_v27  ;;  %1196 = vmatprep.subr.bf16.mxu1 %v3853_v28 }
 0x53d   :  { %1156 = vmatpush1.bf16.msra.mxu0 %v3861_v30  ;;  %1197 = vmatpush1.bf16.msra.mxu1 %v3869_v32 }
 0x53e   :  { %1157 = vmatprep.subr.bf16.mxu0 %v3879_v34  ;;  %1198 = vmatprep.subr.bf16.mxu1 %v3885_v35 }
 0x541   :  { %1158 = vmatpush1.bf16.msra.mxu0 %v3890_v36  ;;  %1199 = vmatpush1.bf16.msra.mxu1 %v3895_v37 }
 0x542   :  { %1159 = vmatprep.subr.bf16.mxu0 %v3906_v38  ;;  %1200 = vmatprep.subr.bf16.mxu1 %v3916_v40 }
 0x545   :  { %1160 = vmatpush1.bf16.msra.mxu0 %v3911_v39  ;;  %1201 = vmatpush1.bf16.msra.mxu1 %v3927_v43 }
 0x546   :  { %1161 = vmatprep.subr.bf16.mxu0 %v3934_v45  ;;  %1202 = vmatprep.subr.bf16.mxu1 %v3939_v46 }
 0x549   :  { %1162 = vmatpush1.bf16.msra.mxu0 %v3946_v47  ;;  %1203 = vmatpush1.bf16.msra.mxu1 %v3951_v48 }
 0x54a   :  { %1163 = vmatprep.subr.bf16.mxu0 %v3958_v49  ;;  %1204 = vmatprep.subr.bf16.mxu1 %v3963_v50 }
 0x54d   :  { %1164 = vmatpush1.bf16.msra.mxu0 %v3974_v51  ;;  %1205 = vmatpush1.bf16.msra.mxu1 %v3979_v52 }
 0x54e   :  { %1269 = vmatprep.subr.bf16.mxu0 %v3766_v12  ;;  %1310 = vmatprep.subr.bf16.mxu1 %v3771_v13 }
 0x603   :  { %v1063_v25 = vpop.f32.mrb[32].mxu0  ;;  %v1104_v26 = vpop.f32.mrb[32].mxu1 }
 0x604   :  { %v1111_v27 = vadd.f32 %v1063_v25, %v233_v15  ;;  %v1113_v28 = vadd.f32 %v1104_v26, %v306_v17  ;;  %v1065_v30 = vpop.f32.mrb[33].mxu0  ;;  %v1106_v12 = vpop.f32.mrb[33].mxu1  ;;  %v3592_v15 = vld [vmem:[%s5095_s2 + $0x8c] ss:$16 sps:$4 sm:$0xff]   ;;  %v3594_v17 = vld [vmem:[%s5095_s2 + $0x88] ss:$16 sps:$4 sm:$0xff]  }
 0x605   :  { %v1112_v32 = vadd.f32 %v1065_v30, %v235_v21  ;;  %v1114_v13 = vadd.f32 %v1106_v12, %v308_v24  ;;  %v1067_v34 = vpop.f32.mrb[34].mxu0  ;;  %v1108_v35 = vpop.f32.mrb[34].mxu1  ;;  %v3596_v21 = vld [vmem:[%s5095_s2 + $0xac] ss:$16 sps:$4 sm:$0xff]   ;;  %v3598_v24 = vld [vmem:[%s5095_s2 + $0xa8] ss:$16 sps:$4 sm:$0xff]  }
 0x606   :  { %v2996_v36 = vmul.f32 -1.442695, %v1111_v27  ;;  %v1068_v37 = vpop.f32.mrb[35].mxu0  ;;  %v1109_v38 = vpop.f32.mrb[35].mxu1  ;;  %v2998_v40 = vmul.f32 -1.442695, %v1113_v28 }
 0x607   :  { %v2997_v39 = vmul.f32 -1.442695, %v1112_v32  ;;  %v3599_v25 = vld [vmem:[%s5095_s2 + $0xc4] ss:$16 sps:$4 sm:$0xff]   ;;  %v3600_v26 = vld [vmem:[%s5095_s2 + $0xcc] ss:$16 sps:$4 sm:$0xff]  }
 0x608   :  { %3401 = vpow2.f32 %v2996_v36  ;;  %v3601_v27 = vld [vmem:[%s5095_s2 + $0xc0] ss:$16 sps:$4 sm:$0xff]   ;;  %v3602_v28 = vld [vmem:[%s5095_s2 + $0xc8] ss:$16 sps:$4 sm:$0xff]   ;;  %v3603_v30 = vld [vmem:[%s5095_s2 + $0xe4] ss:$16 sps:$4 sm:$0xff]  }
 0x609   :  { %3403 = vpow2.f32 %v2997_v39  ;;  %v3604_v12 = vld [vmem:[%s5095_s2 + $0xec] ss:$16 sps:$4 sm:$0xff]   ;;  %v3227_v32 = vld [vmem:[%s5097_s4 + $0x4] ss:$16 sps:$4 sm:$0xff]  }
 0x60a   :  { %3405 = vtanh.f32 %v1114_v13  ;;  %v3230_v13 = vld [vmem:[%s5097_s4 + $0xc] ss:$16 sps:$4 sm:$0xff]  }
 0x60b   :  { %3407 = vpow2.f32 %v2998_v40  ;;  %v5146_v34 = vld [vmem:[#allocation20_spill] sm:$0xff]  ;;  %v5147_v36 = vld [vmem:[#allocation22_spill] sm:$0xff] }
 0x60c   :  { %v239_v35 = vadd.f32 %v5146_v34, %v3996_v58  ;;  %v312_v37 = vadd.f32 %v5147_v36, %v4011_v5  ;;  %v3254_v34 = vld [vmem:[%s5097_s4 + $0x8c] ss:$16 sps:$4 sm:$0xff]   ;;  %v3252_v36 = vld [vmem:[%s5097_s4 + $0x88] ss:$16 sps:$4 sm:$0xff]  }
 0x612   :  { %v3402_v43 = vpop.eup %3401 }
 0x613   :  { %v1124_v45 = vadd.f32 1.0, %v3402_v43  ;;  %v3404_v46 = vpop.eup %3403 }
 0x614   :  { %v1125_v47 = vadd.f32 1.0, %v3404_v46  ;;  %v3406_v48 = vpop.eup %3405 }
 0x615   :  { %3409 = vrcp.f32 %v1124_v45  ;;  %v3408_v49 = vpop.eup %3407 }
 0x616   :  { %3411 = vrcp.f32 %v1125_v47  ;;  %v1126_v62 = vadd.f32 1.0, %v3408_v49 }
 0x618   :  { %3413 = vrcp.f32 %v1126_v62 }
 0x61f   :  { %v3410_v50 = vpop.eup %3409 }
 0x620   :  { %v1135_v53 = vmul.f32 %v3410_v50, %v3406_v48  ;;  %v3412_v9 = vpop.eup %3411 }
 0x621   :  { %v1134_v29 = vmul.f32 %v3412_v9, %v4272_v61  ;;  %v3587_v61 = vld [vmem:[%s5095_s2 + $0x64] ss:$16 sps:$4 sm:$0xff]  }
 0x622   :  { %v3414_v54 = vpop.eup %3413 }
 0x623   :  { %v4322_v31 = vadd.f32 %v1135_v53, %v1134_v29 }
 0x625   :  { %3415 = vtanh.f32 %v4322_v31 }
 0x62f   :  { %v3416_v33 = vpop.eup %3415 }
 0x630   :  { %v4325_v42 = vmul.f32 %v3416_v33, %v3414_v54 }
 0x632   :  { %v1148_v10 = vpack.c.bf16 %v4325_v42, %v4325_v42 }
 0x634   :  { %1182 = vmatmul.mubr.bf16.vlgmr.msra.gmra.mrb[36].mxu0 %v1148_v10  ;;  %1223 = vmatmul.mubr.bf16.vlgmr.msra.gmra.mrb[36].mxu1 %v1148_v10 }
 0x635   :  { %1270 = vmatpush1.bf16.msra.mxu0 %v3577_v3  ;;  %1311 = vmatpush1.bf16.msra.mxu1 %v3578_v41 }
 0x636   :  { %1271 = vmatprep.subr.bf16.mxu0 %v3579_v1  ;;  %1312 = vmatprep.subr.bf16.mxu1 %v3580_v6 }
 0x637   :  { %1301 = vmatprep.mubr.bf16.mxu0 %v5134_v56  ;;  %1342 = vmatprep.mubr.bf16.mxu1 %v5134_v56 }
 0x639   :  { %1272 = vmatpush1.bf16.msra.mxu0 %v3581_v7  ;;  %1313 = vmatpush1.bf16.msra.mxu1 %v3582_v11 }
 0x63a   :  { %1273 = vmatprep.subr.bf16.mxu0 %v3583_v2  ;;  %1314 = vmatprep.subr.bf16.mxu1 %v3584_v4 }
 0x63d   :  { %1274 = vmatpush1.bf16.msra.mxu0 %v3585_v18  ;;  %1315 = vmatpush1.bf16.msra.mxu1 %v3586_v57 }
 0x63e   :  { %1275 = vmatprep.subr.bf16.mxu0 %v3587_v61  ;;  %1316 = vmatprep.subr.bf16.mxu1 %v3588_v60 }
 0x641   :  { %1276 = vmatpush1.bf16.msra.mxu0 %v3589_v55  ;;  %1317 = vmatpush1.bf16.msra.mxu1 %v3590_v22 }
 0x642   :  { %1277 = vmatprep.subr.bf16.mxu0 %v3591_v14  ;;  %1318 = vmatprep.subr.bf16.mxu1 %v3592_v15  ;;  %v3225_v15 = vld [vmem:[%s5097_s4] ss:$16 sps:$4 sm:$0xff]  }
 0x645   :  { %1278 = vmatpush1.bf16.msra.mxu0 %v3593_v16  ;;  %1319 = vmatpush1.bf16.msra.mxu1 %v3594_v17  ;;  %v3228_v16 = vld [vmem:[%s5097_s4 + $0x8] ss:$16 sps:$4 sm:$0xff]   ;;  %v3233_v17 = vld [vmem:[%s5097_s4 + $0x24] ss:$16 sps:$4 sm:$0xff]  }
 0x646   :  { %1279 = vmatprep.subr.bf16.mxu0 %v3595_v19  ;;  %1320 = vmatprep.subr.bf16.mxu1 %v3596_v21  ;;  %v3236_v19 = vld [vmem:[%s5097_s4 + $0x2c] ss:$16 sps:$4 sm:$0xff]   ;;  %v3231_v21 = vld [vmem:[%s5097_s4 + $0x20] ss:$16 sps:$4 sm:$0xff]  }
 0x649   :  { %1280 = vmatpush1.bf16.msra.mxu0 %v3597_v23  ;;  %1321 = vmatpush1.bf16.msra.mxu1 %v3598_v24  ;;  %v3234_v23 = vld [vmem:[%s5097_s4 + $0x28] ss:$16 sps:$4 sm:$0xff]   ;;  %v3239_v24 = vld [vmem:[%s5097_s4 + $0x44] ss:$16 sps:$4 sm:$0xff]  }
 0x64a   :  { %1281 = vmatprep.subr.bf16.mxu0 %v3599_v25  ;;  %1322 = vmatprep.subr.bf16.mxu1 %v3600_v26  ;;  %v3242_v25 = vld [vmem:[%s5097_s4 + $0x4c] ss:$16 sps:$4 sm:$0xff]   ;;  %v3237_v26 = vld [vmem:[%s5097_s4 + $0x40] ss:$16 sps:$4 sm:$0xff]  }
 0x64d   :  { %1282 = vmatpush1.bf16.msra.mxu0 %v3601_v27  ;;  %1323 = vmatpush1.bf16.msra.mxu1 %v3602_v28  ;;  %v3240_v27 = vld [vmem:[%s5097_s4 + $0x48] ss:$16 sps:$4 sm:$0xff]   ;;  %v3245_v28 = vld [vmem:[%s5097_s4 + $0x64] ss:$16 sps:$4 sm:$0xff]  }
 0x64e   :  { %1283 = vmatprep.subr.bf16.mxu0 %v3603_v30  ;;  %1324 = vmatprep.subr.bf16.mxu1 %v3604_v12  ;;  %v3248_v30 = vld [vmem:[%s5097_s4 + $0x6c] ss:$16 sps:$4 sm:$0xff]   ;;  %v3243_v12 = vld [vmem:[%s5097_s4 + $0x60] ss:$16 sps:$4 sm:$0xff]  }
 0x651   :  { %1284 = vmatpush1.bf16.msra.mxu0 %v3974_v51  ;;  %1325 = vmatpush1.bf16.msra.mxu1 %v3979_v52  ;;  %v5148_v51 = vld [vmem:[#allocation21_spill] sm:$0xff]  ;;  %v5149_v52 = vld [vmem:[#allocation24_spill] sm:$0xff] }
 0x652   :  { %1639 = vmatprep.subr.bf16.mxu0 %v3227_v32  ;;  %1712 = vmatprep.subr.bf16.mxu1 %v3230_v13  ;;  %v241_v38 = vadd.f32 %v5148_v51, %v4000_v59  ;;  %v314_v39 = vadd.f32 %v5149_v52, %v4021_v20  ;;  %v3246_v32 = vld [vmem:[%s5097_s4 + $0x68] ss:$16 sps:$4 sm:$0xff]   ;;  %v3251_v13 = vld [vmem:[%s5097_s4 + $0x84] ss:$16 sps:$4 sm:$0xff]   ;;  %v3260_v51 = vld [vmem:[%s5097_s4 + $0xac] ss:$16 sps:$4 sm:$0xff]  }
 0x653   :  { %v3258_v52 = vld [vmem:[%s5097_s4 + $0xa8] ss:$16 sps:$4 sm:$0xff]  }
 0x707   :  { %v1183_v40 = vpop.f32.mrb[36].mxu0  ;;  %v1224_v43 = vpop.f32.mrb[36].mxu1 }
 0x708   :  { %v1231_v45 = vadd.f32 %v1183_v40, %v239_v35  ;;  %v1233_v46 = vadd.f32 %v1224_v43, %v312_v37  ;;  %v1185_v47 = vpop.f32.mrb[37].mxu0  ;;  %v1226_v48 = vpop.f32.mrb[37].mxu1  ;;  %v3249_v35 = vld [vmem:[%s5097_s4 + $0x80] ss:$16 sps:$4 sm:$0xff]   ;;  %v3257_v37 = vld [vmem:[%s5097_s4 + $0xa4] ss:$16 sps:$4 sm:$0xff]  }
 0x709   :  { %v1232_v49 = vadd.f32 %v1185_v47, %v241_v38  ;;  %v1234_v50 = vadd.f32 %v1226_v48, %v314_v39  ;;  %v1187_v53 = vpop.f32.mrb[38].mxu0  ;;  %v1228_v9 = vpop.f32.mrb[38].mxu1  ;;  %v3255_v38 = vld [vmem:[%s5097_s4 + $0xa0] ss:$16 sps:$4 sm:$0xff]   ;;  %v3263_v39 = vld [vmem:[%s5097_s4 + $0xc4] ss:$16 sps:$4 sm:$0xff]  }
 0x70a   :  { %v2999_v62 = vmul.f32 -1.442695, %v1231_v45  ;;  %v1188_v29 = vpop.f32.mrb[39].mxu0  ;;  %v1229_v54 = vpop.f32.mrb[39].mxu1  ;;  %v3001_v10 = vmul.f32 -1.442695, %v1233_v46  ;;  %v1455_v9 = vpack.c.bf16 %v4225_v44, %v4175_v0 }
 0x70b   :  { %v3000_v33 = vmul.f32 -1.442695, %v1232_v49  ;;  %v3266_v40 = vld [vmem:[%s5097_s4 + $0xcc] ss:$16 sps:$4 sm:$0xff]   ;;  %v3261_v43 = vld [vmem:[%s5097_s4 + $0xc0] ss:$16 sps:$4 sm:$0xff]  }
 0x70c   :  { %3417 = vpow2.f32 %v2999_v62  ;;  %v3264_v45 = vld [vmem:[%s5097_s4 + $0xc8] ss:$16 sps:$4 sm:$0xff]   ;;  %v3269_v46 = vld [vmem:[%s5097_s4 + $0xe4] ss:$16 sps:$4 sm:$0xff]   ;;  %v3272_v47 = vld [vmem:[%s5097_s4 + $0xec] ss:$16 sps:$4 sm:$0xff]   ;;  %v1456_v62 = vpack.c.bf16 %v4325_v42, %v4275_v8 }
 0x70d   :  { %3419 = vpow2.f32 %v3000_v33  ;;  %v3267_v48 = vld [vmem:[%s5097_s4 + $0xe0] ss:$16 sps:$4 sm:$0xff]   ;;  %v3270_v49 = vld [vmem:[%s5097_s4 + $0xe8] ss:$16 sps:$4 sm:$0xff]   ;;  %v4545_v29 = vld [vmem:[#allocation4 + $0xc] ss:$16 sps:$4 sm:$0xff]  }
 0x70e   :  { %3421 = vtanh.f32 %v1234_v50  ;;  %v5150_v50 = vld [vmem:[#allocation8_spill] sm:$0xff]  ;;  %v4547_v0 = vld [vmem:[#allocation4] ss:$16 sps:$4 sm:$0xff]   ;;  %v4555_v8 = vld [vmem:[#allocation4 + $0x24] ss:$16 sps:$4 sm:$0xff]  }
 0x70f   :  { %3423 = vpow2.f32 %v3001_v10  ;;  %v1454_v53 = vpack.c.bf16 %v4125_v63, %v5150_v50  ;;  %v4543_v63 = vld [vmem:[#allocation4 + $0x4] ss:$16 sps:$4 sm:$0xff]   ;;  %v4549_v44 = vld [vmem:[#allocation4 + $0x8] ss:$16 sps:$4 sm:$0xff]   ;;  %v4557_v42 = vld [vmem:[#allocation4 + $0x2c] ss:$16 sps:$4 sm:$0xff]  }
 0x710   :  { %v4559_v54 = vld [vmem:[#allocation4 + $0x20] ss:$16 sps:$4 sm:$0xff]   ;;  %v4561_v33 = vld [vmem:[#allocation4 + $0x28] ss:$16 sps:$4 sm:$0xff]   ;;  %v4567_v10 = vld [vmem:[#allocation4 + $0x44] ss:$16 sps:$4 sm:$0xff]  }
 0x716   :  { %v3418_v3 = vpop.eup %3417 }
 0x717   :  { %v1244_v41 = vadd.f32 1.0, %v3418_v3  ;;  %v3420_v1 = vpop.eup %3419  ;;  %v4569_v3 = vld [vmem:[#allocation4 + $0x4c] ss:$16 sps:$4 sm:$0xff]  }
 0x718   :  { %v1245_v6 = vadd.f32 1.0, %v3420_v1  ;;  %v3422_v7 = vpop.eup %3421  ;;  %v4573_v1 = vld [vmem:[#allocation4 + $0x48] ss:$16 sps:$4 sm:$0xff]  }
 0x719   :  { %3425 = vrcp.f32 %v1244_v41  ;;  %v3424_v11 = vpop.eup %3423  ;;  %v4571_v41 = vld [vmem:[#allocation4 + $0x40] ss:$16 sps:$4 sm:$0xff]  }
 0x71a   :  { %3427 = vrcp.f32 %v1245_v6  ;;  %v1246_v57 = vadd.f32 1.0, %v3424_v11  ;;  %v4579_v6 = vld [vmem:[#allocation4 + $0x64] ss:$16 sps:$4 sm:$0xff]   ;;  %v4583_v11 = vld [vmem:[#allocation4 + $0x60] ss:$16 sps:$4 sm:$0xff]  }
 0x71c   :  { %3429 = vrcp.f32 %v1246_v57  ;;  %v4595_v57 = vld [vmem:[#allocation4 + $0x80] ss:$16 sps:$4 sm:$0xff]  }
 0x723   :  { %v3426_v2 = vpop.eup %3425 }
 0x724   :  { %v1255_v4 = vmul.f32 %v3426_v2, %v3422_v7  ;;  %v3428_v18 = vpop.eup %3427  ;;  %v4581_v7 = vld [vmem:[#allocation4 + $0x6c] ss:$16 sps:$4 sm:$0xff]   ;;  %v4585_v2 = vld [vmem:[#allocation4 + $0x68] ss:$16 sps:$4 sm:$0xff]  }
 0x725   :  { %v1254_v61 = vmul.f32 %v3428_v18, %v4322_v31  ;;  %v4593_v18 = vld [vmem:[#allocation4 + $0x8c] ss:$16 sps:$4 sm:$0xff]  }
 0x726   :  { %v3430_v55 = vpop.eup %3429 }
 0x727   :  { %v4432_v60 = vadd.f32 %v1255_v4, %v1254_v61  ;;  %v4591_v4 = vld [vmem:[#allocation4 + $0x84] ss:$16 sps:$4 sm:$0xff]   ;;  %v4597_v61 = vld [vmem:[#allocation4 + $0x88] ss:$16 sps:$4 sm:$0xff]  }
 0x729   :  { %3431 = vtanh.f32 %v4432_v60 }
 0x733   :  { %v3432_v22 = vpop.eup %3431 }
 0x734   :  { %v4435_v14 = vmul.f32 %v3432_v22, %v3430_v55  ;;  %v4603_v55 = vld [vmem:[#allocation4 + $0xa4] ss:$16 sps:$4 sm:$0xff]   ;;  %v4605_v22 = vld [vmem:[#allocation4 + $0xa0] ss:$16 sps:$4 sm:$0xff]  }
 0x736   :  { %v1268_v31 = vpack.c.bf16 %v4435_v14, %v4435_v14 }
 0x738   :  { %1302 = vmatmul.mubr.bf16.vlgmr.msra.gmra.mrb[40].mxu0 %v1268_v31  ;;  %1343 = vmatmul.mubr.bf16.vlgmr.msra.gmra.mrb[40].mxu1 %v1268_v31  ;;  %v4611_v31 = vld [vmem:[#allocation4 + $0xc4] ss:$16 sps:$4 sm:$0xff]  }
 0x739   :  { %1640 = vmatpush1.bf16.msra.mxu0 %v3225_v15  ;;  %1713 = vmatpush1.bf16.msra.mxu1 %v3228_v16  ;;  %v4607_v15 = vld [vmem:[#allocation4 + $0xac] ss:$16 sps:$4 sm:$0xff]   ;;  %v4609_v16 = vld [vmem:[#allocation4 + $0xa8] ss:$16 sps:$4 sm:$0xff]  }
 0x73a   :  { %1641 = vmatprep.subr.bf16.mxu0 %v3233_v17  ;;  %1714 = vmatprep.subr.bf16.mxu1 %v3236_v19  ;;  %v4615_v17 = vld [vmem:[#allocation4 + $0xcc] ss:$16 sps:$4 sm:$0xff]   ;;  %v4619_v19 = vld [vmem:[#allocation4 + $0xc0] ss:$16 sps:$4 sm:$0xff]  }
 0x73b   :  { %1671 = vmatprep.mubr.bf16.mxu0 %v5134_v56  ;;  %1744 = vmatprep.mubr.bf16.mxu1 %v5134_v56 }
 0x73d   :  { %1642 = vmatpush1.bf16.msra.mxu0 %v3231_v21  ;;  %1715 = vmatpush1.bf16.msra.mxu1 %v3234_v23  ;;  %v4621_v21 = vld [vmem:[#allocation4 + $0xc8] ss:$16 sps:$4 sm:$0xff]   ;;  %v4625_v23 = vld [vmem:[#allocation4 + $0xe4] ss:$16 sps:$4 sm:$0xff]  }
 0x73e   :  { %1643 = vmatprep.subr.bf16.mxu0 %v3239_v24  ;;  %1716 = vmatprep.subr.bf16.mxu1 %v3242_v25  ;;  %v4627_v24 = vld [vmem:[#allocation4 + $0xec] ss:$16 sps:$4 sm:$0xff]   ;;  %v4631_v25 = vld [vmem:[#allocation4 + $0xe0] ss:$16 sps:$4 sm:$0xff]  }
 0x741   :  { %1644 = vmatpush1.bf16.msra.mxu0 %v3237_v26  ;;  %1717 = vmatpush1.bf16.msra.mxu1 %v3240_v27  ;;  %v4633_v26 = vld [vmem:[#allocation4 + $0xe8] ss:$16 sps:$4 sm:$0xff]   ;;  %v5151_v27 = vld [vmem:[#allocation23_spill] sm:$0xff] }
 0x742   :  { %1645 = vmatprep.subr.bf16.mxu0 %v3245_v28  ;;  %1718 = vmatprep.subr.bf16.mxu1 %v3248_v30  ;;  %v243_v28 = vadd.f32 %v5151_v27, %v3996_v58  ;;  %v5152_v30 = vld [vmem:[#allocation26_spill] sm:$0xff] }
 0x745   :  { %1646 = vmatpush1.bf16.msra.mxu0 %v3243_v12  ;;  %1719 = vmatpush1.bf16.msra.mxu1 %v3246_v32  ;;  %v316_v12 = vadd.f32 %v5152_v30, %v4011_v5  ;;  %v5153_v32 = vld [vmem:[#allocation25_spill] sm:$0xff] }
 0x746   :  { %1647 = vmatprep.subr.bf16.mxu0 %v3251_v13  ;;  %1720 = vmatprep.subr.bf16.mxu1 %v3254_v34  ;;  %v245_v13 = vadd.f32 %v5153_v32, %v4000_v59  ;;  %v5154_v34 = vld [vmem:[#allocation27_spill] sm:$0xff] }
 0x749   :  { %1648 = vmatpush1.bf16.msra.mxu0 %v3249_v35  ;;  %1721 = vmatpush1.bf16.msra.mxu1 %v3252_v36  ;;  %v318_v35 = vadd.f32 %v5154_v34, %v4021_v20 }
 0x74a   :  { %1649 = vmatprep.subr.bf16.mxu0 %v3257_v37  ;;  %1722 = vmatprep.subr.bf16.mxu1 %v3260_v51 }
 0x74d   :  { %1650 = vmatpush1.bf16.msra.mxu0 %v3255_v38  ;;  %1723 = vmatpush1.bf16.msra.mxu1 %v3258_v52 }
 0x74e   :  { %1651 = vmatprep.subr.bf16.mxu0 %v3263_v39  ;;  %1724 = vmatprep.subr.bf16.mxu1 %v3266_v40 }
 0x751   :  { %1652 = vmatpush1.bf16.msra.mxu0 %v3261_v43  ;;  %1725 = vmatpush1.bf16.msra.mxu1 %v3264_v45 }
 0x752   :  { %1653 = vmatprep.subr.bf16.mxu0 %v3269_v46  ;;  %1726 = vmatprep.subr.bf16.mxu1 %v3272_v47 }
 0x755   :  { %1654 = vmatpush1.bf16.msra.mxu0 %v3267_v48  ;;  %1727 = vmatpush1.bf16.msra.mxu1 %v3270_v49 }
 0x756   :  { %2010 = vmatprep.subr.bf16.mxu0 %v4543_v63  ;;  %2051 = vmatprep.subr.bf16.mxu1 %v4545_v29 }
 0x758   :  { %1672 = vmatmul.mubr.bf16.vlgmr.msra.gmra.mrb[44].mxu0 %v1454_v53  ;;  %1745 = vmatmul.mubr.bf16.vlgmr.msra.gmra.mrb[44].mxu1 %v1454_v53 }
 0x759   :  { %1681 = vmatprep.mubr.bf16.mxu0 %v5134_v56  ;;  %1754 = vmatprep.mubr.bf16.mxu1 %v5134_v56 }
 0x75a   :  { %2011 = vmatpush1.bf16.msra.mxu0 %v4547_v0  ;;  %2052 = vmatpush1.bf16.msra.mxu1 %v4549_v44 }
 0x75b   :  { %2012 = vmatprep.subr.bf16.mxu0 %v4555_v8  ;;  %2053 = vmatprep.subr.bf16.mxu1 %v4557_v42 }
 0x75e   :  { %2013 = vmatpush1.bf16.msra.mxu0 %v4559_v54  ;;  %2054 = vmatpush1.bf16.msra.mxu1 %v4561_v33 }
 0x75f   :  { %2014 = vmatprep.subr.bf16.mxu0 %v4567_v10  ;;  %2055 = vmatprep.subr.bf16.mxu1 %v4569_v3 }
 0x760   :  { %1682 = vmatmul.mubr.bf16.gmra.mrb[48].mxu0 %v1455_v9  ;;  %1755 = vmatmul.mubr.bf16.gmra.mrb[48].mxu1 %v1455_v9 }
 0x761   :  { %1691 = vmatprep.mubr.bf16.mxu0 %v5134_v56  ;;  %1764 = vmatprep.mubr.bf16.mxu1 %v5134_v56 }
 0x762   :  { %2015 = vmatpush1.bf16.msra.mxu0 %v4571_v41  ;;  %2056 = vmatpush1.bf16.msra.mxu1 %v4573_v1 }
 0x763   :  { %2016 = vmatprep.subr.bf16.mxu0 %v4579_v6  ;;  %2057 = vmatprep.subr.bf16.mxu1 %v4581_v7 }
 0x766   :  { %2017 = vmatpush1.bf16.msra.mxu0 %v4583_v11  ;;  %2058 = vmatpush1.bf16.msra.mxu1 %v4585_v2 }
 0x767   :  { %2018 = vmatprep.subr.bf16.mxu0 %v4591_v4  ;;  %2059 = vmatprep.subr.bf16.mxu1 %v4593_v18 }
 0x768   :  { %1692 = vmatmul.mubr.bf16.gmra.mrb[52].mxu0 %v1456_v62  ;;  %1765 = vmatmul.mubr.bf16.gmra.mrb[52].mxu1 %v1456_v62  ;;  %v1445_v62 = vld [vmem:[%s5099_s6] sm:$0xf] }
 0x769   :  { %1701 = vmatprep.mubr.bf16.mxu0 %v5134_v56  ;;  %1774 = vmatprep.mubr.bf16.mxu1 %v5134_v56 }
 0x76a   :  { %2019 = vmatpush1.bf16.msra.mxu0 %v4595_v57  ;;  %2060 = vmatpush1.bf16.msra.mxu1 %v4597_v61 }
 0x76b   :  { %2020 = vmatprep.subr.bf16.mxu0 %v4603_v55  ;;  %2061 = vmatprep.subr.bf16.mxu1 %v4607_v15 }
 0x76e   :  { %2021 = vmatpush1.bf16.msra.mxu0 %v4605_v22  ;;  %2062 = vmatpush1.bf16.msra.mxu1 %v4609_v16 }
 0x76f   :  { %2022 = vmatprep.subr.bf16.mxu0 %v4611_v31  ;;  %2063 = vmatprep.subr.bf16.mxu1 %v4615_v17 }
 0x772   :  { %2023 = vmatpush1.bf16.msra.mxu0 %v4619_v19  ;;  %2064 = vmatpush1.bf16.msra.mxu1 %v4621_v21 }
 0x773   :  { %2024 = vmatprep.subr.bf16.mxu0 %v4625_v23  ;;  %2065 = vmatprep.subr.bf16.mxu1 %v4627_v24 }
 0x776   :  { %2025 = vmatpush1.bf16.msra.mxu0 %v4631_v25  ;;  %2066 = vmatpush1.bf16.msra.mxu1 %v4633_v26 }
 0x777   :  { %2125 = vmatprep.subr.bf16.mxu0 %v4543_v63  ;;  %2166 = vmatprep.subr.bf16.mxu1 %v4545_v29 }
 0x80b   :  { %v1303_v36 = vpop.f32.mrb[40].mxu0  ;;  %v1344_v37 = vpop.f32.mrb[40].mxu1 }
 0x80c   :  { %v1351_v51 = vadd.f32 %v1303_v36, %v243_v28  ;;  %v1353_v38 = vadd.f32 %v1344_v37, %v316_v12  ;;  %v1305_v52 = vpop.f32.mrb[41].mxu0  ;;  %v1346_v39 = vpop.f32.mrb[41].mxu1  ;;  %v5155_v12 = vld [vmem:[#allocation7_spill] sm:$0xff] }
 0x80d   :  { %v1352_v40 = vadd.f32 %v1305_v52, %v245_v13  ;;  %v1354_v43 = vadd.f32 %v1346_v39, %v318_v35  ;;  %v1307_v45 = vpop.f32.mrb[42].mxu0  ;;  %v1348_v46 = vpop.f32.mrb[42].mxu1  ;;  %v5156_v32 = vsub.s32 0, %v5155_v12  ;;  %v5157_v36 = vsub.s32 1, %v5155_v12 }
 0x80e   :  { %v3002_v58 = vmul.f32 -1.442695, %v1351_v51  ;;  %v1308_v47 = vpop.f32.mrb[43].mxu0  ;;  %v1349_v48 = vpop.f32.mrb[43].mxu1  ;;  %v3004_v59 = vmul.f32 -1.442695, %v1353_v38 }
 0x80f   :  { %v3003_v5 = vmul.f32 -1.442695, %v1352_v40  ;;  %v4654_v13 = vrot.slane %v1445_v62, %v5156_v32  ;;  %v4658_v37 = vrot.slane %v1445_v62, %v5157_v36 }
 0x810   :  { %3433 = vpow2.f32 %v3002_v58 }
 0x811   :  { %3435 = vpow2.f32 %v3003_v5 }
 0x812   :  { %3437 = vtanh.f32 %v1354_v43 }
 0x813   :  { %3439 = vpow2.f32 %v3004_v59 }
 0x81a   :  { %v3434_v49 = vpop.eup %3433 }
 0x81b   :  { %v1364_v50 = vadd.f32 1.0, %v3434_v49  ;;  %v3436_v20 = vpop.eup %3435  ;;  %v5158_v49 = vsub.s32 2, %v5155_v12 }
 0x81c   :  { %v1365_v53 = vadd.f32 1.0, %v3436_v20  ;;  %v3438_v9 = vpop.eup %3437  ;;  %v5159_v20 = vsub.s32 3, %v5155_v12 }
 0x81d   :  { %3441 = vrcp.f32 %v1364_v50  ;;  %v3440_v27 = vpop.eup %3439  ;;  %v4673_v50 = vrot.slane %v1445_v62, %v5158_v49 }
 0x81e   :  { %3443 = vrcp.f32 %v1365_v53  ;;  %v1366_v35 = vadd.f32 1.0, %v3440_v27  ;;  %v4677_v53 = vrot.slane %v1445_v62, %v5159_v20 }
 0x820   :  { %3445 = vrcp.f32 %v1366_v35 }
 0x827   :  { %v3442_v28 = vpop.eup %3441 }
 0x828   :  { %v1375_v30 = vmul.f32 %v3442_v28, %v3438_v9  ;;  %v3444_v34 = vpop.eup %3443 }
 0x829   :  { %v1374_v51 = vmul.f32 %v3444_v34, %v4432_v60 }
 0x82a   :  { %v3446_v62 = vpop.eup %3445 }
 0x82b   :  { %v1673_v38 = vpop.f32.mrb[44].mxu0  ;;  %v1746_v52 = vpop.f32.mrb[44].mxu1  ;;  %v1376_v39 = vadd.f32 %v1375_v30, %v1374_v51 }
 0x82c   :  { %v1674_v40 = vadd.f32 %v1673_v38, %v4654_v13  ;;  %v1675_v43 = vpop.f32.mrb[45].mxu0  ;;  %v1748_v45 = vpop.f32.mrb[45].mxu1  ;;  %v1747_v28 = vadd.f32 %v1746_v52, %v4673_v50 }
 0x82d   :  { %v1676_v46 = vadd.f32 %v1675_v43, %v4658_v37  ;;  %v4663_v58 = vpop.f32.mrb[46].mxu0  ;;  %v4665_v47 = vpop.f32.mrb[46].mxu1  ;;  %3447 = vtanh.f32 %v1376_v39  ;;  %v1749_v12 = vadd.f32 %v1748_v45, %v4677_v53 }
 0x82e   :  { %v3037_v48 = vmul.f32 -1.442695, %v1674_v40  ;;  %v4667_v5 = vpop.f32.mrb[47].mxu0  ;;  %v4669_v59 = vpop.f32.mrb[47].mxu1  ;;  %v3039_v39 = vmul.f32 -1.442695, %v1747_v28 }
 0x82f   :  { %v3038_v60 = vmul.f32 -1.442695, %v1676_v46 }
 0x830   :  { %3449 = vpow2.f32 %v3037_v48 }
 0x831   :  { %3451 = vpow2.f32 %v3038_v60 }
 0x832   :  { %3453 = vtanh.f32 %v1749_v12 }
 0x833   :  { %v4679_v9 = vpop.f32.mrb[48].mxu0  ;;  %v4681_v27 = vpop.f32.mrb[48].mxu1  ;;  %3455 = vpow2.f32 %v3039_v39 }
 0x834   :  { %v4684_v30 = vpop.f32.mrb[49].mxu0  ;;  %v4686_v32 = vpop.f32.mrb[49].mxu1 }
 0x835   :  { %v4688_v34 = vpop.f32.mrb[50].mxu0  ;;  %v4690_v35 = vpop.f32.mrb[50].mxu1 }
 0x836   :  { %5160 = vst [vmem:[#allocation9_spill] sm:$0xff] %v4688_v34  ;;  %5161 = vst [vmem:[#allocation10_spill] sm:$0xff] %v4690_v35  ;;  %v4692_v36 = vpop.f32.mrb[51].mxu0  ;;  %v4694_v51 = vpop.f32.mrb[51].mxu1 }
 0x837   :  { %5162 = vst [vmem:[#allocation11_spill] sm:$0xff] %v4692_v36  ;;  %5163 = vst [vmem:[#allocation12_spill] sm:$0xff] %v4694_v51  ;;  %v3448_v38 = vpop.eup %3447 }
 0x838   :  { %v1378_v40 = vmul.f32 %v3448_v38, %v3446_v62 }
 0x83a   :  { %v3450_v43 = vpop.eup %3449  ;;  %v1457_v60 = vpack.c.bf16 %v1378_v40, %v4435_v14 }
 0x83b   :  { %v1830_v52 = vadd.f32 1.0, %v3450_v43  ;;  %v4697_v46 = vpop.f32.mrb[52].mxu0  ;;  %v4699_v48 = vpop.f32.mrb[52].mxu1 }
 0x83c   :  { %5164 = vst [vmem:[#allocation13_spill] sm:$0xff] %v4697_v46  ;;  %5165 = vst [vmem:[#allocation14_spill] sm:$0xff] %v4699_v48  ;;  %v3452_v49 = vpop.eup %3451  ;;  %v4702_v20 = vpop.f32.mrb[53].mxu0  ;;  %1702 = vmatmul.mubr.bf16.gmra.mrb[56].mxu0 %v1457_v60  ;;  %1775 = vmatmul.mubr.bf16.gmra.mrb[56].mxu1 %v1457_v60 }
 0x83d   :  { %5166 = vst [vmem:[#allocation15_spill] sm:$0xff] %v4702_v20  ;;  %v4704_v51 = vpop.f32.mrb[53].mxu1  ;;  %3457 = vrcp.f32 %v1830_v52  ;;  %v1831_v45 = vadd.f32 1.0, %v3452_v49  ;;  %v4706_v36 = vpop.f32.mrb[54].mxu0  ;;  %2042 = vmatprep.mubr.bf16.mxu0 %v5134_v56  ;;  %2083 = vmatprep.mubr.bf16.mxu1 %v5134_v56 }
 0x83e   :  { %5167 = vst [vmem:[#allocation16_spill] sm:$0xff] %v4704_v51  ;;  %5168 = vst [vmem:[#allocation17_spill] sm:$0xff] %v4706_v36  ;;  %v4708_v28 = vpop.f32.mrb[54].mxu1  ;;  %v4710_v62 = vpop.f32.mrb[55].mxu0 }
 0x83f   :  { %5169 = vst [vmem:[#allocation18_spill] sm:$0xff] %v4708_v28  ;;  %5170 = vst [vmem:[#allocation19_spill] sm:$0xff] %v4710_v62  ;;  %v4712_v12 = vpop.f32.mrb[55].mxu1  ;;  %3459 = vrcp.f32 %v1831_v45  ;;  %v3454_v14 = vpop.eup %3453 }
 0x840   :  { %5171 = vst [vmem:[#allocation20_spill] sm:$0xff] %v4712_v12  ;;  %v3456_v38 = vpop.eup %3455 }
 0x841   :  { %v1832_v52 = vadd.f32 1.0, %v3456_v38 }
 0x843   :  { %3461 = vrcp.f32 %v1832_v52  ;;  %v1678_v52 = vadd.f32 %v4663_v58, %v4654_v13 }
 0x847   :  { %v3458_v39 = vpop.eup %3457 }
 0x848   :  { %v1841_v40 = vmul.f32 %v3458_v39, %v3454_v14 }
 0x849   :  { %v3460_v43 = vpop.eup %3459 }
 0x84a   :  { %v1840_v49 = vmul.f32 0.0, %v3460_v43 }
 0x84c   :  { %v4716_v36 = vadd.f32 %v1841_v40, %v1840_v49  ;;  %v1751_v49 = vadd.f32 %v4665_v47, %v4673_v50 }
 0x84d   :  { %v3462_v60 = vpop.eup %3461 }
 0x84e   :  { %3463 = vtanh.f32 %v4716_v36 }
 0x858   :  { %v3464_v62 = vpop.eup %3463 }
 0x859   :  { %v4719_v12 = vmul.f32 %v3464_v62, %v3462_v60  ;;  %v1680_v60 = vadd.f32 %v4667_v5, %v4658_v37 }
 0x85b   :  { %5172 = vst [vmem:[#allocation22_spill] sm:$0xff] %v4719_v12  ;;  %v1849_v28 = vpack.c.bf16 %v4719_v12, %v4719_v12  ;;  %v1753_v12 = vadd.f32 %v4669_v59, %v4677_v53 }
 0x85d   :  { %2043 = vmatmul.mubr.bf16.vlgmr.msra.gmra.mrb[60].mxu0 %v1849_v28  ;;  %2084 = vmatmul.mubr.bf16.vlgmr.msra.gmra.mrb[60].mxu1 %v1849_v28 }
 0x85e   :  { %2126 = vmatpush1.bf16.msra.mxu0 %v4547_v0  ;;  %2167 = vmatpush1.bf16.msra.mxu1 %v4549_v44 }
 0x85f   :  { %2127 = vmatprep.subr.bf16.mxu0 %v4555_v8  ;;  %2168 = vmatprep.subr.bf16.mxu1 %v4557_v42 }
 0x860   :  { %2157 = vmatprep.mubr.bf16.mxu0 %v5134_v56  ;;  %2198 = vmatprep.mubr.bf16.mxu1 %v5134_v56 }
 0x862   :  { %2128 = vmatpush1.bf16.msra.mxu0 %v4559_v54  ;;  %2169 = vmatpush1.bf16.msra.mxu1 %v4561_v33 }
 0x863   :  { %2129 = vmatprep.subr.bf16.mxu0 %v4567_v10  ;;  %2170 = vmatprep.subr.bf16.mxu1 %v4569_v3 }
 0x866   :  { %2130 = vmatpush1.bf16.msra.mxu0 %v4571_v41  ;;  %2171 = vmatpush1.bf16.msra.mxu1 %v4573_v1 }
 0x867   :  { %2131 = vmatprep.subr.bf16.mxu0 %v4579_v6  ;;  %2172 = vmatprep.subr.bf16.mxu1 %v4581_v7 }
 0x86a   :  { %2132 = vmatpush1.bf16.msra.mxu0 %v4583_v11  ;;  %2173 = vmatpush1.bf16.msra.mxu1 %v4585_v2 }
 0x86b   :  { %2133 = vmatprep.subr.bf16.mxu0 %v4591_v4  ;;  %2174 = vmatprep.subr.bf16.mxu1 %v4593_v18 }
 0x86e   :  { %2134 = vmatpush1.bf16.msra.mxu0 %v4595_v57  ;;  %2175 = vmatpush1.bf16.msra.mxu1 %v4597_v61 }
 0x86f   :  { %2135 = vmatprep.subr.bf16.mxu0 %v4603_v55  ;;  %2176 = vmatprep.subr.bf16.mxu1 %v4607_v15 }
 0x872   :  { %2136 = vmatpush1.bf16.msra.mxu0 %v4605_v22  ;;  %2177 = vmatpush1.bf16.msra.mxu1 %v4609_v16 }
 0x873   :  { %2137 = vmatprep.subr.bf16.mxu0 %v4611_v31  ;;  %2178 = vmatprep.subr.bf16.mxu1 %v4615_v17 }
 0x876   :  { %2138 = vmatpush1.bf16.msra.mxu0 %v4619_v19  ;;  %2179 = vmatpush1.bf16.msra.mxu1 %v4621_v21 }
 0x877   :  { %2139 = vmatprep.subr.bf16.mxu0 %v4625_v23  ;;  %2180 = vmatprep.subr.bf16.mxu1 %v4627_v24 }
 0x87a   :  { %2140 = vmatpush1.bf16.msra.mxu0 %v4631_v25  ;;  %2181 = vmatpush1.bf16.msra.mxu1 %v4633_v26 }
 0x87b   :  { %2240 = vmatprep.subr.bf16.mxu0 %v4543_v63  ;;  %2281 = vmatprep.subr.bf16.mxu1 %v4545_v29 }
 0x90f   :  { %v4757_v45 = vpop.f32.mrb[56].mxu0  ;;  %v4759_v28 = vpop.f32.mrb[56].mxu1 }
 0x910   :  { %5173 = vst [vmem:[#allocation21_spill] sm:$0xff] %v4757_v45  ;;  %5174 = vst [vmem:[#allocation24_spill] sm:$0xff] %v4759_v28  ;;  %v4761_v62 = vpop.f32.mrb[57].mxu0  ;;  %v4763_v14 = vpop.f32.mrb[57].mxu1 }
 0x911   :  { %5175 = vst [vmem:[#allocation8_spill] sm:$0xff] %v4761_v62  ;;  %5176 = vst [vmem:[#allocation23_spill] sm:$0xff] %v4763_v14  ;;  %v4765_v38 = vpop.f32.mrb[58].mxu0  ;;  %v4767_v39 = vpop.f32.mrb[58].mxu1 }
 0x912   :  { %5177 = vst [vmem:[#allocation26_spill] sm:$0xff] %v4765_v38  ;;  %5178 = vst [vmem:[#allocation25_spill] sm:$0xff] %v4767_v39  ;;  %v4769_v40 = vpop.f32.mrb[59].mxu0  ;;  %v4771_v43 = vpop.f32.mrb[59].mxu1 }
 0x913   :  { %5179 = vst [vmem:[#allocation27_spill] sm:$0xff] %v4769_v40  ;;  %5180 = vst [vmem:[#allocation7_spill] sm:$0xff] %v4771_v43 }
 0x930   :  { %v2044_v14 = vpop.f32.mrb[60].mxu0  ;;  %v2085_v38 = vpop.f32.mrb[60].mxu1 }
 0x931   :  { %v2092_v62 = vadd.f32 %v2044_v14, %v1678_v52  ;;  %v2094_v39 = vadd.f32 %v2085_v38, %v1751_v49  ;;  %v2046_v28 = vpop.f32.mrb[61].mxu0  ;;  %v2087_v40 = vpop.f32.mrb[61].mxu1  ;;  %v1759_v52 = vadd.f32 %v4686_v32, %v4677_v53 }
 0x932   :  { %v2093_v45 = vadd.f32 %v2046_v28, %v1680_v60  ;;  %v2095_v43 = vadd.f32 %v2087_v40, %v1753_v12  ;;  %v2048_v51 = vpop.f32.mrb[62].mxu0  ;;  %v2089_v20 = vpop.f32.mrb[62].mxu1 }
 0x933   :  { %v3072_v58 = vmul.f32 -1.442695, %v2092_v62  ;;  %v2049_v48 = vpop.f32.mrb[63].mxu0  ;;  %v2090_v46 = vpop.f32.mrb[63].mxu1  ;;  %v3074_v5 = vmul.f32 -1.442695, %v2094_v39 }
 0x934   :  { %v3073_v47 = vmul.f32 -1.442695, %v2093_v45 }
 0x935   :  { %3465 = vpow2.f32 %v3072_v58 }
 0x936   :  { %3467 = vpow2.f32 %v3073_v47 }
 0x937   :  { %3469 = vtanh.f32 %v2095_v43  ;;  %v1686_v43 = vadd.f32 %v4684_v30, %v4658_v37 }
 0x938   :  { %3471 = vpow2.f32 %v3074_v5 }
 0x93f   :  { %v3466_v35 = vpop.eup %3465 }
 0x940   :  { %v2105_v34 = vadd.f32 1.0, %v3466_v35  ;;  %v3468_v59 = vpop.eup %3467 }
 0x941   :  { %v2106_v14 = vadd.f32 1.0, %v3468_v59  ;;  %v3470_v38 = vpop.eup %3469 }
 0x942   :  { %3473 = vrcp.f32 %v2105_v34  ;;  %v3472_v28 = vpop.eup %3471  ;;  %v1684_v34 = vadd.f32 %v4679_v9, %v4654_v13 }
 0x943   :  { %3475 = vrcp.f32 %v2106_v14  ;;  %v2107_v62 = vadd.f32 1.0, %v3472_v28 }
 0x945   :  { %3477 = vrcp.f32 %v2107_v62 }
 0x94c   :  { %v3474_v12 = vpop.eup %3473 }
 0x94d   :  { %v2116_v51 = vmul.f32 %v3474_v12, %v3470_v38  ;;  %v3476_v20 = vpop.eup %3475 }
 0x94e   :  { %v2115_v46 = vmul.f32 %v3476_v20, %v4716_v36  ;;  %v1757_v36 = vadd.f32 %v4681_v27, %v4673_v50 }
 0x94f   :  { %v3478_v35 = vpop.eup %3477 }
 0x950   :  { %v4782_v48 = vadd.f32 %v2116_v51, %v2115_v46 }
 0x952   :  { %3479 = vtanh.f32 %v4782_v48 }
 0x95c   :  { %v3480_v45 = vpop.eup %3479 }
 0x95d   :  { %v2119_v39 = vmul.f32 %v3480_v45, %v3478_v35 }
 0x95f   :  { %v2124_v40 = vpack.c.bf16 %v2119_v39, %v2119_v39 }
 0x961   :  { %2158 = vmatmul.mubr.bf16.vlgmr.msra.gmra.mrb[64].mxu0 %v2124_v40  ;;  %2199 = vmatmul.mubr.bf16.vlgmr.msra.gmra.mrb[64].mxu1 %v2124_v40 }
 0x962   :  { %2241 = vmatpush1.bf16.msra.mxu0 %v4547_v0  ;;  %2282 = vmatpush1.bf16.msra.mxu1 %v4549_v44 }
 0x963   :  { %2242 = vmatprep.subr.bf16.mxu0 %v4555_v8  ;;  %2283 = vmatprep.subr.bf16.mxu1 %v4557_v42 }
 0x964   :  { %2272 = vmatprep.mubr.bf16.mxu0 %v5134_v56  ;;  %2313 = vmatprep.mubr.bf16.mxu1 %v5134_v56 }
 0x966   :  { %2243 = vmatpush1.bf16.msra.mxu0 %v4559_v54  ;;  %2284 = vmatpush1.bf16.msra.mxu1 %v4561_v33 }
 0x967   :  { %2244 = vmatprep.subr.bf16.mxu0 %v4567_v10  ;;  %2285 = vmatprep.subr.bf16.mxu1 %v4569_v3 }
 0x96a   :  { %2245 = vmatpush1.bf16.msra.mxu0 %v4571_v41  ;;  %2286 = vmatpush1.bf16.msra.mxu1 %v4573_v1 }
 0x96b   :  { %2246 = vmatprep.subr.bf16.mxu0 %v4579_v6  ;;  %2287 = vmatprep.subr.bf16.mxu1 %v4581_v7 }
 0x96e   :  { %2247 = vmatpush1.bf16.msra.mxu0 %v4583_v11  ;;  %2288 = vmatpush1.bf16.msra.mxu1 %v4585_v2 }
 0x96f   :  { %2248 = vmatprep.subr.bf16.mxu0 %v4591_v4  ;;  %2289 = vmatprep.subr.bf16.mxu1 %v4593_v18 }
 0x972   :  { %2249 = vmatpush1.bf16.msra.mxu0 %v4595_v57  ;;  %2290 = vmatpush1.bf16.msra.mxu1 %v4597_v61 }
 0x973   :  { %2250 = vmatprep.subr.bf16.mxu0 %v4603_v55  ;;  %2291 = vmatprep.subr.bf16.mxu1 %v4607_v15 }
 0x976   :  { %2251 = vmatpush1.bf16.msra.mxu0 %v4605_v22  ;;  %2292 = vmatpush1.bf16.msra.mxu1 %v4609_v16 }
 0x977   :  { %2252 = vmatprep.subr.bf16.mxu0 %v4611_v31  ;;  %2293 = vmatprep.subr.bf16.mxu1 %v4615_v17 }
 0x97a   :  { %2253 = vmatpush1.bf16.msra.mxu0 %v4619_v19  ;;  %2294 = vmatpush1.bf16.msra.mxu1 %v4621_v21 }
 0x97b   :  { %2254 = vmatprep.subr.bf16.mxu0 %v4625_v23  ;;  %2295 = vmatprep.subr.bf16.mxu1 %v4627_v24 }
 0x97e   :  { %2255 = vmatpush1.bf16.msra.mxu0 %v4631_v25  ;;  %2296 = vmatpush1.bf16.msra.mxu1 %v4633_v26 }
 0x97f   :  { %2355 = vmatprep.subr.bf16.mxu0 %v4543_v63  ;;  %2396 = vmatprep.subr.bf16.mxu1 %v4545_v29 }
 0xa34   :  { %v2159_v49 = vpop.f32.mrb[64].mxu0  ;;  %v2200_v60 = vpop.f32.mrb[64].mxu1 }
 0xa35   :  { %v2207_v58 = vadd.f32 %v2159_v49, %v1684_v34  ;;  %v2209_v47 = vadd.f32 %v2200_v60, %v1757_v36  ;;  %v2161_v5 = vpop.f32.mrb[65].mxu0  ;;  %v2202_v59 = vpop.f32.mrb[65].mxu1 }
 0xa36   :  { %v2208_v14 = vadd.f32 %v2161_v5, %v1686_v43  ;;  %v2210_v38 = vadd.f32 %v2202_v59, %v1759_v52  ;;  %v2163_v28 = vpop.f32.mrb[66].mxu0  ;;  %v2204_v12 = vpop.f32.mrb[66].mxu1 }
 0xa37   :  { %v3075_v9 = vmul.f32 -1.442695, %v2207_v58  ;;  %v2164_v51 = vpop.f32.mrb[67].mxu0  ;;  %v2205_v20 = vpop.f32.mrb[67].mxu1  ;;  %v3077_v30 = vmul.f32 -1.442695, %v2209_v47 }
 0xa38   :  { %v3076_v27 = vmul.f32 -1.442695, %v2208_v14  ;;  %v5182_v14 = vld [vmem:[#allocation10_spill] sm:$0xff]  ;;  %v5183_v28 = vld [vmem:[#allocation11_spill] sm:$0xff] }
 0xa39   :  { %3481 = vpow2.f32 %v3075_v9  ;;  %v1690_v12 = vadd.f32 %v5183_v28, %v4658_v37  ;;  %v5184_v9 = vld [vmem:[#allocation12_spill] sm:$0xff] }
 0xa3a   :  { %3483 = vpow2.f32 %v3076_v27  ;;  %v1763_v51 = vadd.f32 %v5184_v9, %v4677_v53 }
 0xa3b   :  { %3485 = vtanh.f32 %v2210_v38  ;;  %v1761_v38 = vadd.f32 %v5182_v14, %v4673_v50 }
 0xa3c   :  { %3487 = vpow2.f32 %v3077_v30 }
 0xa43   :  { %v3482_v62 = vpop.eup %3481 }
 0xa44   :  { %v2220_v46 = vadd.f32 1.0, %v3482_v62  ;;  %v3484_v32 = vpop.eup %3483 }
 0xa45   :  { %v2221_v35 = vadd.f32 1.0, %v3484_v32  ;;  %v3486_v45 = vpop.eup %3485 }
 0xa46   :  { %3489 = vrcp.f32 %v2220_v46  ;;  %v3488_v39 = vpop.eup %3487 }
 0xa47   :  { %3491 = vrcp.f32 %v2221_v35  ;;  %v2222_v43 = vadd.f32 1.0, %v3488_v39 }
 0xa49   :  { %3493 = vrcp.f32 %v2222_v43 }
 0xa50   :  { %v3490_v40 = vpop.eup %3489 }
 0xa51   :  { %v2231_v34 = vmul.f32 %v3490_v40, %v3486_v45  ;;  %v3492_v36 = vpop.eup %3491 }
 0xa52   :  { %v2230_v52 = vmul.f32 %v3492_v36, %v4782_v48  ;;  %v5181_v48 = vld [vmem:[#allocation9_spill] sm:$0xff] }
 0xa53   :  { %v3494_v60 = vpop.eup %3493  ;;  %v1688_v59 = vadd.f32 %v5181_v48, %v4654_v13 }
 0xa54   :  { %v4828_v49 = vadd.f32 %v2231_v34, %v2230_v52 }
 0xa56   :  { %3495 = vtanh.f32 %v4828_v49 }
 0xa60   :  { %v3496_v58 = vpop.eup %3495 }
 0xa61   :  { %v2234_v47 = vmul.f32 %v3496_v58, %v3494_v60 }
 0xa63   :  { %v2239_v5 = vpack.c.bf16 %v2234_v47, %v2234_v47 }
 0xa65   :  { %2273 = vmatmul.mubr.bf16.vlgmr.msra.gmra.mrb[68].mxu0 %v2239_v5  ;;  %2314 = vmatmul.mubr.bf16.vlgmr.msra.gmra.mrb[68].mxu1 %v2239_v5 }
 0xa66   :  { %2356 = vmatpush1.bf16.msra.mxu0 %v4547_v0  ;;  %2397 = vmatpush1.bf16.msra.mxu1 %v4549_v44 }
 0xa67   :  { %2357 = vmatprep.subr.bf16.mxu0 %v4555_v8  ;;  %2398 = vmatprep.subr.bf16.mxu1 %v4557_v42 }
 0xa68   :  { %2387 = vmatprep.mubr.bf16.mxu0 %v5134_v56  ;;  %2428 = vmatprep.mubr.bf16.mxu1 %v5134_v56 }
 0xa6a   :  { %2358 = vmatpush1.bf16.msra.mxu0 %v4559_v54  ;;  %2399 = vmatpush1.bf16.msra.mxu1 %v4561_v33 }
 0xa6b   :  { %2359 = vmatprep.subr.bf16.mxu0 %v4567_v10  ;;  %2400 = vmatprep.subr.bf16.mxu1 %v4569_v3 }
 0xa6e   :  { %2360 = vmatpush1.bf16.msra.mxu0 %v4571_v41  ;;  %2401 = vmatpush1.bf16.msra.mxu1 %v4573_v1 }
 0xa6f   :  { %2361 = vmatprep.subr.bf16.mxu0 %v4579_v6  ;;  %2402 = vmatprep.subr.bf16.mxu1 %v4581_v7 }
 0xa72   :  { %2362 = vmatpush1.bf16.msra.mxu0 %v4583_v11  ;;  %2403 = vmatpush1.bf16.msra.mxu1 %v4585_v2 }
 0xa73   :  { %2363 = vmatprep.subr.bf16.mxu0 %v4591_v4  ;;  %2404 = vmatprep.subr.bf16.mxu1 %v4593_v18 }
 0xa76   :  { %2364 = vmatpush1.bf16.msra.mxu0 %v4595_v57  ;;  %2405 = vmatpush1.bf16.msra.mxu1 %v4597_v61 }
 0xa77   :  { %2365 = vmatprep.subr.bf16.mxu0 %v4603_v55  ;;  %2406 = vmatprep.subr.bf16.mxu1 %v4607_v15 }
 0xa7a   :  { %2366 = vmatpush1.bf16.msra.mxu0 %v4605_v22  ;;  %2407 = vmatpush1.bf16.msra.mxu1 %v4609_v16 }
 0xa7b   :  { %2367 = vmatprep.subr.bf16.mxu0 %v4611_v31  ;;  %2408 = vmatprep.subr.bf16.mxu1 %v4615_v17 }
 0xa7e   :  { %2368 = vmatpush1.bf16.msra.mxu0 %v4619_v19  ;;  %2409 = vmatpush1.bf16.msra.mxu1 %v4621_v21 }
 0xa7f   :  { %2369 = vmatprep.subr.bf16.mxu0 %v4625_v23  ;;  %2410 = vmatprep.subr.bf16.mxu1 %v4627_v24 }
 0xa82   :  { %2370 = vmatpush1.bf16.msra.mxu0 %v4631_v25  ;;  %2411 = vmatpush1.bf16.msra.mxu1 %v4633_v26 }
 0xa83   :  { %2470 = vmatprep.subr.bf16.mxu0 %v4543_v63  ;;  %2511 = vmatprep.subr.bf16.mxu1 %v4545_v29 }
 0xb38   :  { %v2274_v20 = vpop.f32.mrb[68].mxu0  ;;  %v2315_v27 = vpop.f32.mrb[68].mxu1 }
 0xb39   :  { %v2322_v30 = vadd.f32 %v2274_v20, %v1688_v59  ;;  %v2324_v62 = vadd.f32 %v2315_v27, %v1761_v38  ;;  %v2276_v46 = vpop.f32.mrb[69].mxu0  ;;  %v2317_v32 = vpop.f32.mrb[69].mxu1 }
 0xb3a   :  { %v2323_v35 = vadd.f32 %v2276_v46, %v1690_v12  ;;  %v2325_v45 = vadd.f32 %v2317_v32, %v1763_v51  ;;  %v2278_v39 = vpop.f32.mrb[70].mxu0  ;;  %v2319_v40 = vpop.f32.mrb[70].mxu1 }
 0xb3b   :  { %v3078_v34 = vmul.f32 -1.442695, %v2322_v30  ;;  %v2279_v36 = vpop.f32.mrb[71].mxu0  ;;  %v2320_v43 = vpop.f32.mrb[71].mxu1  ;;  %v3080_v60 = vmul.f32 -1.442695, %v2324_v62 }
 0xb3c   :  { %v3079_v52 = vmul.f32 -1.442695, %v2323_v35  ;;  %v5186_v35 = vld [vmem:[#allocation14_spill] sm:$0xff]  ;;  %v5187_v39 = vld [vmem:[#allocation15_spill] sm:$0xff] }
 0xb3d   :  { %3497 = vpow2.f32 %v3078_v34  ;;  %v1696_v40 = vadd.f32 %v5187_v39, %v4658_v37  ;;  %v5188_v34 = vld [vmem:[#allocation16_spill] sm:$0xff] }
 0xb3e   :  { %3499 = vpow2.f32 %v3079_v52  ;;  %v1769_v36 = vadd.f32 %v5188_v34, %v4677_v53 }
 0xb3f   :  { %3501 = vtanh.f32 %v2325_v45  ;;  %v1767_v45 = vadd.f32 %v5186_v35, %v4673_v50 }
 0xb40   :  { %3503 = vpow2.f32 %v3080_v60 }
 0xb47   :  { %v3498_v58 = vpop.eup %3497 }
 0xb48   :  { %v2335_v47 = vadd.f32 1.0, %v3498_v58  ;;  %v3500_v5 = vpop.eup %3499 }
 0xb49   :  { %v2336_v48 = vadd.f32 1.0, %v3500_v5  ;;  %v3502_v59 = vpop.eup %3501 }
 0xb4a   :  { %3505 = vrcp.f32 %v2335_v47  ;;  %v3504_v14 = vpop.eup %3503 }
 0xb4b   :  { %3507 = vrcp.f32 %v2336_v48  ;;  %v2337_v9 = vadd.f32 1.0, %v3504_v14 }
 0xb4d   :  { %3509 = vrcp.f32 %v2337_v9 }
 0xb54   :  { %v3506_v38 = vpop.eup %3505 }
 0xb55   :  { %v2346_v28 = vmul.f32 %v3506_v38, %v3502_v59  ;;  %v3508_v12 = vpop.eup %3507 }
 0xb56   :  { %v2345_v51 = vmul.f32 %v3508_v12, %v4828_v49  ;;  %v5185_v49 = vld [vmem:[#allocation13_spill] sm:$0xff] }
 0xb57   :  { %v3510_v27 = vpop.eup %3509  ;;  %v1694_v32 = vadd.f32 %v5185_v49, %v4654_v13 }
 0xb58   :  { %v4874_v20 = vadd.f32 %v2346_v28, %v2345_v51 }
 0xb5a   :  { %3511 = vtanh.f32 %v4874_v20 }
 0xb64   :  { %v3512_v30 = vpop.eup %3511 }
 0xb65   :  { %v2349_v62 = vmul.f32 %v3512_v30, %v3510_v27 }
 0xb67   :  { %v2354_v46 = vpack.c.bf16 %v2349_v62, %v2349_v62 }
 0xb69   :  { %2388 = vmatmul.mubr.bf16.vlgmr.msra.gmra.mrb[72].mxu0 %v2354_v46  ;;  %2429 = vmatmul.mubr.bf16.vlgmr.msra.gmra.mrb[72].mxu1 %v2354_v46 }
 0xb6a   :  { %2471 = vmatpush1.bf16.msra.mxu0 %v4547_v0  ;;  %2512 = vmatpush1.bf16.msra.mxu1 %v4549_v44 }
 0xb6b   :  { %2472 = vmatprep.subr.bf16.mxu0 %v4555_v8  ;;  %2513 = vmatprep.subr.bf16.mxu1 %v4557_v42 }
 0xb6c   :  { %2502 = vmatprep.mubr.bf16.mxu0 %v5134_v56  ;;  %2543 = vmatprep.mubr.bf16.mxu1 %v5134_v56 }
 0xb6e   :  { %2473 = vmatpush1.bf16.msra.mxu0 %v4559_v54  ;;  %2514 = vmatpush1.bf16.msra.mxu1 %v4561_v33 }
 0xb6f   :  { %2474 = vmatprep.subr.bf16.mxu0 %v4567_v10  ;;  %2515 = vmatprep.subr.bf16.mxu1 %v4569_v3 }
 0xb72   :  { %2475 = vmatpush1.bf16.msra.mxu0 %v4571_v41  ;;  %2516 = vmatpush1.bf16.msra.mxu1 %v4573_v1 }
 0xb73   :  { %2476 = vmatprep.subr.bf16.mxu0 %v4579_v6  ;;  %2517 = vmatprep.subr.bf16.mxu1 %v4581_v7 }
 0xb76   :  { %2477 = vmatpush1.bf16.msra.mxu0 %v4583_v11  ;;  %2518 = vmatpush1.bf16.msra.mxu1 %v4585_v2 }
 0xb77   :  { %2478 = vmatprep.subr.bf16.mxu0 %v4591_v4  ;;  %2519 = vmatprep.subr.bf16.mxu1 %v4593_v18 }
 0xb7a   :  { %2479 = vmatpush1.bf16.msra.mxu0 %v4595_v57  ;;  %2520 = vmatpush1.bf16.msra.mxu1 %v4597_v61 }
 0xb7b   :  { %2480 = vmatprep.subr.bf16.mxu0 %v4603_v55  ;;  %2521 = vmatprep.subr.bf16.mxu1 %v4607_v15 }
 0xb7e   :  { %2481 = vmatpush1.bf16.msra.mxu0 %v4605_v22  ;;  %2522 = vmatpush1.bf16.msra.mxu1 %v4609_v16 }
 0xb7f   :  { %2482 = vmatprep.subr.bf16.mxu0 %v4611_v31  ;;  %2523 = vmatprep.subr.bf16.mxu1 %v4615_v17 }
 0xb82   :  { %2483 = vmatpush1.bf16.msra.mxu0 %v4619_v19  ;;  %2524 = vmatpush1.bf16.msra.mxu1 %v4621_v21 }
 0xb83   :  { %2484 = vmatprep.subr.bf16.mxu0 %v4625_v23  ;;  %2525 = vmatprep.subr.bf16.mxu1 %v4627_v24 }
 0xb86   :  { %2485 = vmatpush1.bf16.msra.mxu0 %v4631_v25  ;;  %2526 = vmatpush1.bf16.msra.mxu1 %v4633_v26 }
 0xb87   :  { %2585 = vmatprep.subr.bf16.mxu0 %v4543_v63  ;;  %2626 = vmatprep.subr.bf16.mxu1 %v4545_v29 }
 0xc3c   :  { %v2389_v43 = vpop.f32.mrb[72].mxu0  ;;  %v2430_v52 = vpop.f32.mrb[72].mxu1 }
 0xc3d   :  { %v2437_v60 = vadd.f32 %v2389_v43, %v1694_v32  ;;  %v2439_v58 = vadd.f32 %v2430_v52, %v1767_v45  ;;  %v2391_v47 = vpop.f32.mrb[73].mxu0  ;;  %v2432_v63 = vpop.f32.mrb[73].mxu1 }
 0xc3e   :  { %v2438_v5 = vadd.f32 %v2391_v47, %v1696_v40  ;;  %v2440_v29 = vadd.f32 %v2432_v63, %v1769_v36  ;;  %v2393_v48 = vpop.f32.mrb[74].mxu0  ;;  %v2434_v59 = vpop.f32.mrb[74].mxu1 }
 0xc3f   :  { %v3081_v14 = vmul.f32 -1.442695, %v2437_v60  ;;  %v2394_v38 = vpop.f32.mrb[75].mxu0  ;;  %v2435_v28 = vpop.f32.mrb[75].mxu1  ;;  %v3083_v9 = vmul.f32 -1.442695, %v2439_v58 }
 0xc40   :  { %v3082_v12 = vmul.f32 -1.442695, %v2438_v5 }
 0xc41   :  { %3513 = vpow2.f32 %v3081_v14 }
 0xc42   :  { %3515 = vpow2.f32 %v3082_v12  ;;  %v3607_v12 = vld [vmem:[#allocation4] ss:$16 sps:$4 sm:$0xff]  }
 0xc43   :  { %3517 = vtanh.f32 %v2440_v29 }
 0xc44   :  { %3519 = vpow2.f32 %v3083_v9  ;;  %v3608_v9 = vld [vmem:[#allocation4 + $0x8] ss:$16 sps:$4 sm:$0xff]  }
 0xc4b   :  { %v3514_v51 = vpop.eup %3513 }
 0xc4c   :  { %v2450_v27 = vadd.f32 1.0, %v3514_v51  ;;  %v3516_v30 = vpop.eup %3515  ;;  %v3609_v51 = vld [vmem:[#allocation4 + $0x24] ss:$16 sps:$4 sm:$0xff]  }
 0xc4d   :  { %v2451_v62 = vadd.f32 1.0, %v3516_v30  ;;  %v3518_v46 = vpop.eup %3517  ;;  %v3611_v30 = vld [vmem:[#allocation4 + $0x20] ss:$16 sps:$4 sm:$0xff]  }
 0xc4e   :  { %3521 = vrcp.f32 %v2450_v27  ;;  %v3520_v49 = vpop.eup %3519  ;;  %v3610_v27 = vld [vmem:[#allocation4 + $0x2c] ss:$16 sps:$4 sm:$0xff]  }
 0xc4f   :  { %3523 = vrcp.f32 %v2451_v62  ;;  %v2452_v39 = vadd.f32 1.0, %v3520_v49  ;;  %v3612_v62 = vld [vmem:[#allocation4 + $0x28] ss:$16 sps:$4 sm:$0xff]   ;;  %v3614_v49 = vld [vmem:[#allocation4 + $0x4c] ss:$16 sps:$4 sm:$0xff]  }
 0xc51   :  { %3525 = vrcp.f32 %v2452_v39  ;;  %v3618_v39 = vld [vmem:[#allocation4 + $0x6c] ss:$16 sps:$4 sm:$0xff]  }
 0xc58   :  { %v3522_v32 = vpop.eup %3521 }
 0xc59   :  { %v2461_v35 = vmul.f32 %v3522_v32, %v3518_v46  ;;  %v3524_v45 = vpop.eup %3523  ;;  %v3613_v46 = vld [vmem:[#allocation4 + $0x44] ss:$16 sps:$4 sm:$0xff]   ;;  %v3615_v32 = vld [vmem:[#allocation4 + $0x40] ss:$16 sps:$4 sm:$0xff]  }
 0xc5a   :  { %v2460_v40 = vmul.f32 %v3524_v45, %v4874_v20  ;;  %v3617_v45 = vld [vmem:[#allocation4 + $0x64] ss:$16 sps:$4 sm:$0xff]  }
 0xc5b   :  { %v3526_v36 = vpop.eup %3525 }
 0xc5c   :  { %v4920_v34 = vadd.f32 %v2461_v35, %v2460_v40  ;;  %v3616_v35 = vld [vmem:[#allocation4 + $0x48] ss:$16 sps:$4 sm:$0xff]   ;;  %v3619_v40 = vld [vmem:[#allocation4 + $0x60] ss:$16 sps:$4 sm:$0xff]  }
 0xc5e   :  { %3527 = vtanh.f32 %v4920_v34 }
 0xc68   :  { %v3528_v43 = vpop.eup %3527 }
 0xc69   :  { %v2464_v52 = vmul.f32 %v3528_v43, %v3526_v36  ;;  %v3622_v36 = vld [vmem:[#allocation4 + $0x8c] ss:$16 sps:$4 sm:$0xff]   ;;  %v3623_v43 = vld [vmem:[#allocation4 + $0x80] ss:$16 sps:$4 sm:$0xff]  }
 0xc6b   :  { %v2469_v60 = vpack.c.bf16 %v2464_v52, %v2464_v52  ;;  %v3624_v52 = vld [vmem:[#allocation4 + $0x88] ss:$16 sps:$4 sm:$0xff]  }
 0xc6d   :  { %2503 = vmatmul.mubr.bf16.vlgmr.msra.gmra.mrb[76].mxu0 %v2469_v60  ;;  %2544 = vmatmul.mubr.bf16.vlgmr.msra.gmra.mrb[76].mxu1 %v2469_v60  ;;  %v3625_v60 = vld [vmem:[#allocation4 + $0xa4] ss:$16 sps:$4 sm:$0xff]  }
 0xc6e   :  { %2586 = vmatpush1.bf16.msra.mxu0 %v4547_v0  ;;  %2627 = vmatpush1.bf16.msra.mxu1 %v4549_v44  ;;  %v3605_v0 = vld [vmem:[#allocation4 + $0x4] ss:$16 sps:$4 sm:$0xff]   ;;  %v3606_v44 = vld [vmem:[#allocation4 + $0xc] ss:$16 sps:$4 sm:$0xff]  }
 0xc6f   :  { %2587 = vmatprep.subr.bf16.mxu0 %v4555_v8  ;;  %2628 = vmatprep.subr.bf16.mxu1 %v4557_v42  ;;  %v5189_v8 = vld [vmem:[#allocation17_spill] sm:$0xff] }
 0xc70   :  { %2617 = vmatprep.mubr.bf16.mxu0 %v5134_v56  ;;  %2658 = vmatprep.mubr.bf16.mxu1 %v5134_v56  ;;  %v1698_v42 = vadd.f32 %v5189_v8, %v4654_v13  ;;  %v3628_v8 = vld [vmem:[#allocation4 + $0xa8] ss:$16 sps:$4 sm:$0xff]  }
 0xc72   :  { %2588 = vmatpush1.bf16.msra.mxu0 %v4559_v54  ;;  %2629 = vmatpush1.bf16.msra.mxu1 %v4561_v33  ;;  %v5190_v54 = vld [vmem:[#allocation18_spill] sm:$0xff] }
 0xc73   :  { %2589 = vmatprep.subr.bf16.mxu0 %v4567_v10  ;;  %2630 = vmatprep.subr.bf16.mxu1 %v4569_v3  ;;  %v1771_v33 = vadd.f32 %v5190_v54, %v4673_v50  ;;  %v5191_v10 = vld [vmem:[#allocation19_spill] sm:$0xff]  ;;  %v3630_v54 = vld [vmem:[#allocation4 + $0xcc] ss:$16 sps:$4 sm:$0xff]  }
 0xc74   :  { %v1700_v3 = vadd.f32 %v5191_v10, %v4658_v37  ;;  %v3632_v10 = vld [vmem:[#allocation4 + $0xc8] ss:$16 sps:$4 sm:$0xff]  }
 0xc76   :  { %2590 = vmatpush1.bf16.msra.mxu0 %v4571_v41  ;;  %2631 = vmatpush1.bf16.msra.mxu1 %v4573_v1  ;;  %v5192_v41 = vld [vmem:[#allocation20_spill] sm:$0xff] }
 0xc77   :  { %2591 = vmatprep.subr.bf16.mxu0 %v4579_v6  ;;  %2632 = vmatprep.subr.bf16.mxu1 %v4581_v7  ;;  %v1773_v1 = vadd.f32 %v5192_v41, %v4677_v53  ;;  %v3634_v41 = vld [vmem:[#allocation4 + $0xec] ss:$16 sps:$4 sm:$0xff]  }
 0xc7a   :  { %2592 = vmatpush1.bf16.msra.mxu0 %v4583_v11  ;;  %2633 = vmatpush1.bf16.msra.mxu1 %v4585_v2 }
 0xc7b   :  { %2593 = vmatprep.subr.bf16.mxu0 %v4591_v4  ;;  %2634 = vmatprep.subr.bf16.mxu1 %v4593_v18 }
 0xc7e   :  { %2594 = vmatpush1.bf16.msra.mxu0 %v4595_v57  ;;  %2635 = vmatpush1.bf16.msra.mxu1 %v4597_v61 }
 0xc7f   :  { %2595 = vmatprep.subr.bf16.mxu0 %v4603_v55  ;;  %2636 = vmatprep.subr.bf16.mxu1 %v4607_v15 }
 0xc82   :  { %2596 = vmatpush1.bf16.msra.mxu0 %v4605_v22  ;;  %2637 = vmatpush1.bf16.msra.mxu1 %v4609_v16 }
 0xc83   :  { %2597 = vmatprep.subr.bf16.mxu0 %v4611_v31  ;;  %2638 = vmatprep.subr.bf16.mxu1 %v4615_v17 }
 0xc86   :  { %2598 = vmatpush1.bf16.msra.mxu0 %v4619_v19  ;;  %2639 = vmatpush1.bf16.msra.mxu1 %v4621_v21 }
 0xc87   :  { %2599 = vmatprep.subr.bf16.mxu0 %v4625_v23  ;;  %2640 = vmatprep.subr.bf16.mxu1 %v4627_v24 }
 0xc8a   :  { %2600 = vmatpush1.bf16.msra.mxu0 %v4631_v25  ;;  %2641 = vmatpush1.bf16.msra.mxu1 %v4633_v26 }
 0xc8b   :  { %2700 = vmatprep.subr.bf16.mxu0 %v3605_v0  ;;  %2741 = vmatprep.subr.bf16.mxu1 %v3606_v44  ;;  %v3626_v0 = vld [vmem:[#allocation4 + $0xac] ss:$16 sps:$4 sm:$0xff]   ;;  %v3627_v44 = vld [vmem:[#allocation4 + $0xa0] ss:$16 sps:$4 sm:$0xff]  }
 0xd40   :  { %v2504_v6 = vpop.f32.mrb[76].mxu0  ;;  %v2545_v7 = vpop.f32.mrb[76].mxu1 }
 0xd41   :  { %v2552_v11 = vadd.f32 %v2504_v6, %v1698_v42  ;;  %v2554_v2 = vadd.f32 %v2545_v7, %v1771_v33  ;;  %v2506_v4 = vpop.f32.mrb[77].mxu0  ;;  %v2547_v18 = vpop.f32.mrb[77].mxu1  ;;  %v3629_v42 = vld [vmem:[#allocation4 + $0xc4] ss:$16 sps:$4 sm:$0xff]   ;;  %v3631_v33 = vld [vmem:[#allocation4 + $0xc0] ss:$16 sps:$4 sm:$0xff]  }
 0xd42   :  { %v2553_v57 = vadd.f32 %v2506_v4, %v1700_v3  ;;  %v2555_v61 = vadd.f32 %v2547_v18, %v1773_v1  ;;  %v2508_v55 = vpop.f32.mrb[78].mxu0  ;;  %v2549_v22 = vpop.f32.mrb[78].mxu1  ;;  %v3633_v3 = vld [vmem:[#allocation4 + $0xe4] ss:$16 sps:$4 sm:$0xff]   ;;  %v3635_v1 = vld [vmem:[#allocation4 + $0xe0] ss:$16 sps:$4 sm:$0xff]  }
 0xd43   :  { %v3084_v15 = vmul.f32 -1.442695, %v2552_v11  ;;  %v2509_v16 = vpop.f32.mrb[79].mxu0  ;;  %v2550_v31 = vpop.f32.mrb[79].mxu1  ;;  %v3086_v19 = vmul.f32 -1.442695, %v2554_v2 }
 0xd44   :  { %v3085_v17 = vmul.f32 -1.442695, %v2553_v57  ;;  %v3636_v6 = vld [vmem:[#allocation4 + $0xe8] ss:$16 sps:$4 sm:$0xff]   ;;  %v5193_v7 = vld [vmem:[#allocation21_spill] sm:$0xff] }
 0xd45   :  { %3529 = vpow2.f32 %v3084_v15  ;;  %v1704_v11 = vadd.f32 %v5193_v7, %v4654_v13  ;;  %v5194_v2 = vld [vmem:[#allocation24_spill] sm:$0xff]  ;;  %v2816_v7 = vld [vmem:[%s5100_s7 + $0x30] sm:$0xff] }
 0xd46   :  { %3531 = vpow2.f32 %v3085_v17  ;;  %v1777_v4 = vadd.f32 %v5194_v2, %v4673_v50  ;;  %v5195_v18 = vld [vmem:[#allocation8_spill] sm:$0xff] }
 0xd47   :  { %3533 = vtanh.f32 %v2555_v61  ;;  %v1706_v57 = vadd.f32 %v5195_v18, %v4658_v37  ;;  %v5196_v61 = vld [vmem:[#allocation23_spill] sm:$0xff]  ;;  %v2835_v18 = vld [vmem:[%s5100_s7 + $0xc8] sm:$0xff] }
 0xd48   :  { %3535 = vpow2.f32 %v3086_v19  ;;  %v1779_v55 = vadd.f32 %v5196_v61, %v4677_v53  ;;  %v2818_v61 = vld [vmem:[%s5100_s7 + $0x40] sm:$0xff] }
 0xd4f   :  { %v3530_v21 = vpop.eup %3529 }
 0xd50   :  { %v2565_v23 = vadd.f32 1.0, %v3530_v21  ;;  %v3532_v24 = vpop.eup %3531 }
 0xd51   :  { %v2566_v25 = vadd.f32 1.0, %v3532_v24  ;;  %v3534_v26 = vpop.eup %3533 }
 0xd52   :  { %3537 = vrcp.f32 %v2565_v23  ;;  %v3536_v20 = vpop.eup %3535 }
 0xd53   :  { %3539 = vrcp.f32 %v2566_v25  ;;  %v2567_v5 = vadd.f32 1.0, %v3536_v20 }
 0xd55   :  { %3541 = vrcp.f32 %v2567_v5 }
 0xd5c   :  { %v3538_v58 = vpop.eup %3537 }
 0xd5d   :  { %v2576_v47 = vmul.f32 %v3538_v58, %v3534_v26  ;;  %v3540_v63 = vpop.eup %3539 }
 0xd5e   :  { %v2575_v29 = vmul.f32 %v3540_v63, %v4920_v34  ;;  %v3620_v34 = vld [vmem:[#allocation4 + $0x68] ss:$16 sps:$4 sm:$0xff]  }
 0xd5f   :  { %v3542_v59 = vpop.eup %3541 }
 0xd60   :  { %v4964_v48 = vadd.f32 %v2576_v47, %v2575_v29 }
 0xd62   :  { %3543 = vtanh.f32 %v4964_v48 }
 0xd6c   :  { %v3544_v14 = vpop.eup %3543 }
 0xd6d   :  { %v2579_v38 = vmul.f32 %v3544_v14, %v3542_v59 }
 0xd6f   :  { %v2584_v28 = vpack.c.bf16 %v2579_v38, %v2579_v38 }
 0xd71   :  { %2618 = vmatmul.mubr.bf16.vlgmr.msra.gmra.mrb[80].mxu0 %v2584_v28  ;;  %2659 = vmatmul.mubr.bf16.vlgmr.msra.gmra.mrb[80].mxu1 %v2584_v28 }
 0xd72   :  { %2701 = vmatpush1.bf16.msra.mxu0 %v3607_v12  ;;  %2742 = vmatpush1.bf16.msra.mxu1 %v3608_v9 }
 0xd73   :  { %2702 = vmatprep.subr.bf16.mxu0 %v3609_v51  ;;  %2743 = vmatprep.subr.bf16.mxu1 %v3610_v27 }
 0xd74   :  { %2732 = vmatprep.mubr.bf16.mxu0 %v5134_v56  ;;  %2773 = vmatprep.mubr.bf16.mxu1 %v5134_v56  ;;  %v3621_v56 = vld [vmem:[#allocation4 + $0x84] ss:$16 sps:$4 sm:$0xff]  }
 0xd76   :  { %2703 = vmatpush1.bf16.msra.mxu0 %v3611_v30  ;;  %2744 = vmatpush1.bf16.msra.mxu1 %v3612_v62 }
 0xd77   :  { %2704 = vmatprep.subr.bf16.mxu0 %v3613_v46  ;;  %2745 = vmatprep.subr.bf16.mxu1 %v3614_v49 }
 0xd7a   :  { %2705 = vmatpush1.bf16.msra.mxu0 %v3615_v32  ;;  %2746 = vmatpush1.bf16.msra.mxu1 %v3616_v35 }
 0xd7b   :  { %2706 = vmatprep.subr.bf16.mxu0 %v3617_v45  ;;  %2747 = vmatprep.subr.bf16.mxu1 %v3618_v39  ;;  %v2826_v45 = vld [vmem:[%s5100_s7 + $0x80] sm:$0xff]  ;;  %v2827_v39 = vld [vmem:[%s5100_s7 + $0x88] sm:$0xff] }
 0xd7e   :  { %2707 = vmatpush1.bf16.msra.mxu0 %v3619_v40  ;;  %2748 = vmatpush1.bf16.msra.mxu1 %v3620_v34  ;;  %v2810_v40 = vld [vmem:[%s5100_s7] sm:$0xff]  ;;  %v2811_v34 = vld [vmem:[%s5100_s7 + $0x8] sm:$0xff] }
 0xd7f   :  { %2708 = vmatprep.subr.bf16.mxu0 %v3621_v56  ;;  %2749 = vmatprep.subr.bf16.mxu1 %v3622_v36  ;;  %v3131_v56 = vpack.c.bf16 %v2811_v34, %v2810_v40  ;;  %v2828_v36 = vld [vmem:[%s5100_s7 + $0x90] sm:$0xff] }
 0xd82   :  { %2709 = vmatpush1.bf16.msra.mxu0 %v3623_v43  ;;  %2750 = vmatpush1.bf16.msra.mxu1 %v3624_v52  ;;  %v2829_v43 = vld [vmem:[%s5100_s7 + $0x98] sm:$0xff] }
 0xd83   :  { %2710 = vmatprep.subr.bf16.mxu0 %v3625_v60  ;;  %2751 = vmatprep.subr.bf16.mxu1 %v3626_v0  ;;  %v3133_v52 = vpack.c.bf16 %v2829_v43, %v2828_v36  ;;  %v2812_v60 = vld [vmem:[%s5100_s7 + $0x10] sm:$0xff]  ;;  %v2813_v0 = vld [vmem:[%s5100_s7 + $0x18] sm:$0xff] }
 0xd86   :  { %2711 = vmatpush1.bf16.msra.mxu0 %v3627_v44  ;;  %2752 = vmatpush1.bf16.msra.mxu1 %v3628_v8  ;;  %v3135_v44 = vpack.c.bf16 %v2813_v0, %v2812_v60  ;;  %v2830_v8 = vld [vmem:[%s5100_s7 + $0xa0] sm:$0xff] }
 0xd87   :  { %2712 = vmatprep.subr.bf16.mxu0 %v3629_v42  ;;  %2753 = vmatprep.subr.bf16.mxu1 %v3630_v54  ;;  %v2831_v42 = vld [vmem:[%s5100_s7 + $0xa8] sm:$0xff] }
 0xd88   :  { %v3137_v54 = vpack.c.bf16 %v2831_v42, %v2830_v8 }
 0xd8a   :  { %2713 = vmatpush1.bf16.msra.mxu0 %v3631_v33  ;;  %2754 = vmatpush1.bf16.msra.mxu1 %v3632_v10  ;;  %v2814_v33 = vld [vmem:[%s5100_s7 + $0x20] sm:$0xff]  ;;  %v2815_v10 = vld [vmem:[%s5100_s7 + $0x28] sm:$0xff] }
 0xd8b   :  { %2714 = vmatprep.subr.bf16.mxu0 %v3633_v3  ;;  %2755 = vmatprep.subr.bf16.mxu1 %v3634_v41  ;;  %v3139_v3 = vpack.c.bf16 %v2815_v10, %v2814_v33  ;;  %v2832_v41 = vld [vmem:[%s5100_s7 + $0xb0] sm:$0xff] }
 0xd8e   :  { %2715 = vmatpush1.bf16.msra.mxu0 %v3635_v1  ;;  %2756 = vmatpush1.bf16.msra.mxu1 %v3636_v6  ;;  %v2833_v1 = vld [vmem:[%s5100_s7 + $0xb8] sm:$0xff] }
 0xd8f   :  { %v3141_v6 = vpack.c.bf16 %v2833_v1, %v2832_v41 }
 0xe44   :  { %v2619_v22 = vpop.f32.mrb[80].mxu0  ;;  %v2660_v15 = vpop.f32.mrb[80].mxu1 }
 0xe45   :  { %v2667_v16 = vadd.f32 %v2619_v22, %v1704_v11  ;;  %v2669_v31 = vadd.f32 %v2660_v15, %v1777_v4  ;;  %v2621_v17 = vpop.f32.mrb[81].mxu0  ;;  %v2662_v19 = vpop.f32.mrb[81].mxu1  ;;  %v2817_v11 = vld [vmem:[%s5100_s7 + $0x38] sm:$0xff]  ;;  %v2834_v4 = vld [vmem:[%s5100_s7 + $0xc0] sm:$0xff]  ;;  %v2836_v15 = vld [vmem:[%s5100_s7 + $0xd0] sm:$0xff] }
 0xe46   :  { %v2668_v21 = vadd.f32 %v2621_v17, %v1706_v57  ;;  %v2670_v23 = vadd.f32 %v2662_v19, %v1779_v55  ;;  %v2623_v24 = vpop.f32.mrb[82].mxu0  ;;  %v2664_v25 = vpop.f32.mrb[82].mxu1  ;;  %v3143_v2 = vpack.c.bf16 %v2817_v11, %v2816_v7  ;;  %v3145_v57 = vpack.c.bf16 %v2835_v18, %v2834_v4  ;;  %v2819_v55 = vld [vmem:[%s5100_s7 + $0x48] sm:$0xff]  ;;  %v2820_v17 = vld [vmem:[%s5100_s7 + $0x50] sm:$0xff]  ;;  %v2821_v19 = vld [vmem:[%s5100_s7 + $0x58] sm:$0xff] }
 0xe47   :  { %v3087_v26 = vmul.f32 -1.442695, %v2667_v16  ;;  %v2624_v20 = vpop.f32.mrb[83].mxu0  ;;  %v2665_v58 = vpop.f32.mrb[83].mxu1  ;;  %v3089_v63 = vmul.f32 -1.442695, %v2669_v31  ;;  %v3147_v22 = vpack.c.bf16 %v2819_v55, %v2818_v61 }
 0xe48   :  { %v3088_v47 = vmul.f32 -1.442695, %v2668_v21  ;;  %v2837_v16 = vld [vmem:[%s5100_s7 + $0xd8] sm:$0xff]  ;;  %v2838_v21 = vld [vmem:[%s5100_s7 + $0xe0] sm:$0xff]  ;;  %v2839_v24 = vld [vmem:[%s5100_s7 + $0xe8] sm:$0xff] }
 0xe49   :  { %3545 = vpow2.f32 %v3087_v26  ;;  %v3149_v31 = vpack.c.bf16 %v2837_v16, %v2836_v15  ;;  %v2822_v25 = vld [vmem:[%s5100_s7 + $0x60] sm:$0xff]  ;;  %v2823_v26 = vld [vmem:[%s5100_s7 + $0x68] sm:$0xff]  ;;  %v3153_v20 = vpack.c.bf16 %v2839_v24, %v2838_v21  ;;  %v2840_v58 = vld [vmem:[%s5100_s7 + $0xf0] sm:$0xff] }
 0xe4a   :  { %3547 = vpow2.f32 %v3088_v47  ;;  %v2841_v47 = vld [vmem:[%s5100_s7 + $0xf8] sm:$0xff]  ;;  %v3093_v18 = vld [vmem:[%s5101_s8] ss:$0 sm:$0xff] }
 0xe4b   :  { %3549 = vtanh.f32 %v2670_v23  ;;  %v3151_v23 = vpack.c.bf16 %v2821_v19, %v2820_v17 }
 0xe4c   :  { %3551 = vpow2.f32 %v3089_v63  ;;  %v3155_v63 = vpack.c.bf16 %v2823_v26, %v2822_v25 }
 0xe53   :  { %v3546_v5 = vpop.eup %3545 }
 0xe54   :  { %v2680_v29 = vadd.f32 1.0, %v3546_v5  ;;  %v3548_v59 = vpop.eup %3547  ;;  %v3157_v5 = vpack.c.bf16 %v2841_v47, %v2840_v58 }
 0xe55   :  { %v2681_v14 = vadd.f32 1.0, %v3548_v59  ;;  %v3550_v38 = vpop.eup %3549  ;;  %v2825_v59 = vld [vmem:[%s5100_s7 + $0x78] sm:$0xff] }
 0xe56   :  { %3553 = vrcp.f32 %v2680_v29  ;;  %v3552_v28 = vpop.eup %3551  ;;  %v2824_v29 = vld [vmem:[%s5100_s7 + $0x70] sm:$0xff] }
 0xe57   :  { %3555 = vrcp.f32 %v2681_v14  ;;  %v2682_v27 = vadd.f32 1.0, %v3552_v28  ;;  %v3159_v14 = vpack.c.bf16 %v2825_v59, %v2824_v29 }
 0xe59   :  { %3557 = vrcp.f32 %v2682_v27 }
 0xe60   :  { %v3554_v12 = vpop.eup %3553 }
 0xe61   :  { %v2691_v9 = vmul.f32 %v3554_v12, %v3550_v38  ;;  %v3556_v51 = vpop.eup %3555  ;;  %v5197_v38 = vld [vmem:[#allocation26_spill] sm:$0xff]  ;;  %v5198_v12 = vld [vmem:[#allocation25_spill] sm:$0xff] }
 0xe62   :  { %v2690_v30 = vmul.f32 %v3556_v51, %v4964_v48  ;;  %v3129_v48 = vpack.c.bf16 %v2827_v39, %v2826_v45  ;;  %v1708_v28 = vadd.f32 %v5197_v38, %v4654_v13  ;;  %v5199_v51 = vld [vmem:[#allocation27_spill] sm:$0xff] }
 0xe63   :  { %v3558_v46 = vpop.eup %3557  ;;  %v1710_v27 = vadd.f32 %v5199_v51, %v4658_v37 }
 0xe64   :  { %v4978_v62 = vadd.f32 %v2691_v9, %v2690_v30  ;;  %3130 = vmatprep.subr.bf16.mxu0 %v3129_v48  ;;  %v1781_v9 = vadd.f32 %v5198_v12, %v4673_v50  ;;  %v5200_v30 = vld [vmem:[#allocation7_spill] sm:$0xff] }
 0xe66   :  { %3559 = vtanh.f32 %v4978_v62 }
 0xe70   :  { %v3560_v49 = vpop.eup %3559 }
 0xe71   :  { %v2694_v32 = vmul.f32 %v3560_v49, %v3558_v46  ;;  %v1783_v46 = vadd.f32 %v5200_v30, %v4677_v53 }
 0xe73   :  { %v2699_v35 = vpack.c.bf16 %v2694_v32, %v2694_v32 }
 0xe75   :  { %2733 = vmatmul.mubr.bf16.vlgmr.msra.gmra.mrb[84].mxu0 %v2699_v35  ;;  %2774 = vmatmul.mubr.bf16.vlgmr.msra.gmra.mrb[84].mxu1 %v2699_v35 }
 0xe76   :  { %3132 = vmatpush3.bf16.msra.mxu0 %v3131_v56 }
 0xe77   :  { %3134 = vmatprep.subr.bf16.mxu0 %v3133_v52 }
 0xe7a   :  { %3136 = vmatpush3.bf16.msra.mxu0 %v3135_v44 }
 0xe7b   :  { %3138 = vmatprep.subr.bf16.mxu0 %v3137_v54 }
 0xe7e   :  { %3140 = vmatpush3.bf16.msra.mxu0 %v3139_v3 }
 0xe7f   :  { %3142 = vmatprep.subr.bf16.mxu0 %v3141_v6 }
 0xe82   :  { %3144 = vmatpush3.bf16.msra.mxu0 %v3143_v2  ;;  %v5201_v2 = vld [vmem:[#allocation22_spill] sm:$0xff] }
 0xe83   :  { %3146 = vmatprep.subr.bf16.mxu0 %v3145_v57 }
 0xe86   :  { %3148 = vmatpush3.bf16.msra.mxu0 %v3147_v22 }
 0xe87   :  { %3150 = vmatprep.subr.bf16.mxu0 %v3149_v31 }
 0xe8a   :  { %3152 = vmatpush3.bf16.msra.mxu0 %v3151_v23 }
 0xe8b   :  { %3154 = vmatprep.subr.bf16.mxu0 %v3153_v20 }
 0xe8e   :  { %3156 = vmatpush3.bf16.msra.mxu0 %v3155_v63 }
 0xe8f   :  { %3158 = vmatprep.subr.bf16.mxu0 %v3157_v5 }
 0xe92   :  { %3160 = vmatpush3.bf16.msra.mxu0 %v3159_v14 }
 0xf48   :  { %v2734_v49 = vpop.f32.mrb[84].mxu0  ;;  %v2775_v32 = vpop.f32.mrb[84].mxu1 }
 0xf49   :  { %v2782_v35 = vadd.f32 %v2734_v49, %v1708_v28  ;;  %v2784_v45 = vadd.f32 %v2775_v32, %v1781_v9  ;;  %v2736_v39 = vpop.f32.mrb[85].mxu0  ;;  %v2777_v48 = vpop.f32.mrb[85].mxu1 }
 0xf4a   :  { %v2783_v40 = vadd.f32 %v2736_v39, %v1710_v27  ;;  %v2785_v34 = vadd.f32 %v2777_v48, %v1783_v46  ;;  %v2738_v56 = vpop.f32.mrb[86].mxu0  ;;  %v2779_v36 = vpop.f32.mrb[86].mxu1 }
 0xf4b   :  { %v3090_v13 = vmul.f32 -1.442695, %v2782_v35  ;;  %v2739_v43 = vpop.f32.mrb[87].mxu0  ;;  %v2780_v52 = vpop.f32.mrb[87].mxu1  ;;  %v3092_v37 = vmul.f32 -1.442695, %v2784_v45 }
 0xf4c   :  { %v3091_v50 = vmul.f32 -1.442695, %v2783_v40 }
 0xf4d   :  { %3561 = vpow2.f32 %v3090_v13 }
 0xf4e   :  { %3563 = vpow2.f32 %v3091_v50 }
 0xf4f   :  { %3565 = vtanh.f32 %v2785_v34 }
 0xf50   :  { %3567 = vpow2.f32 %v3092_v37 }
 0xf57   :  { %v3562_v60 = vpop.eup %3561 }
 0xf58   :  { %v2795_v0 = vadd.f32 1.0, %v3562_v60  ;;  %v3564_v53 = vpop.eup %3563 }
 0xf59   :  { %v2796_v44 = vadd.f32 1.0, %v3564_v53  ;;  %v3566_v8 = vpop.eup %3565 }
 0xf5a   :  { %3569 = vrcp.f32 %v2795_v0  ;;  %v3568_v42 = vpop.eup %3567 }
 0xf5b   :  { %3571 = vrcp.f32 %v2796_v44  ;;  %v2797_v3 = vadd.f32 1.0, %v3568_v42 }
 0xf5d   :  { %3573 = vrcp.f32 %v2797_v3 }
 0xf64   :  { %v3570_v54 = vpop.eup %3569 }
 0xf65   :  { %v2806_v33 = vmul.f32 %v3570_v54, %v3566_v8  ;;  %v3572_v10 = vpop.eup %3571 }
 0xf66   :  { %v2805_v41 = vmul.f32 %v3572_v10, %v4978_v62 }
 0xf67   :  { %v3574_v6 = vpop.eup %3573 }
 0xf68   :  { %v2807_v1 = vadd.f32 %v2806_v33, %v2805_v41 }
 0xf6a   :  { %3575 = vtanh.f32 %v2807_v1 }
 0xf74   :  { %v3576_v7 = vpop.eup %3575 }
 0xf75   :  { %v2809_v11 = vmul.f32 %v3576_v7, %v3574_v6 }
 0xf77   :  { %2913 = vmatprep.mubr.f32.mxu0 %v2809_v11 }
 0xf78   :  { %2914 = vmatmul.mubr.f32.vlgmr.msra.gmra.mrb[88].mxu0 %v5201_v2 }
0x104b   :  { %v3126_v4 = vpop.f32.mrb[88].mxu0 }
0x104c   :  { %v3127_v57 = vpop.f32.mrb[89].mxu0 }
0x104d   :  { %v3128_v61 = vadd.f32 %v3127_v57, %v3126_v4 }
0x104f   :  { %v2916_v55 = vadd.f32 %v3128_v61, %v3093_v18 }
0x1051   :  { %2920 = vst.msk [vmem:[%s5102_s9] sm:$0xff] %vm2919_vm1, %v2916_v55 }
0x1052   :  { %2925 = vsyncpa [#allocation5], 1 }

</bundles_post_ra>
